<compile_context>
chip_gen: v6e
topology: v6e:2x2x1
jax: 0.10.0
libtpu: 0.0.40
codegen_flags: <defaults>
</compile_context>

<pallas_src>
import math

import jax
import jax.numpy as jnp
from jax import lax
from jax.experimental import pallas as pl
from jax.experimental.pallas import tpu as pltpu

# ---- small, module-consistent hyper-parameters ------------------------------
BATCH = 2
CHANNELS = 3              # RGB
IMG_H = 16                # sequence length == rgb_combinator_config.feed_forward_dimensions
D_MODEL = 128             # image width    == rgb_combinator_config.d_model
FF_RGB = IMG_H            # RGB-encoder FFN hidden size (tied to image height by the config)
FF_HIDDEN = 64            # FFN hidden size of hidden_transformer0 / hidden_transformer1
FF_PAD = 128              # FFN hidden sizes zero-padded to a lane-dense 128
LN_EPS = 1e-5

# packed-parameter layout
_W_BLOCKS_PER_ENC = 6     # [wq|wk|wv] (3 lanes-of-128) + wo + w1 + w2
_B_ROWS_PER_ENC = 10      # bq, bk, bv, bo, ln1_g, ln1_b, b1, b2, ln2_g, ln2_b
_N_ENC = 3                # rgb_encoder, tr0, tr1
_OUTER_LN_ROW0 = _N_ENC * _B_ROWS_PER_ENC   # ln0_g, ln0_b, ln1_g, ln1_b, ln2_g, ln2_b


# ---- shared in-kernel math ---------------------------------------------------
def _layernorm(x, gamma, beta):
    """Single-pass LayerNorm: mean and E[x^2] in one sweep, f32 accumulation."""
    inv_n = 1.0 / x.shape[-1]
    mu = jnp.sum(x, axis=-1, keepdims=True) * inv_n
    ex2 = jnp.sum(x * x, axis=-1, keepdims=True) * inv_n
    var = jnp.maximum(ex2 - mu * mu, 0.0)
    return (x - mu) * lax.rsqrt(var + LN_EPS) * gamma + beta


def _brow(b_ref, i):
    """Load packed bias/LN row i as a (1, D) f32 slab (static index)."""
    return b_ref[i:i + 1, :]


def _encoder_layer(x, w_ref, b_ref, enc_idx, num_seqs, seq_len):
    """Single-head post-LN transformer encoder layer on (num_seqs*seq_len, D).

    Weights come from the packed (D, N_ENC*6*D) bf16 blob; biases / LN params
    from the packed (rows, D) f32 blob.  The 1/sqrt(D) attention scale is
    already folded into the wq / bq slots at prep time.
    """
    d = x.shape[-1]
    wcol = enc_idx * _W_BLOCKS_PER_ENC * d
    brow = enc_idx * _B_ROWS_PER_ENC

    # ---- fused Q/K/V projection: one (rows, D) x (D, 3D) MXU matmul --------
    x_bf = x.astype(jnp.bfloat16)
    wqkv = w_ref[:, wcol:wcol + 3 * d]                                # (D, 3D) bf16
    qkv = jnp.dot(x_bf, wqkv, preferred_element_type=jnp.float32)     # (rows, 3D) f32

    q = (qkv[:, 0 * d:1 * d] + _brow(b_ref, brow + 0)).astype(jnp.bfloat16)
    k = (qkv[:, 1 * d:2 * d] + _brow(b_ref, brow + 1)).astype(jnp.bfloat16)
    v = (qkv[:, 2 * d:3 * d] + _brow(b_ref, brow + 2)).astype(jnp.bfloat16)
    q = q.reshape(num_seqs, seq_len, d)
    k = k.reshape(num_seqs, seq_len, d)
    v = v.reshape(num_seqs, seq_len, d)

    # ---- attention: per-sequence scores / softmax / PV (batched dot_general)
    s = lax.dot_general(q, k, (((2,), (2,)), ((0,), (0,))),
                        preferred_element_type=jnp.float32)           # (S, L, L)
    s = s - jnp.max(s, axis=-1, keepdims=True)
    p = jnp.exp(s)
    p = p * pl.reciprocal(jnp.sum(p, axis=-1, keepdims=True), approx=True)
    a = lax.dot_general(p.astype(jnp.bfloat16), v, (((2,), (1,)), ((0,), (0,))),
                        preferred_element_type=jnp.float32)           # (S, L, D)
    a = a.reshape(num_seqs * seq_len, d)

    # ---- output projection + post-LN ---------------------------------------
    wo = w_ref[:, wcol + 3 * d:wcol + 4 * d]
    attn = jnp.dot(a.astype(jnp.bfloat16), wo,
                   preferred_element_type=jnp.float32) + _brow(b_ref, brow + 3)
    y = _layernorm(x + attn, _brow(b_ref, brow + 4), _brow(b_ref, brow + 5))

    # ---- FFN (hidden padded to 128 lanes) + post-LN -------------------------
    w1 = w_ref[:, wcol + 4 * d:wcol + 5 * d]
    hdn = jnp.maximum(jnp.dot(y.astype(jnp.bfloat16), w1,
                              preferred_element_type=jnp.float32)
                      + _brow(b_ref, brow + 6), 0.0)
    w2 = w_ref[:, wcol + 5 * d:wcol + 6 * d]
    f = jnp.dot(hdn.astype(jnp.bfloat16), w2,
                preferred_element_type=jnp.float32) + _brow(b_ref, brow + 7)
    return _layernorm(y + f, _brow(b_ref, brow + 8), _brow(b_ref, brow + 9))


# ---- fused forward kernel (single invocation, no grid) -----------------------
def _fused_forward_kernel(x_ref, w_ref, b_ref, comb_ref, out_ref):
    bsz, h, d = out_ref.shape
    c = x_ref.shape[0] // (bsz * h)

    xs = x_ref[...]                                   # (B*C*H, D) f32

    # RawVisionTransformerRGBEncoder: shared encoder over every (batch,channel)
    # sequence; all row projections done in one (B*C*H, D) x (D, 3D) matmul.
    enc = _encoder_layer(xs, w_ref, b_ref, enc_idx=0, num_seqs=bsz * c, seq_len=h)

    # x.mean(dim=1) + RGBCombinator (learned channel mix + activation).
    xs4 = xs.reshape(bsz, c, h, d)
    enc4 = enc.reshape(bsz, c, h, d)
    x_mean = xs4[:, 0]
    comb = comb_ref[0] * enc4[:, 0]
    for ci in range(1, c):
        x_mean = x_mean + xs4[:, ci]
        comb = comb + comb_ref[ci] * enc4[:, ci]
    x_mean = (x_mean * (1.0 / c)).reshape(bsz * h, d)
    x0 = jnp.tanh(comb + comb_ref[c]).reshape(bsz * h, d)   # TODO(synk): combinator activation assumed tanh

    r0 = _OUTER_LN_ROW0
    xn0 = _layernorm(x0 + x_mean, _brow(b_ref, r0 + 0), _brow(b_ref, r0 + 1))   # layer_norm0

    x1 = _encoder_layer(xn0, w_ref, b_ref, enc_idx=1, num_seqs=bsz, seq_len=h)  # hidden_transformer0
    xn1 = _layernorm(xn0 + x0 + x1, _brow(b_ref, r0 + 2), _brow(b_ref, r0 + 3))  # layer_norm1
    x2 = _encoder_layer(xn1, w_ref, b_ref, enc_idx=2, num_seqs=bsz, seq_len=h)  # hidden_transformer1
    out = jax.nn.sigmoid(
        _layernorm(xn1 + x0 + x1 + x2, _brow(b_ref, r0 + 4), _brow(b_ref, r0 + 5)))
    out_ref[...] = out.reshape(bsz, h, d)


@jax.jit
def vit_object_detection_forward(x, w_blob, b_blob, comb):
    bsz, c, h, d = x.shape
    xs = x.reshape(bsz * c * h, d)        # fold batch and channel into the row axis
    return pl.pallas_call(
        _fused_forward_kernel,
        out_shape=jax.ShapeDtypeStruct((bsz, h, d), jnp.float32),
        in_specs=[
            pl.BlockSpec(memory_space=pltpu.MemorySpace.VMEM),   # activations
            pl.BlockSpec(memory_space=pltpu.MemorySpace.VMEM),   # packed weights (bf16)
            pl.BlockSpec(memory_space=pltpu.MemorySpace.VMEM),   # packed biases / LN params (f32)
            pl.BlockSpec(memory_space=pltpu.MemorySpace.SMEM),   # combinator scalars
        ],
        out_specs=pl.BlockSpec(memory_space=pltpu.MemorySpace.VMEM),
    )(xs, w_blob, b_blob, comb)


# ---- deterministic parameter initialization ---------------------------------
def init_encoder_params(key, d_model, d_ff, scale=0.05):
    keys = jax.random.split(key, 6)

    def rnd(k, shape):
        return scale * jax.random.normal(k, shape, jnp.float32)

    return {
        "wq": rnd(keys[0], (d_model, d_model)), "bq": jnp.zeros((1, d_model), jnp.float32),
        "wk": rnd(keys[1], (d_model, d_model)), "bk": jnp.zeros((1, d_model), jnp.float32),
        "wv": rnd(keys[2], (d_model, d_model)), "bv": jnp.zeros((1, d_model), jnp.float32),
        "wo": rnd(keys[3], (d_model, d_model)), "bo": jnp.zeros((1, d_model), jnp.float32),
        "ln1_g": jnp.ones((1, d_model), jnp.float32), "ln1_b": jnp.zeros((1, d_model), jnp.float32),
        "w1": rnd(keys[4], (d_model, d_ff)), "b1": jnp.zeros((1, d_ff), jnp.float32),
        "w2": rnd(keys[5], (d_ff, d_model)), "b2": jnp.zeros((1, d_model), jnp.float32),
        "ln1_g2": None,  # unused placeholder (kept out of the dict below)
        "ln2_g": jnp.ones((1, d_model), jnp.float32), "ln2_b": jnp.zeros((1, d_model), jnp.float32),
    }


def init_params(key):
    k_rgb, k_t0, k_t1, k_comb = jax.random.split(key, 4)
    rgb = init_encoder_params(k_rgb, D_MODEL, FF_RGB)
    t0 = init_encoder_params(k_t0, D_MODEL, FF_HIDDEN)
    t1 = init_encoder_params(k_t1, D_MODEL, FF_HIDDEN)
    for p in (rgb, t0, t1):
        p.pop("ln1_g2", None)
    return {
        "rgb_encoder": rgb, "tr0": t0, "tr1": t1,
        "comb_w": 0.5 + 0.1 * jax.random.normal(k_comb, (CHANNELS,), jnp.float32),
        "comb_b": jnp.zeros((1,), jnp.float32),
        "ln0_g": jnp.ones((1, D_MODEL), jnp.float32), "ln0_b": jnp.zeros((1, D_MODEL), jnp.float32),
        "ln1_g": jnp.ones((1, D_MODEL), jnp.float32), "ln1_b": jnp.zeros((1, D_MODEL), jnp.float32),
        "ln2_g": jnp.ones((1, D_MODEL), jnp.float32), "ln2_b": jnp.zeros((1, D_MODEL), jnp.float32),
    }


# ---- wrapper-time weight packing: fold scale, fuse QKV, pad FFN, cast bf16 ---
def _prep_encoder_blocks(p, d_model):
    scale = 1.0 / math.sqrt(float(d_model))
    dff = p["w1"].shape[1]
    pad = FF_PAD - dff
    wqkv = jnp.concatenate([p["wq"] * scale, p["wk"], p["wv"]], axis=1)      # (D, 3D)
    w1p = jnp.pad(p["w1"], ((0, 0), (0, pad)))                               # (D, FF_PAD)
    w2p = jnp.pad(p["w2"], ((0, pad), (0, 0)))                               # (FF_PAD, D)
    w_block = jnp.concatenate([wqkv, p["wo"], w1p, w2p], axis=1).astype(jnp.bfloat16)   # (D, 6D)
    b_rows = jnp.concatenate([
        p["bq"] * scale, p["bk"], p["bv"], p["bo"],
        p["ln1_g"], p["ln1_b"],
        jnp.pad(p["b1"], ((0, 0), (0, pad))), p["b2"],
        p["ln2_g"], p["ln2_b"]], axis=0)                                     # (10, D)
    return w_block, b_rows


def prepare_kernel_params(params):
    w_blocks, b_rows = [], []
    for name in ("rgb_encoder", "tr0", "tr1"):
        w, b = _prep_encoder_blocks(params[name], D_MODEL)
        w_blocks.append(w)
        b_rows.append(b)
    w_blob = jnp.concatenate(w_blocks, axis=1)                               # (D, 18*D) bf16
    b_blob = jnp.concatenate(
        b_rows + [params["ln0_g"], params["ln0_b"],
                  params["ln1_g"], params["ln1_b"],
                  params["ln2_g"], params["ln2_b"]], axis=0)                 # (36, D) f32
    comb = jnp.concatenate([params["comb_w"], params["comb_b"]], axis=0)     # (C+1,) f32, SMEM
    return w_blob, b_blob, comb


# ---- pure-JAX reference (f32, unpadded, unfused) -----------------------------
def _ref_layernorm(x, g, b):
    mu = jnp.mean(x, axis=-1, keepdims=True)
    var = jnp.mean((x - mu) ** 2, axis=-1, keepdims=True)
    return (x - mu) / jnp.sqrt(var + LN_EPS) * g + b


def _ref_encoder(x, p):
    q = x @ p["wq"] + p["bq"]
    k = x @ p["wk"] + p["bk"]
    v = x @ p["wv"] + p["bv"]
    s = jnp.einsum("...qd,...kd->...qk", q, k) / jnp.sqrt(jnp.float32(x.shape[-1]))
    a = jax.nn.softmax(s, axis=-1)
    attn = jnp.einsum("...qk,...kd->...qd", a, v) @ p["wo"] + p["bo"]
    y = _ref_layernorm(x + attn, p["ln1_g"], p["ln1_b"])
    h = jnp.maximum(y @ p["w1"] + p["b1"], 0.0)
    f = h @ p["w2"] + p["b2"]
    return _ref_layernorm(y + f, p["ln2_g"], p["ln2_b"])


def reference_forward(x, params):
    x_mean = x.mean(axis=1)
    enc = _ref_encoder(x, params["rgb_encoder"])
    x0 = jnp.tanh(jnp.einsum("c,bchd->bhd", params["comb_w"], enc) + params["comb_b"][0])
    xn0 = _ref_layernorm(x0 + x_mean, params["ln0_g"], params["ln0_b"])
    x1 = _ref_encoder(xn0, params["tr0"])
    xn1 = _ref_layernorm(xn0 + x0 + x1, params["ln1_g"], params["ln1_b"])
    x2 = _ref_encoder(xn1, params["tr1"])
    return jax.nn.sigmoid(_ref_layernorm(xn1 + x0 + x1 + x2, params["ln2_g"], params["ln2_b"]))


# ---- main --------------------------------------------------------------------
if __name__ == "__main__":
    key = jax.random.PRNGKey(0)
    k_x, k_p = jax.random.split(key)
    x = jax.random.uniform(k_x, (BATCH, CHANNELS, IMG_H, D_MODEL), jnp.float32)
    params = init_params(k_p)
    w_blob, b_blob, comb = prepare_kernel_params(params)

    out = vit_object_detection_forward(x, w_blob, b_blob, comb)
    out = jax.block_until_ready(out)

    assert out.shape == (BATCH, IMG_H, D_MODEL), out.shape
    assert bool(jnp.all(jnp.isfinite(out)))
    assert bool(jnp.all((out >= 0.0) & (out <= 1.0)))            # sigmoid head

    ref = reference_forward(x, params)
    assert bool(jnp.max(jnp.abs(out - ref)) < 0.1)               # loose: bf16 matmuls + approx recip
    print("KERNEL_OK")
</pallas_src>

<mosaic_0001>
module attributes {stable_mosaic.version = 11 : i64} {
  func.func @_fused_forward_kernel(%arg0: memref<96x128xf32, #tpu.memory_space<vmem>>, %arg1: memref<128x2304xbf16, #tpu.memory_space<vmem>>, %arg2: memref<36x128xf32, #tpu.memory_space<vmem>>, %arg3: memref<4xf32, #tpu.memory_space<smem>>, %arg4: memref<2x16x128xf32, #tpu.memory_space<vmem>>) attributes {dimension_semantics = [], scalar_prefetch = 0 : i64, scratch_operands = 0 : i64, tpu.core_type = #tpu.core_type<tc>} {
    %c0 = arith.constant 0 : index
    %c0_0 = arith.constant 0 : index
    %0 = vector.load %arg0[%c0, %c0_0] : memref<96x128xf32, #tpu.memory_space<vmem>>, vector<96x128xf32>
    %1 = arith.truncf %0 : vector<96x128xf32> to vector<96x128xbf16>
    %c0_1 = arith.constant 0 : index
    %c0_2 = arith.constant 0 : index
    %2 = vector.load %arg1[%c0_1, %c0_2] : memref<128x2304xbf16, #tpu.memory_space<vmem>>, vector<128x384xbf16>
    %cst = arith.constant dense<0.000000e+00> : vector<96x384xf32>
    %3 = tpu.matmul %1, %2, %cst {dimension_numbers = #tpu.dot_dimension_numbers<[1], [0], [0], [1], [0, 0, 1, 1], [], []>} : vector<96x128xbf16>, vector<128x384xbf16>, vector<96x384xf32> -> vector<96x384xf32>
    %4 = vector.extract_strided_slice %3 {offsets = [0, 0], sizes = [96, 128], strides = [1, 1]} : vector<96x384xf32> to vector<96x128xf32>
    %c0_3 = arith.constant 0 : index
    %c0_4 = arith.constant 0 : index
    %5 = vector.load %arg2[%c0_3, %c0_4] : memref<36x128xf32, #tpu.memory_space<vmem>>, vector<1x128xf32>
    %6 = vector.broadcast %5 : vector<1x128xf32> to vector<96x128xf32>
    %7 = arith.addf %4, %6 : vector<96x128xf32>
    %8 = arith.truncf %7 : vector<96x128xf32> to vector<96x128xbf16>
    %9 = vector.extract_strided_slice %3 {offsets = [0, 128], sizes = [96, 128], strides = [1, 1]} : vector<96x384xf32> to vector<96x128xf32>
    %c1 = arith.constant 1 : index
    %c0_5 = arith.constant 0 : index
    %10 = vector.load %arg2[%c1, %c0_5] : memref<36x128xf32, #tpu.memory_space<vmem>>, vector<1x128xf32>
    %11 = vector.broadcast %10 : vector<1x128xf32> to vector<96x128xf32>
    %12 = arith.addf %9, %11 : vector<96x128xf32>
    %13 = arith.truncf %12 : vector<96x128xf32> to vector<96x128xbf16>
    %14 = vector.extract_strided_slice %3 {offsets = [0, 256], sizes = [96, 128], strides = [1, 1]} : vector<96x384xf32> to vector<96x128xf32>
    %c2 = arith.constant 2 : index
    %c0_6 = arith.constant 0 : index
    %15 = vector.load %arg2[%c2, %c0_6] : memref<36x128xf32, #tpu.memory_space<vmem>>, vector<1x128xf32>
    %16 = vector.broadcast %15 : vector<1x128xf32> to vector<96x128xf32>
    %17 = arith.addf %14, %16 : vector<96x128xf32>
    %18 = arith.truncf %17 : vector<96x128xf32> to vector<96x128xbf16>
    %19 = vector.shape_cast %8 : vector<96x128xbf16> to vector<6x16x128xbf16>
    %20 = vector.shape_cast %13 : vector<96x128xbf16> to vector<6x16x128xbf16>
    %21 = vector.shape_cast %18 : vector<96x128xbf16> to vector<6x16x128xbf16>
    %cst_7 = arith.constant dense<0.000000e+00> : vector<6x16x16xf32>
    %22 = tpu.matmul %19, %20, %cst_7 {dimension_numbers = #tpu.dot_dimension_numbers<[2], [2], [1], [1], [0, 0, 0, 1, 1, 1], [0], [0]>} : vector<6x16x128xbf16>, vector<6x16x128xbf16>, vector<6x16x16xf32> -> vector<6x16x16xf32>
    %cst_8 = arith.constant dense<0xFF800000> : vector<6x16xf32>
    %23 = vector.multi_reduction <maximumf>, %22, %cst_8 [2] : vector<6x16x16xf32> to vector<6x16xf32>
    %24 = vector.shape_cast %23 : vector<6x16xf32> to vector<6x16x1xf32>
    %25 = vector.broadcast %24 : vector<6x16x1xf32> to vector<6x16x16xf32>
    %26 = arith.subf %22, %25 : vector<6x16x16xf32>
    %27 = math.exp %26 : vector<6x16x16xf32>
    %cst_9 = arith.constant dense<0.000000e+00> : vector<6x16xf32>
    %28 = vector.multi_reduction <add>, %27, %cst_9 [2] : vector<6x16x16xf32> to vector<6x16xf32>
    %29 = vector.shape_cast %28 : vector<6x16xf32> to vector<6x16x1xf32>
    %30 = tpu.reciprocal %29 {approx = true} : vector<6x16x1xf32> -> vector<6x16x1xf32>
    %31 = vector.broadcast %30 : vector<6x16x1xf32> to vector<6x16x16xf32>
    %32 = arith.mulf %27, %31 : vector<6x16x16xf32>
    %33 = arith.truncf %32 : vector<6x16x16xf32> to vector<6x16x16xbf16>
    %cst_10 = arith.constant dense<0.000000e+00> : vector<6x16x128xf32>
    %34 = tpu.matmul %33, %21, %cst_10 {dimension_numbers = #tpu.dot_dimension_numbers<[2], [1], [1], [2], [0, 0, 0, 1, 1, 2], [0], [0]>} : vector<6x16x16xbf16>, vector<6x16x128xbf16>, vector<6x16x128xf32> -> vector<6x16x128xf32>
    %35 = vector.shape_cast %34 : vector<6x16x128xf32> to vector<96x128xf32>
    %c0_11 = arith.constant 0 : index
    %c384 = arith.constant 384 : index
    %36 = vector.load %arg1[%c0_11, %c384] : memref<128x2304xbf16, #tpu.memory_space<vmem>>, vector<128x128xbf16>
    %37 = arith.truncf %35 : vector<96x128xf32> to vector<96x128xbf16>
    %cst_12 = arith.constant dense<0.000000e+00> : vector<96x128xf32>
    %38 = tpu.matmul %37, %36, %cst_12 {dimension_numbers = #tpu.dot_dimension_numbers<[1], [0], [0], [1], [0, 0, 1, 1], [], []>} : vector<96x128xbf16>, vector<128x128xbf16>, vector<96x128xf32> -> vector<96x128xf32>
    %c3 = arith.constant 3 : index
    %c0_13 = arith.constant 0 : index
    %39 = vector.load %arg2[%c3, %c0_13] : memref<36x128xf32, #tpu.memory_space<vmem>>, vector<1x128xf32>
    %40 = vector.broadcast %39 : vector<1x128xf32> to vector<96x128xf32>
    %41 = arith.addf %38, %40 : vector<96x128xf32>
    %42 = arith.addf %0, %41 : vector<96x128xf32>
    %c4 = arith.constant 4 : index
    %c0_14 = arith.constant 0 : index
    %43 = vector.load %arg2[%c4, %c0_14] : memref<36x128xf32, #tpu.memory_space<vmem>>, vector<1x128xf32>
    %c5 = arith.constant 5 : index
    %c0_15 = arith.constant 0 : index
    %44 = vector.load %arg2[%c5, %c0_15] : memref<36x128xf32, #tpu.memory_space<vmem>>, vector<1x128xf32>
    %cst_16 = arith.constant dense<0.000000e+00> : vector<96xf32>
    %45 = vector.multi_reduction <add>, %42, %cst_16 [1] : vector<96x128xf32> to vector<96xf32>
    %46 = vector.shape_cast %45 : vector<96xf32> to vector<96x1xf32>
    %cst_17 = arith.constant 7.812500e-03 : f32
    %47 = vector.broadcast %cst_17 : f32 to vector<96x1xf32>
    %48 = arith.mulf %46, %47 : vector<96x1xf32>
    %49 = arith.mulf %42, %42 : vector<96x128xf32>
    %cst_18 = arith.constant dense<0.000000e+00> : vector<96xf32>
    %50 = vector.multi_reduction <add>, %49, %cst_18 [1] : vector<96x128xf32> to vector<96xf32>
    %51 = vector.shape_cast %50 : vector<96xf32> to vector<96x1xf32>
    %cst_19 = arith.constant 7.812500e-03 : f32
    %52 = vector.broadcast %cst_19 : f32 to vector<96x1xf32>
    %53 = arith.mulf %51, %52 : vector<96x1xf32>
    %54 = arith.mulf %48, %48 : vector<96x1xf32>
    %55 = arith.subf %53, %54 : vector<96x1xf32>
    %cst_20 = arith.constant 0.000000e+00 : f32
    %56 = vector.broadcast %cst_20 : f32 to vector<96x1xf32>
    %57 = arith.maximumf %55, %56 : vector<96x1xf32>
    %58 = vector.broadcast %48 : vector<96x1xf32> to vector<96x128xf32>
    %59 = arith.subf %42, %58 : vector<96x128xf32>
    %cst_21 = arith.constant 9.99999974E-6 : f32
    %60 = vector.broadcast %cst_21 : f32 to vector<96x1xf32>
    %61 = arith.addf %57, %60 : vector<96x1xf32>
    %62 = math.rsqrt %61 : vector<96x1xf32>
    %63 = vector.broadcast %62 : vector<96x1xf32> to vector<96x128xf32>
    %64 = arith.mulf %59, %63 : vector<96x128xf32>
    %65 = vector.broadcast %43 : vector<1x128xf32> to vector<96x128xf32>
    %66 = arith.mulf %64, %65 : vector<96x128xf32>
    %67 = vector.broadcast %44 : vector<1x128xf32> to vector<96x128xf32>
    %68 = arith.addf %66, %67 : vector<96x128xf32>
    %c0_22 = arith.constant 0 : index
    %c512 = arith.constant 512 : index
    %69 = vector.load %arg1[%c0_22, %c512] : memref<128x2304xbf16, #tpu.memory_space<vmem>>, vector<128x128xbf16>
    %70 = arith.truncf %68 : vector<96x128xf32> to vector<96x128xbf16>
    %cst_23 = arith.constant dense<0.000000e+00> : vector<96x128xf32>
    %71 = tpu.matmul %70, %69, %cst_23 {dimension_numbers = #tpu.dot_dimension_numbers<[1], [0], [0], [1], [0, 0, 1, 1], [], []>} : vector<96x128xbf16>, vector<128x128xbf16>, vector<96x128xf32> -> vector<96x128xf32>
    %c6 = arith.constant 6 : index
    %c0_24 = arith.constant 0 : index
    %72 = vector.load %arg2[%c6, %c0_24] : memref<36x128xf32, #tpu.memory_space<vmem>>, vector<1x128xf32>
    %73 = vector.broadcast %72 : vector<1x128xf32> to vector<96x128xf32>
    %74 = arith.addf %71, %73 : vector<96x128xf32>
    %cst_25 = arith.constant 0.000000e+00 : f32
    %75 = vector.broadcast %cst_25 : f32 to vector<96x128xf32>
    %76 = arith.maximumf %74, %75 : vector<96x128xf32>
    %c0_26 = arith.constant 0 : index
    %c640 = arith.constant 640 : index
    %77 = vector.load %arg1[%c0_26, %c640] : memref<128x2304xbf16, #tpu.memory_space<vmem>>, vector<128x128xbf16>
    %78 = arith.truncf %76 : vector<96x128xf32> to vector<96x128xbf16>
    %cst_27 = arith.constant dense<0.000000e+00> : vector<96x128xf32>
    %79 = tpu.matmul %78, %77, %cst_27 {dimension_numbers = #tpu.dot_dimension_numbers<[1], [0], [0], [1], [0, 0, 1, 1], [], []>} : vector<96x128xbf16>, vector<128x128xbf16>, vector<96x128xf32> -> vector<96x128xf32>
    %c7 = arith.constant 7 : index
    %c0_28 = arith.constant 0 : index
    %80 = vector.load %arg2[%c7, %c0_28] : memref<36x128xf32, #tpu.memory_space<vmem>>, vector<1x128xf32>
    %81 = vector.broadcast %80 : vector<1x128xf32> to vector<96x128xf32>
    %82 = arith.addf %79, %81 : vector<96x128xf32>
    %83 = arith.addf %68, %82 : vector<96x128xf32>
    %c8 = arith.constant 8 : index
    %c0_29 = arith.constant 0 : index
    %84 = vector.load %arg2[%c8, %c0_29] : memref<36x128xf32, #tpu.memory_space<vmem>>, vector<1x128xf32>
    %c9 = arith.constant 9 : index
    %c0_30 = arith.constant 0 : index
    %85 = vector.load %arg2[%c9, %c0_30] : memref<36x128xf32, #tpu.memory_space<vmem>>, vector<1x128xf32>
    %cst_31 = arith.constant dense<0.000000e+00> : vector<96xf32>
    %86 = vector.multi_reduction <add>, %83, %cst_31 [1] : vector<96x128xf32> to vector<96xf32>
    %87 = vector.shape_cast %86 : vector<96xf32> to vector<96x1xf32>
    %cst_32 = arith.constant 7.812500e-03 : f32
    %88 = vector.broadcast %cst_32 : f32 to vector<96x1xf32>
    %89 = arith.mulf %87, %88 : vector<96x1xf32>
    %90 = arith.mulf %83, %83 : vector<96x128xf32>
    %cst_33 = arith.constant dense<0.000000e+00> : vector<96xf32>
    %91 = vector.multi_reduction <add>, %90, %cst_33 [1] : vector<96x128xf32> to vector<96xf32>
    %92 = vector.shape_cast %91 : vector<96xf32> to vector<96x1xf32>
    %cst_34 = arith.constant 7.812500e-03 : f32
    %93 = vector.broadcast %cst_34 : f32 to vector<96x1xf32>
    %94 = arith.mulf %92, %93 : vector<96x1xf32>
    %95 = arith.mulf %89, %89 : vector<96x1xf32>
    %96 = arith.subf %94, %95 : vector<96x1xf32>
    %cst_35 = arith.constant 0.000000e+00 : f32
    %97 = vector.broadcast %cst_35 : f32 to vector<96x1xf32>
    %98 = arith.maximumf %96, %97 : vector<96x1xf32>
    %99 = vector.broadcast %89 : vector<96x1xf32> to vector<96x128xf32>
    %100 = arith.subf %83, %99 : vector<96x128xf32>
    %cst_36 = arith.constant 9.99999974E-6 : f32
    %101 = vector.broadcast %cst_36 : f32 to vector<96x1xf32>
    %102 = arith.addf %98, %101 : vector<96x1xf32>
    %103 = math.rsqrt %102 : vector<96x1xf32>
    %104 = vector.broadcast %103 : vector<96x1xf32> to vector<96x128xf32>
    %105 = arith.mulf %100, %104 : vector<96x128xf32>
    %106 = vector.broadcast %84 : vector<1x128xf32> to vector<96x128xf32>
    %107 = arith.mulf %105, %106 : vector<96x128xf32>
    %108 = vector.broadcast %85 : vector<1x128xf32> to vector<96x128xf32>
    %109 = arith.addf %107, %108 : vector<96x128xf32>
    %110 = vector.shape_cast %0 : vector<96x128xf32> to vector<2x3x16x128xf32>
    %111 = vector.shape_cast %109 : vector<96x128xf32> to vector<2x3x16x128xf32>
    %112 = vector.extract_strided_slice %110 {offsets = [0, 0, 0, 0], sizes = [2, 1, 16, 128], strides = [1, 1, 1, 1]} : vector<2x3x16x128xf32> to vector<2x1x16x128xf32>
    %113 = vector.shape_cast %112 : vector<2x1x16x128xf32> to vector<2x16x128xf32>
    %c0_37 = arith.constant 0 : index
    %114 = memref.load %arg3[%c0_37] : memref<4xf32, #tpu.memory_space<smem>>
    %115 = vector.extract_strided_slice %111 {offsets = [0, 0, 0, 0], sizes = [2, 1, 16, 128], strides = [1, 1, 1, 1]} : vector<2x3x16x128xf32> to vector<2x1x16x128xf32>
    %116 = vector.shape_cast %115 : vector<2x1x16x128xf32> to vector<2x16x128xf32>
    %117 = vector.broadcast %114 : f32 to vector<2x16x128xf32>
    %118 = arith.mulf %117, %116 : vector<2x16x128xf32>
    %119 = vector.extract_strided_slice %110 {offsets = [0, 1, 0, 0], sizes = [2, 1, 16, 128], strides = [1, 1, 1, 1]} : vector<2x3x16x128xf32> to vector<2x1x16x128xf32>
    %120 = vector.shape_cast %119 : vector<2x1x16x128xf32> to vector<2x16x128xf32>
    %121 = arith.addf %113, %120 : vector<2x16x128xf32>
    %c1_38 = arith.constant 1 : index
    %122 = memref.load %arg3[%c1_38] : memref<4xf32, #tpu.memory_space<smem>>
    %123 = vector.extract_strided_slice %111 {offsets = [0, 1, 0, 0], sizes = [2, 1, 16, 128], strides = [1, 1, 1, 1]} : vector<2x3x16x128xf32> to vector<2x1x16x128xf32>
    %124 = vector.shape_cast %123 : vector<2x1x16x128xf32> to vector<2x16x128xf32>
    %125 = vector.broadcast %122 : f32 to vector<2x16x128xf32>
    %126 = arith.mulf %125, %124 : vector<2x16x128xf32>
    %127 = arith.addf %118, %126 : vector<2x16x128xf32>
    %128 = vector.extract_strided_slice %110 {offsets = [0, 2, 0, 0], sizes = [2, 1, 16, 128], strides = [1, 1, 1, 1]} : vector<2x3x16x128xf32> to vector<2x1x16x128xf32>
    %129 = vector.shape_cast %128 : vector<2x1x16x128xf32> to vector<2x16x128xf32>
    %130 = arith.addf %121, %129 : vector<2x16x128xf32>
    %c2_39 = arith.constant 2 : index
    %131 = memref.load %arg3[%c2_39] : memref<4xf32, #tpu.memory_space<smem>>
    %132 = vector.extract_strided_slice %111 {offsets = [0, 2, 0, 0], sizes = [2, 1, 16, 128], strides = [1, 1, 1, 1]} : vector<2x3x16x128xf32> to vector<2x1x16x128xf32>
    %133 = vector.shape_cast %132 : vector<2x1x16x128xf32> to vector<2x16x128xf32>
    %134 = vector.broadcast %131 : f32 to vector<2x16x128xf32>
    %135 = arith.mulf %134, %133 : vector<2x16x128xf32>
    %136 = arith.addf %127, %135 : vector<2x16x128xf32>
    %cst_40 = arith.constant 0.333333343 : f32
    %137 = vector.broadcast %cst_40 : f32 to vector<2x16x128xf32>
    %138 = arith.mulf %130, %137 : vector<2x16x128xf32>
    %139 = vector.shape_cast %138 : vector<2x16x128xf32> to vector<32x128xf32>
    %c3_41 = arith.constant 3 : index
    %140 = memref.load %arg3[%c3_41] : memref<4xf32, #tpu.memory_space<smem>>
    %141 = vector.broadcast %140 : f32 to vector<2x16x128xf32>
    %142 = arith.addf %136, %141 : vector<2x16x128xf32>
    %143 = math.tanh %142 : vector<2x16x128xf32>
    %144 = vector.shape_cast %143 : vector<2x16x128xf32> to vector<32x128xf32>
    %145 = arith.addf %144, %139 : vector<32x128xf32>
    %c30 = arith.constant 30 : index
    %c0_42 = arith.constant 0 : index
    %146 = vector.load %arg2[%c30, %c0_42] : memref<36x128xf32, #tpu.memory_space<vmem>>, vector<1x128xf32>
    %c31 = arith.constant 31 : index
    %c0_43 = arith.constant 0 : index
    %147 = vector.load %arg2[%c31, %c0_43] : memref<36x128xf32, #tpu.memory_space<vmem>>, vector<1x128xf32>
    %cst_44 = arith.constant dense<0.000000e+00> : vector<32xf32>
    %148 = vector.multi_reduction <add>, %145, %cst_44 [1] : vector<32x128xf32> to vector<32xf32>
    %149 = vector.shape_cast %148 : vector<32xf32> to vector<32x1xf32>
    %cst_45 = arith.constant 7.812500e-03 : f32
    %150 = vector.broadcast %cst_45 : f32 to vector<32x1xf32>
    %151 = arith.mulf %149, %150 : vector<32x1xf32>
    %152 = arith.mulf %145, %145 : vector<32x128xf32>
    %cst_46 = arith.constant dense<0.000000e+00> : vector<32xf32>
    %153 = vector.multi_reduction <add>, %152, %cst_46 [1] : vector<32x128xf32> to vector<32xf32>
    %154 = vector.shape_cast %153 : vector<32xf32> to vector<32x1xf32>
    %cst_47 = arith.constant 7.812500e-03 : f32
    %155 = vector.broadcast %cst_47 : f32 to vector<32x1xf32>
    %156 = arith.mulf %154, %155 : vector<32x1xf32>
    %157 = arith.mulf %151, %151 : vector<32x1xf32>
    %158 = arith.subf %156, %157 : vector<32x1xf32>
    %cst_48 = arith.constant 0.000000e+00 : f32
    %159 = vector.broadcast %cst_48 : f32 to vector<32x1xf32>
    %160 = arith.maximumf %158, %159 : vector<32x1xf32>
    %161 = vector.broadcast %151 : vector<32x1xf32> to vector<32x128xf32>
    %162 = arith.subf %145, %161 : vector<32x128xf32>
    %cst_49 = arith.constant 9.99999974E-6 : f32
    %163 = vector.broadcast %cst_49 : f32 to vector<32x1xf32>
    %164 = arith.addf %160, %163 : vector<32x1xf32>
    %165 = math.rsqrt %164 : vector<32x1xf32>
    %166 = vector.broadcast %165 : vector<32x1xf32> to vector<32x128xf32>
    %167 = arith.mulf %162, %166 : vector<32x128xf32>
    %168 = vector.broadcast %146 : vector<1x128xf32> to vector<32x128xf32>
    %169 = arith.mulf %167, %168 : vector<32x128xf32>
    %170 = vector.broadcast %147 : vector<1x128xf32> to vector<32x128xf32>
    %171 = arith.addf %169, %170 : vector<32x128xf32>
    %172 = arith.truncf %171 : vector<32x128xf32> to vector<32x128xbf16>
    %c0_50 = arith.constant 0 : index
    %c768 = arith.constant 768 : index
    %173 = vector.load %arg1[%c0_50, %c768] : memref<128x2304xbf16, #tpu.memory_space<vmem>>, vector<128x384xbf16>
    %cst_51 = arith.constant dense<0.000000e+00> : vector<32x384xf32>
    %174 = tpu.matmul %172, %173, %cst_51 {dimension_numbers = #tpu.dot_dimension_numbers<[1], [0], [0], [1], [0, 0, 1, 1], [], []>} : vector<32x128xbf16>, vector<128x384xbf16>, vector<32x384xf32> -> vector<32x384xf32>
    %175 = vector.extract_strided_slice %174 {offsets = [0, 0], sizes = [32, 128], strides = [1, 1]} : vector<32x384xf32> to vector<32x128xf32>
    %c10 = arith.constant 10 : index
    %c0_52 = arith.constant 0 : index
    %176 = vector.load %arg2[%c10, %c0_52] : memref<36x128xf32, #tpu.memory_space<vmem>>, vector<1x128xf32>
    %177 = vector.broadcast %176 : vector<1x128xf32> to vector<32x128xf32>
    %178 = arith.addf %175, %177 : vector<32x128xf32>
    %179 = arith.truncf %178 : vector<32x128xf32> to vector<32x128xbf16>
    %180 = vector.extract_strided_slice %174 {offsets = [0, 128], sizes = [32, 128], strides = [1, 1]} : vector<32x384xf32> to vector<32x128xf32>
    %c11 = arith.constant 11 : index
    %c0_53 = arith.constant 0 : index
    %181 = vector.load %arg2[%c11, %c0_53] : memref<36x128xf32, #tpu.memory_space<vmem>>, vector<1x128xf32>
    %182 = vector.broadcast %181 : vector<1x128xf32> to vector<32x128xf32>
    %183 = arith.addf %180, %182 : vector<32x128xf32>
    %184 = arith.truncf %183 : vector<32x128xf32> to vector<32x128xbf16>
    %185 = vector.extract_strided_slice %174 {offsets = [0, 256], sizes = [32, 128], strides = [1, 1]} : vector<32x384xf32> to vector<32x128xf32>
    %c12 = arith.constant 12 : index
    %c0_54 = arith.constant 0 : index
    %186 = vector.load %arg2[%c12, %c0_54] : memref<36x128xf32, #tpu.memory_space<vmem>>, vector<1x128xf32>
    %187 = vector.broadcast %186 : vector<1x128xf32> to vector<32x128xf32>
    %188 = arith.addf %185, %187 : vector<32x128xf32>
    %189 = arith.truncf %188 : vector<32x128xf32> to vector<32x128xbf16>
    %190 = vector.shape_cast %179 : vector<32x128xbf16> to vector<2x16x128xbf16>
    %191 = vector.shape_cast %184 : vector<32x128xbf16> to vector<2x16x128xbf16>
    %192 = vector.shape_cast %189 : vector<32x128xbf16> to vector<2x16x128xbf16>
    %cst_55 = arith.constant dense<0.000000e+00> : vector<2x16x16xf32>
    %193 = tpu.matmul %190, %191, %cst_55 {dimension_numbers = #tpu.dot_dimension_numbers<[2], [2], [1], [1], [0, 0, 0, 1, 1, 1], [0], [0]>} : vector<2x16x128xbf16>, vector<2x16x128xbf16>, vector<2x16x16xf32> -> vector<2x16x16xf32>
    %cst_56 = arith.constant dense<0xFF800000> : vector<2x16xf32>
    %194 = vector.multi_reduction <maximumf>, %193, %cst_56 [2] : vector<2x16x16xf32> to vector<2x16xf32>
    %195 = vector.shape_cast %194 : vector<2x16xf32> to vector<2x16x1xf32>
    %196 = vector.broadcast %195 : vector<2x16x1xf32> to vector<2x16x16xf32>
    %197 = arith.subf %193, %196 : vector<2x16x16xf32>
    %198 = math.exp %197 : vector<2x16x16xf32>
    %cst_57 = arith.constant dense<0.000000e+00> : vector<2x16xf32>
    %199 = vector.multi_reduction <add>, %198, %cst_57 [2] : vector<2x16x16xf32> to vector<2x16xf32>
    %200 = vector.shape_cast %199 : vector<2x16xf32> to vector<2x16x1xf32>
    %201 = tpu.reciprocal %200 {approx = true} : vector<2x16x1xf32> -> vector<2x16x1xf32>
    %202 = vector.broadcast %201 : vector<2x16x1xf32> to vector<2x16x16xf32>
    %203 = arith.mulf %198, %202 : vector<2x16x16xf32>
    %204 = arith.truncf %203 : vector<2x16x16xf32> to vector<2x16x16xbf16>
    %cst_58 = arith.constant dense<0.000000e+00> : vector<2x16x128xf32>
    %205 = tpu.matmul %204, %192, %cst_58 {dimension_numbers = #tpu.dot_dimension_numbers<[2], [1], [1], [2], [0, 0, 0, 1, 1, 2], [0], [0]>} : vector<2x16x16xbf16>, vector<2x16x128xbf16>, vector<2x16x128xf32> -> vector<2x16x128xf32>
    %206 = vector.shape_cast %205 : vector<2x16x128xf32> to vector<32x128xf32>
    %c0_59 = arith.constant 0 : index
    %c1152 = arith.constant 1152 : index
    %207 = vector.load %arg1[%c0_59, %c1152] : memref<128x2304xbf16, #tpu.memory_space<vmem>>, vector<128x128xbf16>
    %208 = arith.truncf %206 : vector<32x128xf32> to vector<32x128xbf16>
    %cst_60 = arith.constant dense<0.000000e+00> : vector<32x128xf32>
    %209 = tpu.matmul %208, %207, %cst_60 {dimension_numbers = #tpu.dot_dimension_numbers<[1], [0], [0], [1], [0, 0, 1, 1], [], []>} : vector<32x128xbf16>, vector<128x128xbf16>, vector<32x128xf32> -> vector<32x128xf32>
    %c13 = arith.constant 13 : index
    %c0_61 = arith.constant 0 : index
    %210 = vector.load %arg2[%c13, %c0_61] : memref<36x128xf32, #tpu.memory_space<vmem>>, vector<1x128xf32>
    %211 = vector.broadcast %210 : vector<1x128xf32> to vector<32x128xf32>
    %212 = arith.addf %209, %211 : vector<32x128xf32>
    %213 = arith.addf %171, %212 : vector<32x128xf32>
    %c14 = arith.constant 14 : index
    %c0_62 = arith.constant 0 : index
    %214 = vector.load %arg2[%c14, %c0_62] : memref<36x128xf32, #tpu.memory_space<vmem>>, vector<1x128xf32>
    %c15 = arith.constant 15 : index
    %c0_63 = arith.constant 0 : index
    %215 = vector.load %arg2[%c15, %c0_63] : memref<36x128xf32, #tpu.memory_space<vmem>>, vector<1x128xf32>
    %cst_64 = arith.constant dense<0.000000e+00> : vector<32xf32>
    %216 = vector.multi_reduction <add>, %213, %cst_64 [1] : vector<32x128xf32> to vector<32xf32>
    %217 = vector.shape_cast %216 : vector<32xf32> to vector<32x1xf32>
    %cst_65 = arith.constant 7.812500e-03 : f32
    %218 = vector.broadcast %cst_65 : f32 to vector<32x1xf32>
    %219 = arith.mulf %217, %218 : vector<32x1xf32>
    %220 = arith.mulf %213, %213 : vector<32x128xf32>
    %cst_66 = arith.constant dense<0.000000e+00> : vector<32xf32>
    %221 = vector.multi_reduction <add>, %220, %cst_66 [1] : vector<32x128xf32> to vector<32xf32>
    %222 = vector.shape_cast %221 : vector<32xf32> to vector<32x1xf32>
    %cst_67 = arith.constant 7.812500e-03 : f32
    %223 = vector.broadcast %cst_67 : f32 to vector<32x1xf32>
    %224 = arith.mulf %222, %223 : vector<32x1xf32>
    %225 = arith.mulf %219, %219 : vector<32x1xf32>
    %226 = arith.subf %224, %225 : vector<32x1xf32>
    %cst_68 = arith.constant 0.000000e+00 : f32
    %227 = vector.broadcast %cst_68 : f32 to vector<32x1xf32>
    %228 = arith.maximumf %226, %227 : vector<32x1xf32>
    %229 = vector.broadcast %219 : vector<32x1xf32> to vector<32x128xf32>
    %230 = arith.subf %213, %229 : vector<32x128xf32>
    %cst_69 = arith.constant 9.99999974E-6 : f32
    %231 = vector.broadcast %cst_69 : f32 to vector<32x1xf32>
    %232 = arith.addf %228, %231 : vector<32x1xf32>
    %233 = math.rsqrt %232 : vector<32x1xf32>
    %234 = vector.broadcast %233 : vector<32x1xf32> to vector<32x128xf32>
    %235 = arith.mulf %230, %234 : vector<32x128xf32>
    %236 = vector.broadcast %214 : vector<1x128xf32> to vector<32x128xf32>
    %237 = arith.mulf %235, %236 : vector<32x128xf32>
    %238 = vector.broadcast %215 : vector<1x128xf32> to vector<32x128xf32>
    %239 = arith.addf %237, %238 : vector<32x128xf32>
    %c0_70 = arith.constant 0 : index
    %c1280 = arith.constant 1280 : index
    %240 = vector.load %arg1[%c0_70, %c1280] : memref<128x2304xbf16, #tpu.memory_space<vmem>>, vector<128x128xbf16>
    %241 = arith.truncf %239 : vector<32x128xf32> to vector<32x128xbf16>
    %cst_71 = arith.constant dense<0.000000e+00> : vector<32x128xf32>
    %242 = tpu.matmul %241, %240, %cst_71 {dimension_numbers = #tpu.dot_dimension_numbers<[1], [0], [0], [1], [0, 0, 1, 1], [], []>} : vector<32x128xbf16>, vector<128x128xbf16>, vector<32x128xf32> -> vector<32x128xf32>
    %c16 = arith.constant 16 : index
    %c0_72 = arith.constant 0 : index
    %243 = vector.load %arg2[%c16, %c0_72] : memref<36x128xf32, #tpu.memory_space<vmem>>, vector<1x128xf32>
    %244 = vector.broadcast %243 : vector<1x128xf32> to vector<32x128xf32>
    %245 = arith.addf %242, %244 : vector<32x128xf32>
    %cst_73 = arith.constant 0.000000e+00 : f32
    %246 = vector.broadcast %cst_73 : f32 to vector<32x128xf32>
    %247 = arith.maximumf %245, %246 : vector<32x128xf32>
    %c0_74 = arith.constant 0 : index
    %c1408 = arith.constant 1408 : index
    %248 = vector.load %arg1[%c0_74, %c1408] : memref<128x2304xbf16, #tpu.memory_space<vmem>>, vector<128x128xbf16>
    %249 = arith.truncf %247 : vector<32x128xf32> to vector<32x128xbf16>
    %cst_75 = arith.constant dense<0.000000e+00> : vector<32x128xf32>
    %250 = tpu.matmul %249, %248, %cst_75 {dimension_numbers = #tpu.dot_dimension_numbers<[1], [0], [0], [1], [0, 0, 1, 1], [], []>} : vector<32x128xbf16>, vector<128x128xbf16>, vector<32x128xf32> -> vector<32x128xf32>
    %c17 = arith.constant 17 : index
    %c0_76 = arith.constant 0 : index
    %251 = vector.load %arg2[%c17, %c0_76] : memref<36x128xf32, #tpu.memory_space<vmem>>, vector<1x128xf32>
    %252 = vector.broadcast %251 : vector<1x128xf32> to vector<32x128xf32>
    %253 = arith.addf %250, %252 : vector<32x128xf32>
    %254 = arith.addf %239, %253 : vector<32x128xf32>
    %c18 = arith.constant 18 : index
    %c0_77 = arith.constant 0 : index
    %255 = vector.load %arg2[%c18, %c0_77] : memref<36x128xf32, #tpu.memory_space<vmem>>, vector<1x128xf32>
    %c19 = arith.constant 19 : index
    %c0_78 = arith.constant 0 : index
    %256 = vector.load %arg2[%c19, %c0_78] : memref<36x128xf32, #tpu.memory_space<vmem>>, vector<1x128xf32>
    %cst_79 = arith.constant dense<0.000000e+00> : vector<32xf32>
    %257 = vector.multi_reduction <add>, %254, %cst_79 [1] : vector<32x128xf32> to vector<32xf32>
    %258 = vector.shape_cast %257 : vector<32xf32> to vector<32x1xf32>
    %cst_80 = arith.constant 7.812500e-03 : f32
    %259 = vector.broadcast %cst_80 : f32 to vector<32x1xf32>
    %260 = arith.mulf %258, %259 : vector<32x1xf32>
    %261 = arith.mulf %254, %254 : vector<32x128xf32>
    %cst_81 = arith.constant dense<0.000000e+00> : vector<32xf32>
    %262 = vector.multi_reduction <add>, %261, %cst_81 [1] : vector<32x128xf32> to vector<32xf32>
    %263 = vector.shape_cast %262 : vector<32xf32> to vector<32x1xf32>
    %cst_82 = arith.constant 7.812500e-03 : f32
    %264 = vector.broadcast %cst_82 : f32 to vector<32x1xf32>
    %265 = arith.mulf %263, %264 : vector<32x1xf32>
    %266 = arith.mulf %260, %260 : vector<32x1xf32>
    %267 = arith.subf %265, %266 : vector<32x1xf32>
    %cst_83 = arith.constant 0.000000e+00 : f32
    %268 = vector.broadcast %cst_83 : f32 to vector<32x1xf32>
    %269 = arith.maximumf %267, %268 : vector<32x1xf32>
    %270 = vector.broadcast %260 : vector<32x1xf32> to vector<32x128xf32>
    %271 = arith.subf %254, %270 : vector<32x128xf32>
    %cst_84 = arith.constant 9.99999974E-6 : f32
    %272 = vector.broadcast %cst_84 : f32 to vector<32x1xf32>
    %273 = arith.addf %269, %272 : vector<32x1xf32>
    %274 = math.rsqrt %273 : vector<32x1xf32>
    %275 = vector.broadcast %274 : vector<32x1xf32> to vector<32x128xf32>
    %276 = arith.mulf %271, %275 : vector<32x128xf32>
    %277 = vector.broadcast %255 : vector<1x128xf32> to vector<32x128xf32>
    %278 = arith.mulf %276, %277 : vector<32x128xf32>
    %279 = vector.broadcast %256 : vector<1x128xf32> to vector<32x128xf32>
    %280 = arith.addf %278, %279 : vector<32x128xf32>
    %281 = arith.addf %171, %144 : vector<32x128xf32>
    %282 = arith.addf %281, %280 : vector<32x128xf32>
    %c32 = arith.constant 32 : index
    %c0_85 = arith.constant 0 : index
    %283 = vector.load %arg2[%c32, %c0_85] : memref<36x128xf32, #tpu.memory_space<vmem>>, vector<1x128xf32>
    %c33 = arith.constant 33 : index
    %c0_86 = arith.constant 0 : index
    %284 = vector.load %arg2[%c33, %c0_86] : memref<36x128xf32, #tpu.memory_space<vmem>>, vector<1x128xf32>
    %cst_87 = arith.constant dense<0.000000e+00> : vector<32xf32>
    %285 = vector.multi_reduction <add>, %282, %cst_87 [1] : vector<32x128xf32> to vector<32xf32>
    %286 = vector.shape_cast %285 : vector<32xf32> to vector<32x1xf32>
    %cst_88 = arith.constant 7.812500e-03 : f32
    %287 = vector.broadcast %cst_88 : f32 to vector<32x1xf32>
    %288 = arith.mulf %286, %287 : vector<32x1xf32>
    %289 = arith.mulf %282, %282 : vector<32x128xf32>
    %cst_89 = arith.constant dense<0.000000e+00> : vector<32xf32>
    %290 = vector.multi_reduction <add>, %289, %cst_89 [1] : vector<32x128xf32> to vector<32xf32>
    %291 = vector.shape_cast %290 : vector<32xf32> to vector<32x1xf32>
    %cst_90 = arith.constant 7.812500e-03 : f32
    %292 = vector.broadcast %cst_90 : f32 to vector<32x1xf32>
    %293 = arith.mulf %291, %292 : vector<32x1xf32>
    %294 = arith.mulf %288, %288 : vector<32x1xf32>
    %295 = arith.subf %293, %294 : vector<32x1xf32>
    %cst_91 = arith.constant 0.000000e+00 : f32
    %296 = vector.broadcast %cst_91 : f32 to vector<32x1xf32>
    %297 = arith.maximumf %295, %296 : vector<32x1xf32>
    %298 = vector.broadcast %288 : vector<32x1xf32> to vector<32x128xf32>
    %299 = arith.subf %282, %298 : vector<32x128xf32>
    %cst_92 = arith.constant 9.99999974E-6 : f32
    %300 = vector.broadcast %cst_92 : f32 to vector<32x1xf32>
    %301 = arith.addf %297, %300 : vector<32x1xf32>
    %302 = math.rsqrt %301 : vector<32x1xf32>
    %303 = vector.broadcast %302 : vector<32x1xf32> to vector<32x128xf32>
    %304 = arith.mulf %299, %303 : vector<32x128xf32>
    %305 = vector.broadcast %283 : vector<1x128xf32> to vector<32x128xf32>
    %306 = arith.mulf %304, %305 : vector<32x128xf32>
    %307 = vector.broadcast %284 : vector<1x128xf32> to vector<32x128xf32>
    %308 = arith.addf %306, %307 : vector<32x128xf32>
    %309 = arith.truncf %308 : vector<32x128xf32> to vector<32x128xbf16>
    %c0_93 = arith.constant 0 : index
    %c1536 = arith.constant 1536 : index
    %310 = vector.load %arg1[%c0_93, %c1536] : memref<128x2304xbf16, #tpu.memory_space<vmem>>, vector<128x384xbf16>
    %cst_94 = arith.constant dense<0.000000e+00> : vector<32x384xf32>
    %311 = tpu.matmul %309, %310, %cst_94 {dimension_numbers = #tpu.dot_dimension_numbers<[1], [0], [0], [1], [0, 0, 1, 1], [], []>} : vector<32x128xbf16>, vector<128x384xbf16>, vector<32x384xf32> -> vector<32x384xf32>
    %312 = vector.extract_strided_slice %311 {offsets = [0, 0], sizes = [32, 128], strides = [1, 1]} : vector<32x384xf32> to vector<32x128xf32>
    %c20 = arith.constant 20 : index
    %c0_95 = arith.constant 0 : index
    %313 = vector.load %arg2[%c20, %c0_95] : memref<36x128xf32, #tpu.memory_space<vmem>>, vector<1x128xf32>
    %314 = vector.broadcast %313 : vector<1x128xf32> to vector<32x128xf32>
    %315 = arith.addf %312, %314 : vector<32x128xf32>
    %316 = arith.truncf %315 : vector<32x128xf32> to vector<32x128xbf16>
    %317 = vector.extract_strided_slice %311 {offsets = [0, 128], sizes = [32, 128], strides = [1, 1]} : vector<32x384xf32> to vector<32x128xf32>
    %c21 = arith.constant 21 : index
    %c0_96 = arith.constant 0 : index
    %318 = vector.load %arg2[%c21, %c0_96] : memref<36x128xf32, #tpu.memory_space<vmem>>, vector<1x128xf32>
    %319 = vector.broadcast %318 : vector<1x128xf32> to vector<32x128xf32>
    %320 = arith.addf %317, %319 : vector<32x128xf32>
    %321 = arith.truncf %320 : vector<32x128xf32> to vector<32x128xbf16>
    %322 = vector.extract_strided_slice %311 {offsets = [0, 256], sizes = [32, 128], strides = [1, 1]} : vector<32x384xf32> to vector<32x128xf32>
    %c22 = arith.constant 22 : index
    %c0_97 = arith.constant 0 : index
    %323 = vector.load %arg2[%c22, %c0_97] : memref<36x128xf32, #tpu.memory_space<vmem>>, vector<1x128xf32>
    %324 = vector.broadcast %323 : vector<1x128xf32> to vector<32x128xf32>
    %325 = arith.addf %322, %324 : vector<32x128xf32>
    %326 = arith.truncf %325 : vector<32x128xf32> to vector<32x128xbf16>
    %327 = vector.shape_cast %316 : vector<32x128xbf16> to vector<2x16x128xbf16>
    %328 = vector.shape_cast %321 : vector<32x128xbf16> to vector<2x16x128xbf16>
    %329 = vector.shape_cast %326 : vector<32x128xbf16> to vector<2x16x128xbf16>
    %cst_98 = arith.constant dense<0.000000e+00> : vector<2x16x16xf32>
    %330 = tpu.matmul %327, %328, %cst_98 {dimension_numbers = #tpu.dot_dimension_numbers<[2], [2], [1], [1], [0, 0, 0, 1, 1, 1], [0], [0]>} : vector<2x16x128xbf16>, vector<2x16x128xbf16>, vector<2x16x16xf32> -> vector<2x16x16xf32>
    %cst_99 = arith.constant dense<0xFF800000> : vector<2x16xf32>
    %331 = vector.multi_reduction <maximumf>, %330, %cst_99 [2] : vector<2x16x16xf32> to vector<2x16xf32>
    %332 = vector.shape_cast %331 : vector<2x16xf32> to vector<2x16x1xf32>
    %333 = vector.broadcast %332 : vector<2x16x1xf32> to vector<2x16x16xf32>
    %334 = arith.subf %330, %333 : vector<2x16x16xf32>
    %335 = math.exp %334 : vector<2x16x16xf32>
    %cst_100 = arith.constant dense<0.000000e+00> : vector<2x16xf32>
    %336 = vector.multi_reduction <add>, %335, %cst_100 [2] : vector<2x16x16xf32> to vector<2x16xf32>
    %337 = vector.shape_cast %336 : vector<2x16xf32> to vector<2x16x1xf32>
    %338 = tpu.reciprocal %337 {approx = true} : vector<2x16x1xf32> -> vector<2x16x1xf32>
    %339 = vector.broadcast %338 : vector<2x16x1xf32> to vector<2x16x16xf32>
    %340 = arith.mulf %335, %339 : vector<2x16x16xf32>
    %341 = arith.truncf %340 : vector<2x16x16xf32> to vector<2x16x16xbf16>
    %cst_101 = arith.constant dense<0.000000e+00> : vector<2x16x128xf32>
    %342 = tpu.matmul %341, %329, %cst_101 {dimension_numbers = #tpu.dot_dimension_numbers<[2], [1], [1], [2], [0, 0, 0, 1, 1, 2], [0], [0]>} : vector<2x16x16xbf16>, vector<2x16x128xbf16>, vector<2x16x128xf32> -> vector<2x16x128xf32>
    %343 = vector.shape_cast %342 : vector<2x16x128xf32> to vector<32x128xf32>
    %c0_102 = arith.constant 0 : index
    %c1920 = arith.constant 1920 : index
    %344 = vector.load %arg1[%c0_102, %c1920] : memref<128x2304xbf16, #tpu.memory_space<vmem>>, vector<128x128xbf16>
    %345 = arith.truncf %343 : vector<32x128xf32> to vector<32x128xbf16>
    %cst_103 = arith.constant dense<0.000000e+00> : vector<32x128xf32>
    %346 = tpu.matmul %345, %344, %cst_103 {dimension_numbers = #tpu.dot_dimension_numbers<[1], [0], [0], [1], [0, 0, 1, 1], [], []>} : vector<32x128xbf16>, vector<128x128xbf16>, vector<32x128xf32> -> vector<32x128xf32>
    %c23 = arith.constant 23 : index
    %c0_104 = arith.constant 0 : index
    %347 = vector.load %arg2[%c23, %c0_104] : memref<36x128xf32, #tpu.memory_space<vmem>>, vector<1x128xf32>
    %348 = vector.broadcast %347 : vector<1x128xf32> to vector<32x128xf32>
    %349 = arith.addf %346, %348 : vector<32x128xf32>
    %350 = arith.addf %308, %349 : vector<32x128xf32>
    %c24 = arith.constant 24 : index
    %c0_105 = arith.constant 0 : index
    %351 = vector.load %arg2[%c24, %c0_105] : memref<36x128xf32, #tpu.memory_space<vmem>>, vector<1x128xf32>
    %c25 = arith.constant 25 : index
    %c0_106 = arith.constant 0 : index
    %352 = vector.load %arg2[%c25, %c0_106] : memref<36x128xf32, #tpu.memory_space<vmem>>, vector<1x128xf32>
    %cst_107 = arith.constant dense<0.000000e+00> : vector<32xf32>
    %353 = vector.multi_reduction <add>, %350, %cst_107 [1] : vector<32x128xf32> to vector<32xf32>
    %354 = vector.shape_cast %353 : vector<32xf32> to vector<32x1xf32>
    %cst_108 = arith.constant 7.812500e-03 : f32
    %355 = vector.broadcast %cst_108 : f32 to vector<32x1xf32>
    %356 = arith.mulf %354, %355 : vector<32x1xf32>
    %357 = arith.mulf %350, %350 : vector<32x128xf32>
    %cst_109 = arith.constant dense<0.000000e+00> : vector<32xf32>
    %358 = vector.multi_reduction <add>, %357, %cst_109 [1] : vector<32x128xf32> to vector<32xf32>
    %359 = vector.shape_cast %358 : vector<32xf32> to vector<32x1xf32>
    %cst_110 = arith.constant 7.812500e-03 : f32
    %360 = vector.broadcast %cst_110 : f32 to vector<32x1xf32>
    %361 = arith.mulf %359, %360 : vector<32x1xf32>
    %362 = arith.mulf %356, %356 : vector<32x1xf32>
    %363 = arith.subf %361, %362 : vector<32x1xf32>
    %cst_111 = arith.constant 0.000000e+00 : f32
    %364 = vector.broadcast %cst_111 : f32 to vector<32x1xf32>
    %365 = arith.maximumf %363, %364 : vector<32x1xf32>
    %366 = vector.broadcast %356 : vector<32x1xf32> to vector<32x128xf32>
    %367 = arith.subf %350, %366 : vector<32x128xf32>
    %cst_112 = arith.constant 9.99999974E-6 : f32
    %368 = vector.broadcast %cst_112 : f32 to vector<32x1xf32>
    %369 = arith.addf %365, %368 : vector<32x1xf32>
    %370 = math.rsqrt %369 : vector<32x1xf32>
    %371 = vector.broadcast %370 : vector<32x1xf32> to vector<32x128xf32>
    %372 = arith.mulf %367, %371 : vector<32x128xf32>
    %373 = vector.broadcast %351 : vector<1x128xf32> to vector<32x128xf32>
    %374 = arith.mulf %372, %373 : vector<32x128xf32>
    %375 = vector.broadcast %352 : vector<1x128xf32> to vector<32x128xf32>
    %376 = arith.addf %374, %375 : vector<32x128xf32>
    %c0_113 = arith.constant 0 : index
    %c2048 = arith.constant 2048 : index
    %377 = vector.load %arg1[%c0_113, %c2048] : memref<128x2304xbf16, #tpu.memory_space<vmem>>, vector<128x128xbf16>
    %378 = arith.truncf %376 : vector<32x128xf32> to vector<32x128xbf16>
    %cst_114 = arith.constant dense<0.000000e+00> : vector<32x128xf32>
    %379 = tpu.matmul %378, %377, %cst_114 {dimension_numbers = #tpu.dot_dimension_numbers<[1], [0], [0], [1], [0, 0, 1, 1], [], []>} : vector<32x128xbf16>, vector<128x128xbf16>, vector<32x128xf32> -> vector<32x128xf32>
    %c26 = arith.constant 26 : index
    %c0_115 = arith.constant 0 : index
    %380 = vector.load %arg2[%c26, %c0_115] : memref<36x128xf32, #tpu.memory_space<vmem>>, vector<1x128xf32>
    %381 = vector.broadcast %380 : vector<1x128xf32> to vector<32x128xf32>
    %382 = arith.addf %379, %381 : vector<32x128xf32>
    %cst_116 = arith.constant 0.000000e+00 : f32
    %383 = vector.broadcast %cst_116 : f32 to vector<32x128xf32>
    %384 = arith.maximumf %382, %383 : vector<32x128xf32>
    %c0_117 = arith.constant 0 : index
    %c2176 = arith.constant 2176 : index
    %385 = vector.load %arg1[%c0_117, %c2176] : memref<128x2304xbf16, #tpu.memory_space<vmem>>, vector<128x128xbf16>
    %386 = arith.truncf %384 : vector<32x128xf32> to vector<32x128xbf16>
    %cst_118 = arith.constant dense<0.000000e+00> : vector<32x128xf32>
    %387 = tpu.matmul %386, %385, %cst_118 {dimension_numbers = #tpu.dot_dimension_numbers<[1], [0], [0], [1], [0, 0, 1, 1], [], []>} : vector<32x128xbf16>, vector<128x128xbf16>, vector<32x128xf32> -> vector<32x128xf32>
    %c27 = arith.constant 27 : index
    %c0_119 = arith.constant 0 : index
    %388 = vector.load %arg2[%c27, %c0_119] : memref<36x128xf32, #tpu.memory_space<vmem>>, vector<1x128xf32>
    %389 = vector.broadcast %388 : vector<1x128xf32> to vector<32x128xf32>
    %390 = arith.addf %387, %389 : vector<32x128xf32>
    %391 = arith.addf %376, %390 : vector<32x128xf32>
    %c28 = arith.constant 28 : index
    %c0_120 = arith.constant 0 : index
    %392 = vector.load %arg2[%c28, %c0_120] : memref<36x128xf32, #tpu.memory_space<vmem>>, vector<1x128xf32>
    %c29 = arith.constant 29 : index
    %c0_121 = arith.constant 0 : index
    %393 = vector.load %arg2[%c29, %c0_121] : memref<36x128xf32, #tpu.memory_space<vmem>>, vector<1x128xf32>
    %cst_122 = arith.constant dense<0.000000e+00> : vector<32xf32>
    %394 = vector.multi_reduction <add>, %391, %cst_122 [1] : vector<32x128xf32> to vector<32xf32>
    %395 = vector.shape_cast %394 : vector<32xf32> to vector<32x1xf32>
    %cst_123 = arith.constant 7.812500e-03 : f32
    %396 = vector.broadcast %cst_123 : f32 to vector<32x1xf32>
    %397 = arith.mulf %395, %396 : vector<32x1xf32>
    %398 = arith.mulf %391, %391 : vector<32x128xf32>
    %cst_124 = arith.constant dense<0.000000e+00> : vector<32xf32>
    %399 = vector.multi_reduction <add>, %398, %cst_124 [1] : vector<32x128xf32> to vector<32xf32>
    %400 = vector.shape_cast %399 : vector<32xf32> to vector<32x1xf32>
    %cst_125 = arith.constant 7.812500e-03 : f32
    %401 = vector.broadcast %cst_125 : f32 to vector<32x1xf32>
    %402 = arith.mulf %400, %401 : vector<32x1xf32>
    %403 = arith.mulf %397, %397 : vector<32x1xf32>
    %404 = arith.subf %402, %403 : vector<32x1xf32>
    %cst_126 = arith.constant 0.000000e+00 : f32
    %405 = vector.broadcast %cst_126 : f32 to vector<32x1xf32>
    %406 = arith.maximumf %404, %405 : vector<32x1xf32>
    %407 = vector.broadcast %397 : vector<32x1xf32> to vector<32x128xf32>
    %408 = arith.subf %391, %407 : vector<32x128xf32>
    %cst_127 = arith.constant 9.99999974E-6 : f32
    %409 = vector.broadcast %cst_127 : f32 to vector<32x1xf32>
    %410 = arith.addf %406, %409 : vector<32x1xf32>
    %411 = math.rsqrt %410 : vector<32x1xf32>
    %412 = vector.broadcast %411 : vector<32x1xf32> to vector<32x128xf32>
    %413 = arith.mulf %408, %412 : vector<32x128xf32>
    %414 = vector.broadcast %392 : vector<1x128xf32> to vector<32x128xf32>
    %415 = arith.mulf %413, %414 : vector<32x128xf32>
    %416 = vector.broadcast %393 : vector<1x128xf32> to vector<32x128xf32>
    %417 = arith.addf %415, %416 : vector<32x128xf32>
    %418 = arith.addf %308, %144 : vector<32x128xf32>
    %419 = arith.addf %418, %280 : vector<32x128xf32>
    %420 = arith.addf %419, %417 : vector<32x128xf32>
    %c34 = arith.constant 34 : index
    %c0_128 = arith.constant 0 : index
    %421 = vector.load %arg2[%c34, %c0_128] : memref<36x128xf32, #tpu.memory_space<vmem>>, vector<1x128xf32>
    %c35 = arith.constant 35 : index
    %c0_129 = arith.constant 0 : index
    %422 = vector.load %arg2[%c35, %c0_129] : memref<36x128xf32, #tpu.memory_space<vmem>>, vector<1x128xf32>
    %cst_130 = arith.constant dense<0.000000e+00> : vector<32xf32>
    %423 = vector.multi_reduction <add>, %420, %cst_130 [1] : vector<32x128xf32> to vector<32xf32>
    %424 = vector.shape_cast %423 : vector<32xf32> to vector<32x1xf32>
    %cst_131 = arith.constant 7.812500e-03 : f32
    %425 = vector.broadcast %cst_131 : f32 to vector<32x1xf32>
    %426 = arith.mulf %424, %425 : vector<32x1xf32>
    %427 = arith.mulf %420, %420 : vector<32x128xf32>
    %cst_132 = arith.constant dense<0.000000e+00> : vector<32xf32>
    %428 = vector.multi_reduction <add>, %427, %cst_132 [1] : vector<32x128xf32> to vector<32xf32>
    %429 = vector.shape_cast %428 : vector<32xf32> to vector<32x1xf32>
    %cst_133 = arith.constant 7.812500e-03 : f32
    %430 = vector.broadcast %cst_133 : f32 to vector<32x1xf32>
    %431 = arith.mulf %429, %430 : vector<32x1xf32>
    %432 = arith.mulf %426, %426 : vector<32x1xf32>
    %433 = arith.subf %431, %432 : vector<32x1xf32>
    %cst_134 = arith.constant 0.000000e+00 : f32
    %434 = vector.broadcast %cst_134 : f32 to vector<32x1xf32>
    %435 = arith.maximumf %433, %434 : vector<32x1xf32>
    %436 = vector.broadcast %426 : vector<32x1xf32> to vector<32x128xf32>
    %437 = arith.subf %420, %436 : vector<32x128xf32>
    %cst_135 = arith.constant 9.99999974E-6 : f32
    %438 = vector.broadcast %cst_135 : f32 to vector<32x1xf32>
    %439 = arith.addf %435, %438 : vector<32x1xf32>
    %440 = math.rsqrt %439 : vector<32x1xf32>
    %441 = vector.broadcast %440 : vector<32x1xf32> to vector<32x128xf32>
    %442 = arith.mulf %437, %441 : vector<32x128xf32>
    %443 = vector.broadcast %421 : vector<1x128xf32> to vector<32x128xf32>
    %444 = arith.mulf %442, %443 : vector<32x128xf32>
    %445 = vector.broadcast %422 : vector<1x128xf32> to vector<32x128xf32>
    %446 = arith.addf %444, %445 : vector<32x128xf32>
    %447 = arith.negf %446 : vector<32x128xf32>
    %448 = math.exp %447 : vector<32x128xf32>
    %cst_136 = arith.constant 1.000000e+00 : f32
    %449 = vector.broadcast %cst_136 : f32 to vector<32x128xf32>
    %450 = arith.addf %449, %448 : vector<32x128xf32>
    %451 = arith.divf %449, %450 : vector<32x128xf32>
    %452 = vector.shape_cast %451 : vector<32x128xf32> to vector<2x16x128xf32>
    %c0_137 = arith.constant 0 : index
    %c0_138 = arith.constant 0 : index
    %c0_139 = arith.constant 0 : index
    %453 = vector.load %arg4[%c0_137, %c0_138, %c0_139] : memref<2x16x128xf32, #tpu.memory_space<vmem>>, vector<2x16x128xf32>
    tpu.vector_store %arg4[%c0_137, %c0_138, %c0_139], %452 {strides = array<i32>} : memref<2x16x128xf32, #tpu.memory_space<vmem>>, vector<2x16x128xf32>,
    return
  }
}

</mosaic_0001>

<bundles_post_ra>
// kernel: vit_object_detection_forward.1
= control target key start
LH: loop header
LB: loop body
LE: loop exit
PB: predicated region body
PF: predicated region fallthrough
CT: control target
= control target key end

     0   :  { %9 = vsyncpa [#allocation3], 0  ;;  %s6687_s0 = inlined_call_operand.hbm [shape: f32[96,128], index: 0, kind: input, shape index: {}]   ;;  %s6688_s1 = inlined_call_operand.hbm [shape: bf16[128,2304], index: 1, kind: input, shape index: {}]   ;;  %s6689_s2 = inlined_call_operand.hbm [shape: f32[36,128], index: 2, kind: input, shape index: {}]   ;;  %s6690_s3 = inlined_call_operand.vmem [shape: f32[4], index: 3, kind: input, shape index: {}]   ;;  %s6691_s4 = inlined_call_operand.hbm [shape: f32[2,16,128], index: 4, kind: output, shape index: {}]  }
   0x1   :  { %10 = vsyncpa [#allocation7], 0 }
   0x2   :  { %11 = vsyncpa [#allocation5], 0 }
   0x3   :  { %12 = vsyncpa [#allocation4], 0  ;;  %s5751_s15 = smov [#allocation6]  }
   0x4   :  { %s30_s16 = sshll.u32 %s5751_s15, 4  ;;  %s31_s16 = int_to_ptr.vmem [resolvable:$true] %s30_s16 }
   0x5   :  { %s5659_s17 = scalar_lea.vmem %s31_s16, 18432  ;;  %p5664_p1 = scmp.lt.s32.totalorder %s31_s16, %s31_s16 }
   0x6   :  { %p5660_p0 = scmp.ne.s32.totalorder %s31_s16, %s5659_s17  ;;  %p5665_p2 = scmp.lt.s32.totalorder %s5659_s17, %s5659_s17 }
   0x8   :  { %p5666_p3 = por %p5665_p2, %p5664_p1 }
   0xa   :  { %p5667_p4 = pnand %p5666_p3, %p5660_p0 }
   0xc   :  { %5670 = shalt.err (!%p5667_p4)
}
   0xd   :  { %s5752_s18 = smov 1152   ;;  %s5753_s19 = smov 72  }
   0xe   :  { %36 = dma.hbm_to_vmem [thread:$0]  %s6688_s1, 18432, %s31_s16, [#allocation7], %s5752_s18, %s5752_s18, %s5753_s19  }
   0xf   :  { %s5754_s22 = smov [#allocation2]  }
  0x10   :  { %s18_s23 = sshll.u32 %s5754_s22, 4  ;;  %s19_s23 = int_to_ptr.vmem [resolvable:$true] %s18_s23 }
  0x11   :  { %s5679_s24 = scalar_lea.vmem %s19_s23, 1536  ;;  %p5684_p6 = scmp.lt.s32.totalorder %s19_s23, %s19_s23 }
  0x12   :  { %p5680_p5 = scmp.ne.s32.totalorder %s19_s23, %s5679_s24  ;;  %p5685_p7 = scmp.lt.s32.totalorder %s5679_s24, %s5679_s24 }
  0x14   :  { %p5686_p8 = por %p5685_p7, %p5684_p6 }
  0x16   :  { %p5687_p9 = pnand %p5686_p8, %p5680_p5 }
  0x18   :  { %5690 = shalt.err (!%p5687_p9)
}
  0x19   :  { %s5755_s25 = smov 128   ;;  %s5756_s26 = smov 8  }
  0x1a   :  { %24 = dma.hbm_to_vmem [thread:$0]  %s6687_s0, 1536, %s19_s23, [#allocation3], %s5755_s25, %s5755_s25, %s5756_s26  }
  0x1b   :  { %s55_s30 = sshll.u32 %s6690_s3, 4  ;;  %s5757_s5 = smov [#allocation8]   ;;  %s56_s30 = int_to_ptr.vmem [resolvable:$true] %s55_s30 }
  0x1c   :  { %s42_s6 = sshll.u32 %s5757_s5, 4  ;;  %s43_s6 = int_to_ptr.vmem [resolvable:$true] %s42_s6 }
  0x1d   :  { %s5699_s7 = scalar_lea.vmem %s43_s6, 640  ;;  %p5704_p11 = scmp.lt.s32.totalorder %s43_s6, %s43_s6 }
  0x1e   :  { %p5700_p10 = scmp.ne.s32.totalorder %s43_s6, %s5699_s7  ;;  %p5705_p12 = scmp.lt.s32.totalorder %s5699_s7, %s5699_s7 }
  0x20   :  { %p5706_p13 = por %p5705_p12, %p5704_p11 }
  0x22   :  { %p5707_p0 = pnand %p5706_p13, %p5700_p10 }
  0x24   :  { %5710 = shalt.err (!%p5707_p0)
}
  0x25   :  { %48 = dma.hbm_to_vmem [thread:$0]  %s6689_s2, 640, %s43_s6, [#allocation7], %s5755_s25, %s5755_s25, %s5756_s26  }
  0x26   :  { %s5711_s9 = scalar_lea.vmem %s56_s30, 16  ;;  %p5716_p2 = scmp.lt.s32.totalorder %s56_s30, %s56_s30 }
  0x27   :  { %p5712_p1 = scmp.ne.s32.totalorder %s56_s30, %s5711_s9  ;;  %p5717_p3 = scmp.lt.s32.totalorder %s5711_s9, %s5711_s9 }
  0x29   :  { %p5718_p4 = por %p5717_p3, %p5716_p2 }
  0x2b   :  { %p5719_p5 = pnand %p5718_p4, %p5712_p1 }
  0x2d   :  { %5722 = shalt.err (!%p5719_p5)
}
  0x2e   :  { %s5758_s3 = smov [#allocation9]  }
  0x2f   :  { %58 = dma.vmem_to_smem %s56_s30, 16, %s5758_s3, [#allocation5]  }
  0x30   :  { %5743 = dma.done.wait [#allocation3], 1536  }
  0x31   :  { %5744 = vsyncadd [#allocation3], 4294965760 }
  0x32   :  { %5745 = dma.done.wait [#allocation7], 19072  }
  0x33   :  { %5746 = vsyncadd [#allocation7], 4294948224 }
  0x34   :  { %5747 = dma.done.wait [#allocation5], 16  }
  0x35   :  { %5748 = vsyncadd [#allocation5], 4294967280 }
  0x36   :  { %71 = sfence }
  0x37   :  { %v5251_v0 = vld [vmem:[#allocation6 + $0x3f4] ss:$72 sps:$4 sm:$0xff]   ;;  %v5253_v1 = vld [vmem:[#allocation6 + $0x3f0] ss:$72 sps:$4 sm:$0xff]   ;;  %v5759_v2 = vmov 0   ;;  %v81_v10 = vld [vmem:[#allocation2 + $0x40] sm:$0xff] }
  0x38   :  { %283 = vmatprep.mubr.bf16.mxu0 %v5759_v2  ;;  %251 = vmatprep.subr.bf16.mxu0 %v5251_v0  ;;  %v5254_v3 = vld [vmem:[#allocation6 + $0x364] ss:$72 sps:$4 sm:$0xff]   ;;  %v5256_v4 = vld [vmem:[#allocation6 + $0x360] ss:$72 sps:$4 sm:$0xff]   ;;  %v5257_v5 = vld [vmem:[#allocation6 + $0x2d4] ss:$72 sps:$4 sm:$0xff]  }
  0x39   :  { %252 = vmatpush1.bf16.msra.mxu0 %v5253_v1  ;;  %v5259_v6 = vld [vmem:[#allocation6 + $0x2d0] ss:$72 sps:$4 sm:$0xff]   ;;  %v5260_v7 = vld [vmem:[#allocation6 + $0x244] ss:$72 sps:$4 sm:$0xff]   ;;  %v5262_v8 = vld [vmem:[#allocation6 + $0x240] ss:$72 sps:$4 sm:$0xff]  }
  0x3a   :  { %253 = vmatprep.subr.bf16.mxu0 %v5254_v3  ;;  %v5263_v9 = vld [vmem:[#allocation6 + $0x1b4] ss:$72 sps:$4 sm:$0xff]   ;;  %v82_v11 = vld [vmem:[#allocation2 + $0x48] sm:$0xff]  ;;  %v5265_v12 = vld [vmem:[#allocation6 + $0x1b0] ss:$72 sps:$4 sm:$0xff]   ;;  %v5760_v43 = vmov 0.0  }
  0x3b   :  { %v5266_v13 = vld [vmem:[#allocation6 + $0x124] ss:$72 sps:$4 sm:$0xff]   ;;  %v5807_v14 = vpack.c.bf16 %v82_v11, %v81_v10  ;;  %v5275_v15 = vld [vmem:[#allocation6 + $0x3f8] ss:$72 sps:$4 sm:$0xff]   ;;  %v5276_v16 = vld [vmem:[#allocation6 + $0x368] ss:$72 sps:$4 sm:$0xff]  }
  0x3c   :  { %5223 = vmatprep.subr.bf16.mxu1 %v5275_v15  ;;  %v5268_v17 = vld [vmem:[#allocation6 + $0x120] ss:$72 sps:$4 sm:$0xff]   ;;  %v5269_v19 = vld [vmem:[#allocation6 + $0x94] ss:$72 sps:$4 sm:$0xff]   ;;  %v5271_v20 = vld [vmem:[#allocation6 + $0x90] ss:$72 sps:$4 sm:$0xff]  }
  0x3d   :  { %254 = vmatpush1.bf16.msra.mxu0 %v5256_v4  ;;  %4855 = vmatprep.mubr.bf16.mxu1 %v5807_v14  ;;  %v5277_v18 = vld [vmem:[#allocation6 + $0x2d8] ss:$72 sps:$4 sm:$0xff]   ;;  %v5278_v21 = vld [vmem:[#allocation6 + $0x248] ss:$72 sps:$4 sm:$0xff]   ;;  %v5272_v22 = vld [vmem:[#allocation6 + $0x4] ss:$72 sps:$4 sm:$0xff]  }
  0x3e   :  { %255 = vmatprep.subr.bf16.mxu0 %v5257_v5  ;;  %5231 = vmatpush3.bf16.msra.mxu1 %v5275_v15  ;;  %v5274_v23 = vld [vmem:[#allocation6] ss:$72 sps:$4 sm:$0xff]   ;;  %v75_v29 = vld [vmem:[#allocation2 + $0x10] sm:$0xff]  ;;  %v76_v30 = vld [vmem:[#allocation2 + $0x18] sm:$0xff]  ;;  %vm5761_vm0 = vmmov 0   ;;  %vm740_vm1 = vcmask 130048  }
  0x3f   :  { %5224 = vmatprep.subr.bf16.mxu1 %v5276_v16  ;;  %v73_v24 = vld [vmem:[#allocation2] sm:$0xff]  ;;  %v74_v25 = vld [vmem:[#allocation2 + $0x8] sm:$0xff]  ;;  %v86_v32 = vpack.c.bf16 %v76_v30, %v75_v29  ;;  %v79_v36 = vld [vmem:[#allocation2 + $0x30] sm:$0xff]  ;;  %s6337_s2 = sld [smem:[#allocation9]]  ;;  %s5762_s13 = smov [#allocation10]  }
  0x40   :  { %v5279_v26 = vld [vmem:[#allocation6 + $0x1b8] ss:$72 sps:$4 sm:$0xff]   ;;  %v85_v27 = vpack.c.bf16 %v74_v25, %v73_v24  ;;  %v5280_v28 = vld [vmem:[#allocation6 + $0x128] ss:$72 sps:$4 sm:$0xff]   ;;  %s6345_s10 = sld [smem:[#allocation9 + $0x1]]  ;;  %s4444_s14 = sshll.u32 %s5762_s13, 4  ;;  %s4445_s14 = int_to_ptr.vmem [resolvable:$true] %s4444_s14 }
  0x41   :  { %256 = vmatpush1.bf16.msra.mxu0 %v5259_v6  ;;  %v5281_v31 = vld [vmem:[#allocation6 + $0x98] ss:$72 sps:$4 sm:$0xff]   ;;  %v78_v34 = vld [vmem:[#allocation2 + $0x28] sm:$0xff]  ;;  %v83_v39 = vld [vmem:[#allocation2 + $0x50] sm:$0xff]  ;;  %s6354_s11 = sld [smem:[#allocation9 + $0x2]]  ;;  %s5723_s15 = scalar_lea.vmem %s4445_s14, 512 }
  0x42   :  { %257 = vmatprep.subr.bf16.mxu0 %v5260_v7  ;;  %5232 = vmatpush3.bf16.msra.mxu1 %v5276_v16  ;;  %v77_v33 = vld [vmem:[#allocation2 + $0x20] sm:$0xff]  ;;  %v80_v37 = vld [vmem:[#allocation2 + $0x38] sm:$0xff]  ;;  %v5282_v42 = vld [vmem:[#allocation6 + $0x8] ss:$72 sps:$4 sm:$0xff]   ;;  %s4524_s12 = sld [smem:[#allocation9 + $0x3]]  ;;  %p5724_p6 = scmp.ne.s32.totalorder %s4445_s14, %s5723_s15 }
  0x43   :  { %5225 = vmatprep.subr.bf16.mxu1 %v5277_v18  ;;  %v87_v35 = vpack.c.bf16 %v78_v34, %v77_v33  ;;  %v88_v38 = vpack.c.bf16 %v80_v37, %v79_v36  ;;  %v84_v40 = vld [vmem:[#allocation2 + $0x58] sm:$0xff]  ;;  %v5822_v46 = vld [vmem:[#allocation8 + $0x1] ss:$0 sm:$0xff]  ;;  %v5826_v54 = vld [vmem:[#allocation8] ss:$0 sm:$0xff]  ;;  %p5728_p7 = scmp.lt.s32.totalorder %s4445_s14, %s4445_s14  ;;  %p5729_p8 = scmp.lt.s32.totalorder %s5723_s15, %s5723_s15 }
  0x44   :  { %v90_v41 = vpack.c.bf16 %v84_v40, %v83_v39 }
  0x45   :  { %258 = vmatpush1.bf16.msra.mxu0 %v5262_v8  ;;  %p5730_p9 = por %p5729_p8, %p5728_p7 }
  0x46   :  { %259 = vmatprep.subr.bf16.mxu0 %v5263_v9  ;;  %5233 = vmatpush3.bf16.msra.mxu1 %v5277_v18 }
  0x47   :  { %5226 = vmatprep.subr.bf16.mxu1 %v5278_v21  ;;  %p5731_p10 = pnand %p5730_p9, %p5724_p6 }
  0x49   :  { %260 = vmatpush1.bf16.msra.mxu0 %v5265_v12 }
  0x4a   :  { %261 = vmatprep.subr.bf16.mxu0 %v5266_v13  ;;  %5234 = vmatpush3.bf16.msra.mxu1 %v5278_v21 }
  0x4b   :  { %5227 = vmatprep.subr.bf16.mxu1 %v5279_v26 }
  0x4d   :  { %262 = vmatpush1.bf16.msra.mxu0 %v5268_v17 }
  0x4e   :  { %263 = vmatprep.subr.bf16.mxu0 %v5269_v19  ;;  %5235 = vmatpush3.bf16.msra.mxu1 %v5279_v26 }
  0x4f   :  { %5228 = vmatprep.subr.bf16.mxu1 %v5280_v28 }
  0x51   :  { %264 = vmatpush1.bf16.msra.mxu0 %v5271_v20 }
  0x52   :  { %265 = vmatprep.subr.bf16.mxu0 %v5272_v22  ;;  %5236 = vmatpush3.bf16.msra.mxu1 %v5280_v28 }
  0x53   :  { %5229 = vmatprep.subr.bf16.mxu1 %v5281_v31 }
  0x55   :  { %266 = vmatpush1.bf16.msra.mxu0 %v5274_v23 }
  0x56   :  { %4831 = vmatprep.subr.bf16.mxu0 %v5275_v15  ;;  %5237 = vmatpush3.bf16.msra.mxu1 %v5281_v31 }
  0x57   :  { %5230 = vmatprep.subr.bf16.mxu1 %v5282_v42 }
  0x58   :  { %284 = vmatmul.mubr.bf16.vlgmr.msra.gmra.mxu0 %v85_v27 }
  0x59   :  { %293 = vmatprep.mubr.bf16.mxu0 %v5759_v2  ;;  %4832 = vmatpush3.bf16.msra.mxu0 %v5275_v15 }
  0x5a   :  { %4833 = vmatprep.subr.bf16.mxu0 %v5276_v16  ;;  %5238 = vmatpush3.bf16.msra.mxu1 %v5282_v42 }
  0x5b   :  { %4859 = vmatprep.subr.bf16.mxu1 %v5760_v43 }
  0x5d   :  { %4834 = vmatpush3.bf16.msra.mxu0 %v5276_v16  ;;  %4856 = vmatmul.mubr.bf16.vlgmr.msra.gmra.mxu1 %v90_v41 }
  0x5e   :  { %4835 = vmatprep.subr.bf16.mxu0 %v5277_v18  ;;  %4861 = vmatprep.mubr.msk.bf16.mxu1 %vm5761_vm0, %v5760_v43 }
  0x60   :  { %294 = vmatmul.mubr.bf16.gmra.mxu0 %v86_v32 }
  0x61   :  { %303 = vmatprep.mubr.bf16.mxu0 %v5759_v2  ;;  %4836 = vmatpush3.bf16.msra.mxu0 %v5277_v18 }
  0x62   :  { %4837 = vmatprep.subr.bf16.mxu0 %v5278_v21 }
  0x65   :  { %4838 = vmatpush3.bf16.msra.mxu0 %v5278_v21 }
  0x66   :  { %4839 = vmatprep.subr.bf16.mxu0 %v5279_v26 }
  0x68   :  { %304 = vmatmul.mubr.bf16.gmra.mxu0 %v87_v35 }
  0x69   :  { %313 = vmatprep.mubr.bf16.mxu0 %v5759_v2  ;;  %4840 = vmatpush3.bf16.msra.mxu0 %v5279_v26 }
  0x6a   :  { %4841 = vmatprep.subr.bf16.mxu0 %v5280_v28 }
  0x6d   :  { %4842 = vmatpush3.bf16.msra.mxu0 %v5280_v28 }
  0x6e   :  { %4843 = vmatprep.subr.bf16.mxu0 %v5281_v31 }
  0x70   :  { %314 = vmatmul.mubr.bf16.gmra.mxu0 %v88_v38 }
  0x71   :  { %323 = vmatprep.mubr.bf16.mxu0 %v5759_v2  ;;  %4844 = vmatpush3.bf16.msra.mxu0 %v5281_v31 }
  0x72   :  { %4845 = vmatprep.subr.bf16.mxu0 %v5282_v42 }
  0x75   :  { %4846 = vmatpush3.bf16.msra.mxu0 %v5282_v42 }
  0x76   :  { %4877 = vmatprep.subr.bf16.mxu0 %v5760_v43 }
  0x78   :  { %324 = vmatmul.mubr.bf16.gmra.mxu0 %v5807_v14 }
  0x79   :  { %333 = vmatprep.mubr.bf16.mxu0 %v5759_v2 }
  0x80   :  { %334 = vmatmul.mubr.bf16.gmra.mxu0 %v90_v41 }
  0x81   :  { %4847 = vmatprep.mubr.bf16.mxu0 %v85_v27 }
  0x88   :  { %4848 = vmatmul.mubr.bf16.vlgmr.msra.gmra.mxu0 %v86_v32 }
  0x89   :  { %4851 = vmatprep.mubr.bf16.mxu0 %v87_v35 }
  0x90   :  { %4852 = vmatmul.mubr.bf16.gmra.mxu0 %v88_v38 }
  0x91   :  { %4879 = vmatprep.mubr.msk.bf16.mxu0 %vm5761_vm0, %v5760_v43 }
 0x118   :  { %v285_v44 = vpop.f32.mrf.mxu0 }
 0x119   :  { %v430_v57 = vadd.f32 %v5826_v54, %v285_v44  ;;  %v4484_v44 = vld [vmem:[#allocation8 + $0x2] ss:$0 sm:$0xff] }
 0x11a   :  { %v287_v45 = vpop.f32.mrf.mxu0 }
 0x11b   :  { %v453_v49 = vadd.f32 %v5822_v46, %v287_v45 }
 0x11c   :  { %v289_v47 = vpop.f32.mrf.mxu0 }
 0x11d   :  { %v431_v55 = vadd.f32 %v5826_v54, %v289_v47  ;;  %v4857_v45 = vpop.f32.mrf.mxu1 }
 0x11e   :  { %v291_v48 = vpop.f32.mrf.mxu0 }
 0x11f   :  { %v454_v50 = vadd.f32 %v5822_v46, %v291_v48  ;;  %v442_v61 = vpack.c.bf16 %v431_v55, %v430_v57  ;;  %v410_v47 = vpop.f32.mrf.mxu1 }
 0x120   :  { %v295_v51 = vpop.f32.mrf.mxu0  ;;  %v5870_v48 = vadd.f32 %v4484_v44, %v410_v47 }
 0x121   :  { %v465_v52 = vpack.c.bf16 %v454_v50, %v453_v49  ;;  %v432_v4 = vadd.f32 %v5826_v54, %v295_v51  ;;  %v4858_v49 = vpop.f32.mrf.mxu1 }
 0x122   :  { %v297_v53 = vpop.f32.mrf.mxu0  ;;  %v5872_v50 = vadd.f32 %v4858_v49, %v4484_v44 }
 0x123   :  { %4860 = vmatpush3.bf16.xpose.msra.mxu1 %v465_v52  ;;  %v455_v59 = vadd.f32 %v5822_v46, %v297_v53  ;;  %v413_v51 = vpop.f32.mrf.mxu1 }
 0x124   :  { %v299_v56 = vpop.f32.mrf.mxu0  ;;  %4865 = vmatprep.subr.bf16.mxu1 %v5760_v43  ;;  %v5876_v53 = vadd.f32 %v4484_v44, %v413_v51 }
 0x125   :  { %v433_v1 = vadd.f32 %v5826_v54, %v299_v56 }
 0x126   :  { %v301_v58 = vpop.f32.mrf.mxu0 }
 0x127   :  { %v456_v60 = vadd.f32 %v5822_v46, %v301_v58  ;;  %v443_v8 = vpack.c.bf16 %v433_v1, %v432_v4 }
 0x128   :  { %v305_v62 = vpop.f32.mrf.mxu0 }
 0x129   :  { %v466_v63 = vpack.c.bf16 %v456_v60, %v455_v59  ;;  %v434_v14 = vadd.f32 %v5826_v54, %v305_v62 }
 0x12a   :  { %v307_v0 = vpop.f32.mrf.mxu0  ;;  %4862 = vmatmul.mubr.bf16.vlgmr.msra.gmra.mxu1 %v442_v61 }
 0x12b   :  { %4866 = vmatpush3.bf16.xpose.msra.mxu1 %v466_v63  ;;  %4867 = vmatprep.mubr.msk.bf16.mxu1 %vm5761_vm0, %v5760_v43  ;;  %v457_v6 = vadd.f32 %v5822_v46, %v307_v0 }
 0x12c   :  { %v309_v3 = vpop.f32.mrf.mxu0  ;;  %4871 = vmatprep.subr.bf16.mxu1 %v5760_v43 }
 0x12d   :  { %v435_v12 = vadd.f32 %v5826_v54, %v309_v3 }
 0x12e   :  { %v311_v5 = vpop.f32.mrf.mxu0 }
 0x12f   :  { %v458_v7 = vadd.f32 %v5822_v46, %v311_v5  ;;  %v444_v18 = vpack.c.bf16 %v435_v12, %v434_v14 }
 0x130   :  { %v315_v9 = vpop.f32.mrf.mxu0 }
 0x131   :  { %v467_v10 = vpack.c.bf16 %v458_v7, %v457_v6  ;;  %v436_v24 = vadd.f32 %v5826_v54, %v315_v9 }
 0x132   :  { %v317_v11 = vpop.f32.mrf.mxu0  ;;  %4868 = vmatmul.mubr.bf16.vlgmr.msra.gmra.mxu1 %v443_v8 }
 0x133   :  { %4872 = vmatpush3.bf16.xpose.msra.mxu1 %v467_v10  ;;  %4873 = vmatprep.mubr.msk.bf16.mxu1 %vm5761_vm0, %v5760_v43  ;;  %v459_v16 = vadd.f32 %v5822_v46, %v317_v11 }
 0x134   :  { %v319_v13 = vpop.f32.mrf.mxu0  ;;  %4883 = vmatprep.subr.bf16.mxu1 %v5760_v43 }
 0x135   :  { %v437_v22 = vadd.f32 %v5826_v54, %v319_v13 }
 0x136   :  { %v321_v15 = vpop.f32.mrf.mxu0 }
 0x137   :  { %v460_v17 = vadd.f32 %v5822_v46, %v321_v15  ;;  %v445_v28 = vpack.c.bf16 %v437_v22, %v436_v24 }
 0x138   :  { %v325_v19 = vpop.f32.mrf.mxu0 }
 0x139   :  { %v468_v20 = vpack.c.bf16 %v460_v17, %v459_v16  ;;  %v438_v34 = vadd.f32 %v5826_v54, %v325_v19 }
 0x13a   :  { %v327_v21 = vpop.f32.mrf.mxu0  ;;  %4874 = vmatmul.mubr.bf16.vlgmr.msra.gmra.mxu1 %v444_v18 }
 0x13b   :  { %4878 = vmatpush3.bf16.xpose.msra.mxu0 %v468_v20  ;;  %4885 = vmatprep.mubr.msk.bf16.mxu1 %vm5761_vm0, %v5760_v43  ;;  %v461_v26 = vadd.f32 %v5822_v46, %v327_v21 }
 0x13c   :  { %v329_v23 = vpop.f32.mrf.mxu0  ;;  %4889 = vmatprep.subr.bf16.mxu0 %v5760_v43 }
 0x13d   :  { %v439_v32 = vadd.f32 %v5826_v54, %v329_v23 }
 0x13e   :  { %v331_v25 = vpop.f32.mrf.mxu0 }
 0x13f   :  { %v462_v27 = vadd.f32 %v5822_v46, %v331_v25  ;;  %v446_v38 = vpack.c.bf16 %v439_v32, %v438_v34 }
 0x140   :  { %v335_v29 = vpop.f32.mrf.mxu0 }
 0x141   :  { %v469_v30 = vpack.c.bf16 %v462_v27, %v461_v26  ;;  %v440_v41 = vadd.f32 %v5826_v54, %v335_v29 }
 0x142   :  { %v337_v31 = vpop.f32.mrf.mxu0  ;;  %4880 = vmatmul.mubr.bf16.vlgmr.msra.gmra.mxu0 %v445_v28 }
 0x143   :  { %4884 = vmatpush3.bf16.xpose.msra.mxu1 %v469_v30  ;;  %4891 = vmatprep.mubr.msk.bf16.mxu0 %vm5761_vm0, %v5760_v43  ;;  %v463_v36 = vadd.f32 %v5822_v46, %v337_v31 }
 0x144   :  { %v339_v33 = vpop.f32.mrf.mxu0  ;;  %4895 = vmatprep.subr.bf16.mxu1 %v5760_v43 }
 0x145   :  { %v441_v40 = vadd.f32 %v5826_v54, %v339_v33  ;;  %v492_v54 = vpack.c.bf16 %v5876_v53, %v5870_v48 }
 0x146   :  { %v341_v35 = vpop.f32.mrf.mxu0 }
 0x147   :  { %v464_v37 = vadd.f32 %v5822_v46, %v341_v35  ;;  %v447_v42 = vpack.c.bf16 %v441_v40, %v440_v41  ;;  %v5868_v46 = vadd.f32 %v4857_v45, %v4484_v44 }
 0x148   :  { %v4849_v55 = vpop.f32.mrf.mxu0 }
 0x149   :  { %v470_v39 = vpack.c.bf16 %v464_v37, %v463_v36  ;;  %v493_v52 = vpack.c.bf16 %v5872_v50, %v5868_v46  ;;  %v478_v57 = vadd.f32 %v4849_v55, %v4484_v44 }
 0x14a   :  { %4886 = vmatmul.mubr.bf16.vlgmr.msra.gmra.mxu1 %v446_v38  ;;  %v378_v56 = vpop.f32.mrf.mxu0 }
 0x14b   :  { %4890 = vmatpush3.bf16.xpose.msra.mxu0 %v470_v39  ;;  %4897 = vmatprep.mubr.msk.bf16.mxu1 %vm5761_vm0, %v5760_v43  ;;  %v476_v59 = vadd.f32 %v4484_v44, %v378_v56 }
 0x14c   :  { %4901 = vmatprep.subr.bf16.mxu0 %v5760_v43  ;;  %v4850_v58 = vpop.f32.mrf.mxu0 }
 0x14d   :  { %v479_v60 = vadd.f32 %v4850_v58, %v4484_v44 }
 0x14e   :  { %v381_v61 = vpop.f32.mrf.mxu0 }
 0x14f   :  { %v489_v62 = vpack.c.bf16 %v479_v60, %v478_v57  ;;  %v477_v63 = vadd.f32 %v4484_v44, %v381_v61 }
 0x150   :  { %v4853_v0 = vpop.f32.mrf.mxu0 }
 0x151   :  { %v488_v1 = vpack.c.bf16 %v477_v63, %v476_v59  ;;  %v5880_v3 = vadd.f32 %v4853_v0, %v4484_v44 }
 0x152   :  { %4892 = vmatmul.mubr.bf16.vlgmr.msra.gmra.mxu0 %v447_v42  ;;  %v394_v4 = vpop.f32.mrf.mxu0 }
 0x153   :  { %4903 = vmatprep.mubr.msk.bf16.mxu0 %vm5761_vm0, %v5760_v43  ;;  %4902 = vmatpush3.bf16.msra.mxu0 %v489_v62  ;;  %v5883_v5 = vadd.f32 %v4484_v44, %v394_v4 }
 0x154   :  { %4913 = vmatprep.subr.bf16.mxu0 %v5760_v43  ;;  %4896 = vmatpush3.bf16.msra.mxu1 %v488_v1  ;;  %v4854_v6 = vpop.f32.mrf.mxu0 }
 0x155   :  { %4907 = vmatprep.subr.bf16.mxu1 %v5760_v43  ;;  %v5886_v7 = vadd.f32 %v4854_v6, %v4484_v44 }
 0x156   :  { %v397_v8 = vpop.f32.mrf.mxu0 }
 0x157   :  { %v491_v9 = vpack.c.bf16 %v5886_v7, %v5880_v3  ;;  %v5890_v10 = vadd.f32 %v4484_v44, %v397_v8 }
 0x159   :  { %v490_v11 = vpack.c.bf16 %v5890_v10, %v5883_v5 }
 0x1ea   :  { %v528_v12 = vpop.f32.mrf.mxu1 }
 0x1eb   :  { %v741_v13 = vsel %vm740_vm1, %v528_v12, -inf }
 0x1ec   :  { %742 = vmax.xlane.f32.xlu0 %v741_v13  ;;  %v4863_v14 = vpop.f32.mrf.mxu1 }
 0x1ee   :  { %v531_v15 = vpop.f32.mrf.mxu1 }
 0x1ef   :  { %v744_v16 = vsel %vm740_vm1, %v531_v15, -inf }
 0x1f0   :  { %745 = vmax.xlane.f32.xlu0 %v744_v16  ;;  %v4864_v17 = vpop.f32.mrf.mxu1 }
 0x1f2   :  { %v569_v18 = vpop.f32.mrf.mxu1 }
 0x1f3   :  { %v747_v19 = vsel %vm740_vm1, %v569_v18, -inf }
 0x1f4   :  { %748 = vmax.xlane.f32.xlu1 %v747_v19  ;;  %v4869_v20 = vpop.f32.mrf.mxu1 }
 0x1f6   :  { %v572_v21 = vpop.f32.mrf.mxu1 }
 0x1f7   :  { %v750_v22 = vsel %vm740_vm1, %v572_v21, -inf }
 0x1f8   :  { %751 = vmax.xlane.f32.xlu1 %v750_v22  ;;  %v4870_v23 = vpop.f32.mrf.mxu1 }
 0x1fa   :  { %v610_v24 = vpop.f32.mrf.mxu1 }
 0x1fb   :  { %v753_v25 = vsel %vm740_vm1, %v610_v24, -inf }
 0x1fc   :  { %754 = vmax.xlane.f32.xlu0 %v753_v25  ;;  %v4875_v26 = vpop.f32.mrf.mxu1 }
 0x1fe   :  { %v613_v27 = vpop.f32.mrf.mxu1 }
 0x1ff   :  { %v756_v28 = vsel %vm740_vm1, %v613_v27, -inf }
 0x200   :  { %757 = vmax.xlane.f32.xlu1 %v756_v28  ;;  %v4876_v29 = vpop.f32.mrf.mxu1 }
 0x202   :  { %v651_v30 = vpop.f32.mrf.mxu0 }
 0x203   :  { %v759_v31 = vsel %vm740_vm1, %v651_v30, -inf }
 0x204   :  { %760 = vmax.xlane.f32.xlu0 %v759_v31  ;;  %v4881_v32 = vpop.f32.mrf.mxu0 }
 0x206   :  { %v654_v33 = vpop.f32.mrf.mxu0 }
 0x207   :  { %v762_v34 = vsel %vm740_vm1, %v654_v33, -inf }
 0x208   :  { %763 = vmax.xlane.f32.xlu1 %v762_v34  ;;  %v4882_v35 = vpop.f32.mrf.mxu0 }
 0x20a   :  { %v5902_v36 = vpop.f32.mrf.mxu1 }
 0x20b   :  { %v765_v37 = vsel %vm740_vm1, %v5902_v36, -inf }
 0x20c   :  { %v4887_v38 = vpop.f32.mrf.mxu1  ;;  %766 = vmax.xlane.f32.xlu0 %v765_v37 }
 0x20e   :  { %v5906_v39 = vpop.f32.mrf.mxu1 }
 0x20f   :  { %v768_v40 = vsel %vm740_vm1, %v5906_v39, -inf }
 0x210   :  { %v4888_v41 = vpop.f32.mrf.mxu1  ;;  %769 = vmax.xlane.f32.xlu1 %v768_v40 }
 0x212   :  { %v5910_v42 = vpop.f32.mrf.mxu0 }
 0x213   :  { %v771_v44 = vsel %vm740_vm1, %v5910_v42, -inf }
 0x214   :  { %772 = vmax.xlane.f32.xlu0 %v771_v44  ;;  %v4893_v45 = vpop.f32.mrf.mxu0 }
 0x216   :  { %v5914_v47 = vpop.f32.mrf.mxu0 }
 0x217   :  { %v774_v49 = vsel %vm740_vm1, %v5914_v47, -inf }
 0x218   :  { %775 = vmax.xlane.f32.xlu1 %v774_v49  ;;  %v4894_v51 = vpop.f32.mrf.mxu0 }
 0x275   :  { %v743_v55 = vpop.xlane.xlu0 %742 }
 0x276   :  { %v777_v56 = vsub.f32 %v528_v12, %v743_v55 }
 0x278   :  { %v789_v57 = vmul.f32 1.442695, %v777_v56 }
 0x279   :  { %v746_v58 = vpop.xlane.xlu0 %745 }
 0x27a   :  { %5419 = vpow2.f32 %v789_v57  ;;  %v778_v59 = vsub.f32 %v531_v15, %v746_v58 }
 0x27c   :  { %v791_v60 = vmul.f32 1.442695, %v778_v59 }
 0x27d   :  { %v749_v61 = vpop.xlane.xlu1 %748 }
 0x27e   :  { %5421 = vpow2.f32 %v791_v60  ;;  %v779_v62 = vsub.f32 %v569_v18, %v749_v61 }
 0x280   :  { %v793_v63 = vmul.f32 1.442695, %v779_v62 }
 0x281   :  { %v752_v0 = vpop.xlane.xlu1 %751 }
 0x282   :  { %5423 = vpow2.f32 %v793_v63  ;;  %v780_v1 = vsub.f32 %v572_v21, %v752_v0 }
 0x284   :  { %v795_v4 = vmul.f32 1.442695, %v780_v1 }
 0x285   :  { %v755_v6 = vpop.xlane.xlu0 %754 }
 0x286   :  { %5425 = vpow2.f32 %v795_v4  ;;  %v781_v8 = vsub.f32 %v610_v24, %v755_v6 }
 0x287   :  { %v5918_v13 = vpop.eup %5419 }
 0x288   :  { %v797_v14 = vmul.f32 1.442695, %v781_v8  ;;  %v813_v12 = vsel %vm740_vm1, %v5918_v13, 0.0 }
 0x289   :  { %v758_v16 = vpop.xlane.xlu1 %757  ;;  %814 = vadd.xlane.f32.xlu0 %v813_v12 }
 0x28a   :  { %5427 = vpow2.f32 %v797_v14  ;;  %v782_v15 = vsub.f32 %v613_v27, %v758_v16 }
 0x28b   :  { %v5922_v17 = vpop.eup %5421 }
 0x28c   :  { %v799_v18 = vmul.f32 1.442695, %v782_v15  ;;  %v816_v19 = vsel %vm740_vm1, %v5922_v17, 0.0 }
 0x28d   :  { %v761_v20 = vpop.xlane.xlu0 %760  ;;  %817 = vadd.xlane.f32.xlu1 %v816_v19 }
 0x28e   :  { %5429 = vpow2.f32 %v799_v18  ;;  %v783_v21 = vsub.f32 %v651_v30, %v761_v20 }
 0x28f   :  { %v5926_v22 = vpop.eup %5423 }
 0x290   :  { %v801_v23 = vmul.f32 1.442695, %v783_v21  ;;  %v819_v24 = vsel %vm740_vm1, %v5926_v22, 0.0 }
 0x291   :  { %v764_v25 = vpop.xlane.xlu1 %763  ;;  %820 = vadd.xlane.f32.xlu0 %v819_v24 }
 0x292   :  { %5431 = vpow2.f32 %v801_v23  ;;  %v784_v26 = vsub.f32 %v654_v33, %v764_v25 }
 0x293   :  { %v5930_v27 = vpop.eup %5425 }
 0x294   :  { %v803_v28 = vmul.f32 1.442695, %v784_v26  ;;  %v822_v29 = vsel %vm740_vm1, %v5930_v27, 0.0 }
 0x295   :  { %v767_v31 = vpop.xlane.xlu0 %766  ;;  %823 = vadd.xlane.f32.xlu1 %v822_v29 }
 0x296   :  { %5433 = vpow2.f32 %v803_v28  ;;  %v785_v30 = vsub.f32 %v5902_v36, %v767_v31  ;;  %v5283_v31 = vld [vmem:[#allocation6 + $0x3fc] ss:$72 sps:$4 sm:$0xff]  }
 0x297   :  { %v5935_v32 = vpop.eup %5427 }
 0x298   :  { %v805_v34 = vmul.f32 1.442695, %v785_v30  ;;  %v825_v35 = vsel %vm740_vm1, %v5935_v32, 0.0 }
 0x299   :  { %v770_v37 = vpop.xlane.xlu1 %769  ;;  %826 = vadd.xlane.f32.xlu0 %v825_v35 }
 0x29a   :  { %5435 = vpow2.f32 %v805_v34  ;;  %v786_v33 = vsub.f32 %v5906_v39, %v770_v37 }
 0x29b   :  { %v5940_v38 = vpop.eup %5429 }
 0x29c   :  { %v807_v40 = vmul.f32 1.442695, %v786_v33  ;;  %v828_v41 = vsel %vm740_vm1, %v5940_v38, 0.0 }
 0x29d   :  { %v773_v44 = vpop.xlane.xlu0 %772  ;;  %829 = vadd.xlane.f32.xlu1 %v828_v41  ;;  %v5285_v41 = vld [vmem:[#allocation6 + $0x2dc] ss:$72 sps:$4 sm:$0xff]  }
 0x29e   :  { %5437 = vpow2.f32 %v807_v40  ;;  %v787_v36 = vsub.f32 %v5910_v42, %v773_v44 }
 0x29f   :  { %v5945_v45 = vpop.eup %5431 }
 0x2a0   :  { %v809_v49 = vmul.f32 1.442695, %v787_v36  ;;  %v831_v51 = vsel %vm740_vm1, %v5945_v45, 0.0  ;;  %v5286_v36 = vld [vmem:[#allocation6 + $0x24c] ss:$72 sps:$4 sm:$0xff]  }
 0x2a1   :  { %832 = vadd.xlane.f32.xlu0 %v831_v51  ;;  %v776_v55 = vpop.xlane.xlu1 %775  ;;  %v5289_v51 = vld [vmem:[#allocation6 + $0x9c] ss:$72 sps:$4 sm:$0xff]  }
 0x2a2   :  { %5439 = vpow2.f32 %v809_v49  ;;  %v788_v39 = vsub.f32 %v5914_v47, %v776_v55  ;;  %v5288_v49 = vld [vmem:[#allocation6 + $0x12c] ss:$72 sps:$4 sm:$0xff]  }
 0x2a3   :  { %v5950_v56 = vpop.eup %5433  ;;  %v5290_v55 = vld [vmem:[#allocation6 + $0xc] ss:$72 sps:$4 sm:$0xff]  }
 0x2a4   :  { %v811_v57 = vmul.f32 1.442695, %v788_v39  ;;  %v834_v58 = vsel %vm740_vm1, %v5950_v56, 0.0 }
 0x2a5   :  { %835 = vadd.xlane.f32.xlu1 %v834_v58 }
 0x2a6   :  { %5441 = vpow2.f32 %v811_v57 }
 0x2a7   :  { %v5954_v42 = vpop.eup %5435 }
 0x2a8   :  { %v837_v59 = vsel %vm740_vm1, %v5954_v42, 0.0 }
 0x2a9   :  { %838 = vadd.xlane.f32.xlu0 %v837_v59 }
 0x2ab   :  { %v5958_v60 = vpop.eup %5437 }
 0x2ac   :  { %v840_v61 = vsel %vm740_vm1, %v5958_v60, 0.0 }
 0x2ad   :  { %841 = vadd.xlane.f32.xlu1 %v840_v61 }
 0x2af   :  { %v5962_v47 = vpop.eup %5439 }
 0x2b0   :  { %v843_v62 = vsel %vm740_vm1, %v5962_v47, 0.0 }
 0x2b1   :  { %844 = vadd.xlane.f32.xlu0 %v843_v62 }
 0x2b3   :  { %v5966_v63 = vpop.eup %5441 }
 0x2b4   :  { %v846_v0 = vsel %vm740_vm1, %v5966_v63, 0.0 }
 0x2b5   :  { %847 = vadd.xlane.f32.xlu1 %v846_v0 }
 0x312   :  { %v815_v1 = vpop.xlane.xlu0 %814 }
 0x313   :  { %5443 = vrcp.f32 %v815_v1 }
 0x316   :  { %v818_v4 = vpop.xlane.xlu1 %817 }
 0x317   :  { %5445 = vrcp.f32 %v818_v4 }
 0x31a   :  { %v821_v6 = vpop.xlane.xlu0 %820 }
 0x31b   :  { %5447 = vrcp.f32 %v821_v6 }
 0x31e   :  { %v824_v8 = vpop.xlane.xlu1 %823 }
 0x31f   :  { %5449 = vrcp.f32 %v824_v8 }
 0x320   :  { %v5444_v14 = vpop.eup %5443 }
 0x321   :  { %v861_v15 = vmul.f32 %v5444_v14, %v5918_v13 }
 0x322   :  { %v827_v12 = vpop.xlane.xlu0 %826 }
 0x323   :  { %5451 = vrcp.f32 %v827_v12 }
 0x324   :  { %v5446_v16 = vpop.eup %5445 }
 0x325   :  { %v862_v18 = vmul.f32 %v5446_v16, %v5922_v17 }
 0x326   :  { %v830_v19 = vpop.xlane.xlu1 %829 }
 0x327   :  { %5453 = vrcp.f32 %v830_v19  ;;  %v873_v20 = vpack.c.bf16 %v862_v18, %v861_v15 }
 0x328   :  { %v5448_v21 = vpop.eup %5447 }
 0x329   :  { %4898 = vmatmul.mubr.msk.bf16.vlgmr.msra.gmra.mxu1 %vm740_vm1, %v873_v20  ;;  %v863_v13 = vmul.f32 %v5448_v21, %v5926_v22 }
 0x32a   :  { %4908 = vmatpush3.bf16.msra.mxu1 %v490_v11  ;;  %v833_v23 = vpop.xlane.xlu0 %832  ;;  %4909 = vmatprep.mubr.msk.bf16.mxu1 %vm5761_vm0, %v5760_v43 }
 0x32b   :  { %4919 = vmatprep.subr.bf16.mxu1 %v5760_v43  ;;  %5455 = vrcp.f32 %v833_v23 }
 0x32c   :  { %v5450_v24 = vpop.eup %5449 }
 0x32d   :  { %v864_v17 = vmul.f32 %v5450_v24, %v5930_v27 }
 0x32e   :  { %v836_v25 = vpop.xlane.xlu1 %835 }
 0x32f   :  { %5457 = vrcp.f32 %v836_v25  ;;  %v874_v26 = vpack.c.bf16 %v864_v17, %v863_v13 }
 0x330   :  { %v5452_v28 = vpop.eup %5451 }
 0x331   :  { %4904 = vmatmul.mubr.msk.bf16.vlgmr.msra.gmra.mxu0 %vm740_vm1, %v874_v26  ;;  %v865_v11 = vmul.f32 %v5452_v28, %v5935_v32  ;;  %v6010_v28 = vld [vmem:[#allocation8 + $0x3] ss:$0 sm:$0xff] }
 0x332   :  { %4914 = vmatpush3.bf16.msra.mxu0 %v491_v9  ;;  %v839_v5 = vpop.xlane.xlu0 %838  ;;  %4915 = vmatprep.mubr.msk.bf16.mxu0 %vm5761_vm0, %v5760_v43 }
 0x333   :  { %4925 = vmatprep.subr.bf16.mxu0 %v5760_v43  ;;  %5459 = vrcp.f32 %v839_v5 }
 0x334   :  { %v5454_v10 = vpop.eup %5453 }
 0x335   :  { %v866_v22 = vmul.f32 %v5454_v10, %v5940_v38  ;;  %v5284_v38 = vld [vmem:[#allocation6 + $0x36c] ss:$72 sps:$4 sm:$0xff]  }
 0x336   :  { %v842_v27 = vpop.xlane.xlu1 %841 }
 0x337   :  { %5461 = vrcp.f32 %v842_v27  ;;  %v875_v29 = vpack.c.bf16 %v866_v22, %v865_v11  ;;  %v5627_v22 = vld [vmem:[#allocation2 + $0x10] sm:$0xff] }
 0x338   :  { %v5456_v3 = vpop.eup %5455 }
 0x339   :  { %4910 = vmatmul.mubr.msk.bf16.vlgmr.msra.gmra.mxu1 %vm740_vm1, %v875_v29  ;;  %v867_v30 = vmul.f32 %v5456_v3, %v5945_v45  ;;  %v5287_v45 = vld [vmem:[#allocation6 + $0x1bc] ss:$72 sps:$4 sm:$0xff]  }
 0x33a   :  { %4920 = vmatpush3.bf16.msra.mxu1 %v492_v54  ;;  %v845_v7 = vpop.xlane.xlu0 %844  ;;  %4921 = vmatprep.mubr.msk.bf16.mxu1 %vm5761_vm0, %v5760_v43 }
 0x33b   :  { %4931 = vmatprep.subr.bf16.mxu1 %v5283_v31  ;;  %5463 = vrcp.f32 %v845_v7 }
 0x33c   :  { %v5458_v9 = vpop.eup %5457 }
 0x33d   :  { %v868_v32 = vmul.f32 %v5458_v9, %v5950_v56  ;;  %v5628_v9 = vld [vmem:[#allocation2] sm:$0xff] }
 0x33e   :  { %v848_v34 = vpop.xlane.xlu1 %847 }
 0x33f   :  { %5465 = vrcp.f32 %v848_v34  ;;  %v876_v35 = vpack.c.bf16 %v868_v32, %v867_v30  ;;  %v5629_v32 = vld [vmem:[#allocation2 + $0x18] sm:$0xff] }
 0x340   :  { %v5460_v37 = vpop.eup %5459 }
 0x341   :  { %4916 = vmatmul.mubr.msk.bf16.vlgmr.msra.gmra.mxu0 %vm740_vm1, %v876_v35  ;;  %v869_v53 = vmul.f32 %v5460_v37, %v5954_v42  ;;  %v5630_v37 = vld [vmem:[#allocation2 + $0x8] sm:$0xff] }
 0x342   :  { %4926 = vmatpush3.bf16.msra.mxu0 %v493_v52  ;;  %4927 = vmatprep.mubr.msk.bf16.mxu0 %vm5761_vm0, %v5760_v43 }
 0x344   :  { %v5462_v48 = vpop.eup %5461 }
 0x345   :  { %v870_v54 = vmul.f32 %v5462_v48, %v5958_v60 }
 0x347   :  { %v877_v33 = vpack.c.bf16 %v870_v54, %v869_v53 }
 0x348   :  { %v5464_v40 = vpop.eup %5463 }
 0x349   :  { %4922 = vmatmul.mubr.msk.bf16.vlgmr.msra.gmra.mxu1 %vm740_vm1, %v877_v33  ;;  %v871_v46 = vmul.f32 %v5464_v40, %v5962_v47 }
 0x34a   :  { %4932 = vmatpush3.bf16.msra.mxu1 %v5283_v31 }
 0x34b   :  { %4933 = vmatprep.subr.bf16.mxu1 %v5284_v38 }
 0x34c   :  { %v5466_v44 = vpop.eup %5465 }
 0x34d   :  { %v872_v50 = vmul.f32 %v5466_v44, %v5966_v63  ;;  %v5631_v44 = vld [vmem:[#allocation2 + $0x30] sm:$0xff] }
 0x34e   :  { %4934 = vmatpush3.bf16.msra.mxu1 %v5284_v38 }
 0x34f   :  { %v878_v52 = vpack.c.bf16 %v872_v50, %v871_v46  ;;  %4935 = vmatprep.subr.bf16.mxu1 %v5285_v41 }
 0x351   :  { %4928 = vmatmul.mubr.msk.bf16.vlgmr.msra.gmra.mxu0 %vm740_vm1, %v878_v52 }
 0x352   :  { %4936 = vmatpush3.bf16.msra.mxu1 %v5285_v41 }
 0x353   :  { %4937 = vmatprep.subr.bf16.mxu1 %v5286_v36 }
 0x356   :  { %4938 = vmatpush3.bf16.msra.mxu1 %v5286_v36 }
 0x357   :  { %4939 = vmatprep.subr.bf16.mxu1 %v5287_v45 }
 0x35a   :  { %4940 = vmatpush3.bf16.msra.mxu1 %v5287_v45 }
 0x35b   :  { %4941 = vmatprep.subr.bf16.mxu1 %v5288_v49 }
 0x35e   :  { %4942 = vmatpush3.bf16.msra.mxu1 %v5288_v49 }
 0x35f   :  { %4943 = vmatprep.subr.bf16.mxu1 %v5289_v51 }
 0x362   :  { %4944 = vmatpush3.bf16.msra.mxu1 %v5289_v51  ;;  %v5632_v51 = vld [vmem:[#allocation2 + $0x20] sm:$0xff] }
 0x363   :  { %4945 = vmatprep.subr.bf16.mxu1 %v5290_v55 }
 0x366   :  { %4946 = vmatpush3.bf16.msra.mxu1 %v5290_v55 }
 0x3e9   :  { %v916_v39 = vpop.f32.mrf.mxu1 }
 0x3eb   :  { %v4899_v56 = vpop.f32.mrf.mxu1 }
 0x3ed   :  { %v919_v57 = vpop.f32.mrf.mxu1 }
 0x3ee   :  { %v1159_v58 = vpack.c.bf16 %v919_v57, %v916_v39  ;;  %v5633_v39 = vld [vmem:[#allocation2 + $0x38] sm:$0xff] }
 0x3ef   :  { %v4900_v42 = vpop.f32.mrf.mxu1 }
 0x3f0   :  { %4947 = vmatprep.mubr.bf16.mxu1 %v1159_v58  ;;  %v5634_v58 = vld [vmem:[#allocation2 + $0x28] sm:$0xff] }
 0x3f1   :  { %v960_v59 = vpop.f32.mrf.mxu0 }
 0x3f3   :  { %v4905_v60 = vpop.f32.mrf.mxu0 }
 0x3f4   :  { %v5291_v60 = vld [vmem:[#allocation6 + $0x400] ss:$72 sps:$4 sm:$0xff]  }
 0x3f5   :  { %v963_v61 = vpop.f32.mrf.mxu0  ;;  %4959 = vmatprep.subr.bf16.mxu0 %v5291_v60 }
 0x3f6   :  { %v1160_v47 = vpack.c.bf16 %v963_v61, %v960_v59  ;;  %4960 = vmatpush3.bf16.msra.mxu0 %v5291_v60 }
 0x3f7   :  { %v4906_v62 = vpop.f32.mrf.mxu0 }
 0x3f8   :  { %4948 = vmatmul.mubr.bf16.vlgmr.msra.gmra.mxu1 %v1160_v47 }
 0x3f9   :  { %v1004_v63 = vpop.f32.mrf.mxu1 }
 0x3fb   :  { %v4911_v0 = vpop.f32.mrf.mxu1 }
 0x3fc   :  { %v5292_v0 = vld [vmem:[#allocation6 + $0x370] ss:$72 sps:$4 sm:$0xff]  }
 0x3fd   :  { %v1007_v1 = vpop.f32.mrf.mxu1  ;;  %4961 = vmatprep.subr.bf16.mxu0 %v5292_v0 }
 0x3fe   :  { %v1161_v4 = vpack.c.bf16 %v1007_v1, %v1004_v63  ;;  %4962 = vmatpush3.bf16.msra.mxu0 %v5292_v0 }
 0x3ff   :  { %v4912_v6 = vpop.f32.mrf.mxu1 }
 0x400   :  { %4951 = vmatprep.mubr.bf16.mxu1 %v1161_v4  ;;  %v5635_v4 = vld [vmem:[#allocation2 + $0x50] sm:$0xff] }
 0x401   :  { %v1048_v8 = vpop.f32.mrf.mxu0 }
 0x403   :  { %v4917_v14 = vpop.f32.mrf.mxu0 }
 0x405   :  { %v1051_v12 = vpop.f32.mrf.mxu0 }
 0x406   :  { %v1162_v16 = vpack.c.bf16 %v1051_v12, %v1048_v8 }
 0x407   :  { %v4918_v15 = vpop.f32.mrf.mxu0 }
 0x408   :  { %4952 = vmatmul.mubr.bf16.gmra.mxu1 %v1162_v16  ;;  %v5293_v15 = vld [vmem:[#allocation6 + $0x2e0] ss:$72 sps:$4 sm:$0xff]  }
 0x409   :  { %v1092_v18 = vpop.f32.mrf.mxu1  ;;  %4963 = vmatprep.subr.bf16.mxu0 %v5293_v15 }
 0x40a   :  { %4964 = vmatpush3.bf16.msra.mxu0 %v5293_v15 }
 0x40b   :  { %v4923_v19 = vpop.f32.mrf.mxu1 }
 0x40c   :  { %v5636_v19 = vld [vmem:[#allocation2 + $0x40] sm:$0xff] }
 0x40d   :  { %v1095_v20 = vpop.f32.mrf.mxu1 }
 0x40e   :  { %v1163_v21 = vpack.c.bf16 %v1095_v20, %v1092_v18 }
 0x40f   :  { %v4924_v23 = vpop.f32.mrf.mxu1 }
 0x410   :  { %4955 = vmatprep.mubr.bf16.mxu1 %v1163_v21  ;;  %v5637_v21 = vld [vmem:[#allocation2 + $0x58] sm:$0xff] }
 0x411   :  { %v1136_v24 = vpop.f32.mrf.mxu0 }
 0x413   :  { %v4929_v13 = vpop.f32.mrf.mxu0 }
 0x414   :  { %v5294_v13 = vld [vmem:[#allocation6 + $0x250] ss:$72 sps:$4 sm:$0xff]  }
 0x415   :  { %v1139_v17 = vpop.f32.mrf.mxu0  ;;  %4965 = vmatprep.subr.bf16.mxu0 %v5294_v13 }
 0x416   :  { %v1164_v25 = vpack.c.bf16 %v1139_v17, %v1136_v24  ;;  %v5638_v17 = vld [vmem:[#allocation2 + $0x48] sm:$0xff]  ;;  %4966 = vmatpush3.bf16.msra.mxu0 %v5294_v13 }
 0x417   :  { %v4930_v26 = vpop.f32.mrf.mxu0 }
 0x418   :  { %4956 = vmatmul.mubr.bf16.gmra.mxu1 %v1164_v25 }
 0x4b8   :  { %v4949_v5 = vpop.f32.mrf.mxu1 }
 0x4b9   :  { %v1261_v10 = vadd.f32 %v4949_v5, %v6010_v28  ;;  %v5295_v5 = vld [vmem:[#allocation6 + $0x1c0] ss:$72 sps:$4 sm:$0xff]  }
 0x4ba   :  { %v1252_v11 = vpop.f32.mrf.mxu1  ;;  %4967 = vmatprep.subr.bf16.mxu0 %v5295_v5 }
 0x4bb   :  { %v6013_v27 = vadd.f32 %v5627_v22, %v1261_v10  ;;  %v1253_v29 = vadd.f32 %v6010_v28, %v1252_v11  ;;  %4968 = vmatpush3.bf16.msra.mxu0 %v5295_v5  ;;  %v5296_v11 = vld [vmem:[#allocation6 + $0x130] ss:$72 sps:$4 sm:$0xff]  }
 0x4bc   :  { %v4950_v31 = vpop.f32.mrf.mxu1  ;;  %4969 = vmatprep.subr.bf16.mxu0 %v5296_v11 }
 0x4bd   :  { %v1264_v3 = vadd.f32 %v4950_v31, %v6010_v28  ;;  %1317 = vadd.xlane.f32.xlu0 %v6013_v27  ;;  %v6018_v30 = vadd.f32 %v5628_v9, %v1253_v29  ;;  %v1351_v53 = vmul.f32 %v6013_v27, %v6013_v27  ;;  %v5297_v29 = vld [vmem:[#allocation6 + $0xa0] ss:$72 sps:$4 sm:$0xff]   ;;  %v5298_v31 = vld [vmem:[#allocation6 + $0x10] ss:$72 sps:$4 sm:$0xff]   ;;  %v5301_v9 = vld [vmem:[#allocation6 + $0x2e4] ss:$72 sps:$4 sm:$0xff]  }
 0x4be   :  { %v1255_v7 = vpop.f32.mrf.mxu1 }
 0x4bf   :  { %v6020_v34 = vadd.f32 %v5629_v32, %v1264_v3  ;;  %v1256_v35 = vadd.f32 %v6010_v28, %v1255_v7  ;;  %v1349_v33 = vmul.f32 %v6018_v30, %v6018_v30  ;;  %4970 = vmatpush3.bf16.msra.mxu0 %v5296_v11  ;;  %v5299_v3 = vld [vmem:[#allocation6 + $0x404] ss:$72 sps:$4 sm:$0xff]   ;;  %v5300_v7 = vld [vmem:[#allocation6 + $0x374] ss:$72 sps:$4 sm:$0xff]  }
 0x4c0   :  { %4971 = vmatprep.subr.bf16.mxu0 %v5297_v29  ;;  %4987 = vmatprep.subr.bf16.mxu1 %v5299_v3  ;;  %v5302_v32 = vld [vmem:[#allocation6 + $0x254] ss:$72 sps:$4 sm:$0xff]  }
 0x4c1   :  { %1319 = vadd.xlane.f32.xlu1 %v6020_v34  ;;  %1313 = vadd.xlane.f32.xlu0 %v6018_v30  ;;  %v6025_v48 = vadd.f32 %v5630_v37, %v1256_v35  ;;  %v1352_v54 = vmul.f32 %v6020_v34, %v6020_v34  ;;  %v5303_v35 = vld [vmem:[#allocation6 + $0x1c4] ss:$72 sps:$4 sm:$0xff]  }
 0x4c2   :  { %4988 = vmatpush3.bf16.msra.mxu1 %v5299_v3 }
 0x4c3   :  { %v1350_v52 = vmul.f32 %v6025_v48, %v6025_v48  ;;  %4972 = vmatpush3.bf16.msra.mxu0 %v5297_v29  ;;  %4989 = vmatprep.subr.bf16.mxu1 %v5300_v7 }
 0x4c4   :  { %4973 = vmatprep.subr.bf16.mxu0 %v5298_v31 }
 0x4c5   :  { %1315 = vadd.xlane.f32.xlu1 %v6025_v48  ;;  %1365 = vadd.xlane.f32.xlu0 %v1351_v53 }
 0x4c6   :  { %4990 = vmatpush3.bf16.msra.mxu1 %v5300_v7 }
 0x4c7   :  { %4974 = vmatpush3.bf16.msra.mxu0 %v5298_v31  ;;  %4991 = vmatprep.subr.bf16.mxu1 %v5301_v9 }
 0x4c8   :  { %v4953_v38 = vpop.f32.mrf.mxu1 }
 0x4c9   :  { %v1277_v40 = vadd.f32 %v4953_v38, %v6010_v28  ;;  %1367 = vadd.xlane.f32.xlu1 %v1352_v54  ;;  %1361 = vadd.xlane.f32.xlu0 %v1349_v33 }
 0x4ca   :  { %v1268_v41 = vpop.f32.mrf.mxu1  ;;  %4992 = vmatpush3.bf16.msra.mxu1 %v5301_v9 }
 0x4cb   :  { %v6035_v46 = vadd.f32 %v5631_v44, %v1277_v40  ;;  %v1269_v50 = vadd.f32 %v6010_v28, %v1268_v41  ;;  %4993 = vmatprep.subr.bf16.mxu1 %v5302_v32 }
 0x4cc   :  { %v4954_v36 = vpop.f32.mrf.mxu1 }
 0x4cd   :  { %v1280_v45 = vadd.f32 %v4954_v36, %v6010_v28  ;;  %1363 = vadd.xlane.f32.xlu1 %v1350_v52  ;;  %1325 = vadd.xlane.f32.xlu0 %v6035_v46  ;;  %v6042_v55 = vadd.f32 %v5632_v51, %v1269_v50  ;;  %v1355_v59 = vmul.f32 %v6035_v46, %v6035_v46 }
 0x4ce   :  { %v1271_v49 = vpop.f32.mrf.mxu1  ;;  %4994 = vmatpush3.bf16.msra.mxu1 %v5302_v32 }
 0x4cf   :  { %v6044_v56 = vadd.f32 %v5633_v39, %v1280_v45  ;;  %v1272_v57 = vadd.f32 %v6010_v28, %v1271_v49  ;;  %v1353_v47 = vmul.f32 %v6042_v55, %v6042_v55  ;;  %4995 = vmatprep.subr.bf16.mxu1 %v5303_v35 }
 0x4d1   :  { %1327 = vadd.xlane.f32.xlu1 %v6044_v56  ;;  %1321 = vadd.xlane.f32.xlu0 %v6042_v55  ;;  %v6049_v42 = vadd.f32 %v5634_v58, %v1272_v57  ;;  %v1356_v61 = vmul.f32 %v6044_v56, %v6044_v56 }
 0x4d2   :  { %4996 = vmatpush3.bf16.msra.mxu1 %v5303_v35 }
 0x4d3   :  { %v1354_v14 = vmul.f32 %v6049_v42, %v6049_v42 }
 0x4d5   :  { %1323 = vadd.xlane.f32.xlu1 %v6049_v42  ;;  %1373 = vadd.xlane.f32.xlu0 %v1355_v59 }
 0x4d8   :  { %v4957_v62 = vpop.f32.mrf.mxu1 }
 0x4d9   :  { %v1293_v63 = vadd.f32 %v4957_v62, %v6010_v28  ;;  %1375 = vadd.xlane.f32.xlu1 %v1356_v61  ;;  %1369 = vadd.xlane.f32.xlu0 %v1353_v47 }
 0x4da   :  { %v1284_v1 = vpop.f32.mrf.mxu1 }
 0x4db   :  { %v6059_v6 = vadd.f32 %v5635_v4, %v1293_v63  ;;  %v1285_v8 = vadd.f32 %v6010_v28, %v1284_v1 }
 0x4dc   :  { %v4958_v12 = vpop.f32.mrf.mxu1 }
 0x4dd   :  { %v1296_v16 = vadd.f32 %v4958_v12, %v6010_v28  ;;  %1371 = vadd.xlane.f32.xlu1 %v1354_v14  ;;  %1333 = vadd.xlane.f32.xlu0 %v6059_v6  ;;  %v6066_v20 = vadd.f32 %v5636_v19, %v1285_v8  ;;  %v1359_v10 = vmul.f32 %v6059_v6, %v6059_v6 }
 0x4de   :  { %v1287_v18 = vpop.f32.mrf.mxu1 }
 0x4df   :  { %v6068_v23 = vadd.f32 %v5637_v21, %v1296_v16  ;;  %v1288_v24 = vadd.f32 %v6010_v28, %v1287_v18  ;;  %v1357_v26 = vmul.f32 %v6066_v20, %v6066_v20 }
 0x4e1   :  { %1335 = vadd.xlane.f32.xlu1 %v6068_v23  ;;  %1329 = vadd.xlane.f32.xlu0 %v6066_v20  ;;  %v6073_v25 = vadd.f32 %v5638_v17, %v1288_v24  ;;  %v1360_v22 = vmul.f32 %v6068_v23, %v6068_v23 }
 0x4e3   :  { %v1358_v28 = vmul.f32 %v6073_v25, %v6073_v25 }
 0x4e5   :  { %1331 = vadd.xlane.f32.xlu1 %v6073_v25  ;;  %1377 = vadd.xlane.f32.xlu0 %v1357_v26 }
 0x4e9   :  { %1379 = vadd.xlane.f32.xlu1 %v1358_v28  ;;  %1381 = vadd.xlane.f32.xlu0 %v1359_v10 }
 0x4ed   :  { %1383 = vadd.xlane.f32.xlu1 %v1360_v22 }
 0x546   :  { %v1318_v37 = vpop.xlane.xlu0 %1317 }
 0x547   :  { %v6084_v33 = vmul.f32 0.0078125, %v1318_v37 }
 0x549   :  { %v1399_v50 = vmul.f32 %v6084_v33, %v6084_v33 }
 0x54a   :  { %v1320_v53 = vpop.xlane.xlu1 %1319  ;;  %v1314_v54 = vpop.xlane.xlu0 %1313 }
 0x54b   :  { %v6086_v38 = vmul.f32 0.0078125, %v1320_v53  ;;  %v6088_v40 = vmul.f32 0.0078125, %v1314_v54 }
 0x54d   :  { %v1400_v45 = vmul.f32 %v6086_v38, %v6086_v38  ;;  %v1397_v49 = vmul.f32 %v6088_v40, %v6088_v40 }
 0x54e   :  { %v1316_v41 = vpop.xlane.xlu1 %1315  ;;  %v1366_v44 = vpop.xlane.xlu0 %1365 }
 0x54f   :  { %v1387_v52 = vmul.f32 0.0078125, %v1366_v44  ;;  %v6096_v57 = vmul.f32 0.0078125, %v1316_v41  ;;  %v1436_v41 = vsub.f32 %v6020_v34, %v6086_v38 }
 0x551   :  { %v1411_v36 = vsub.f32 %v1387_v52, %v1399_v50  ;;  %v1398_v1 = vmul.f32 %v6096_v57, %v6096_v57 }
 0x552   :  { %v1368_v51 = vpop.xlane.xlu1 %1367  ;;  %v1362_v39 = vpop.xlane.xlu0 %1361 }
 0x553   :  { %v1423_v58 = vmax.f32 %v1411_v36, 0.0  ;;  %v1388_v59 = vmul.f32 0.0078125, %v1368_v51  ;;  %v1385_v60 = vmul.f32 0.0078125, %v1362_v39 }
 0x555   :  { %v1412_v61 = vsub.f32 %v1388_v59, %v1400_v45  ;;  %v1409_v47 = vsub.f32 %v1385_v60, %v1397_v49  ;;  %v1447_v62 = vadd.f32 1e-05, %v1423_v58  ;;  %v1435_v59 = vsub.f32 %v6013_v27, %v6084_v33 }
 0x556   :  { %v1364_v63 = vpop.xlane.xlu1 %1363  ;;  %v1326_v0 = vpop.xlane.xlu0 %1325  ;;  %v1433_v60 = vsub.f32 %v6018_v30, %v6088_v40  ;;  %v1434_v30 = vsub.f32 %v6025_v48, %v6096_v57  ;;  %v6137_v57 = vld [vmem:[#allocation8 + $0x5] ss:$0 sm:$0xff] }
 0x557   :  { %v1424_v4 = vmax.f32 %v1412_v61, 0.0  ;;  %v1421_v8 = vmax.f32 %v1409_v47, 0.0  ;;  %v1386_v14 = vmul.f32 0.0078125, %v1364_v63  ;;  %5467 = vrsqrt.f32 %v1447_v62 }
 0x558   :  { %v6100_v24 = vmul.f32 0.0078125, %v1326_v0 }
 0x559   :  { %v1448_v12 = vadd.f32 1e-05, %v1424_v4  ;;  %v1445_v16 = vadd.f32 1e-05, %v1421_v8  ;;  %v1410_v15 = vsub.f32 %v1386_v14, %v1398_v1 }
 0x55a   :  { %v1328_v18 = vpop.xlane.xlu1 %1327  ;;  %v1322_v19 = vpop.xlane.xlu0 %1321  ;;  %v1403_v10 = vmul.f32 %v6100_v24, %v6100_v24 }
 0x55b   :  { %5469 = vrsqrt.f32 %v1448_v12  ;;  %v1422_v21 = vmax.f32 %v1410_v15, 0.0  ;;  %v6102_v17 = vmul.f32 0.0078125, %v1328_v18  ;;  %v6104_v26 = vmul.f32 0.0078125, %v1322_v19  ;;  %v6124_v12 = vld [vmem:[#allocation8 + $0x4] ss:$0 sm:$0xff] }
 0x55c   :  { %5471 = vrsqrt.f32 %v1445_v16 }
 0x55d   :  { %v1446_v13 = vadd.f32 1e-05, %v1422_v21  ;;  %v1404_v29 = vmul.f32 %v6102_v17, %v6102_v17  ;;  %v1401_v31 = vmul.f32 %v6104_v26, %v6104_v26 }
 0x55e   :  { %v1324_v5 = vpop.xlane.xlu1 %1323  ;;  %v1374_v28 = vpop.xlane.xlu0 %1373 }
 0x55f   :  { %5473 = vrsqrt.f32 %v1446_v13  ;;  %v1391_v11 = vmul.f32 0.0078125, %v1374_v28  ;;  %v6112_v9 = vmul.f32 0.0078125, %v1324_v5 }
 0x561   :  { %v1415_v22 = vsub.f32 %v1391_v11, %v1403_v10  ;;  %v1402_v45 = vmul.f32 %v6112_v9, %v6112_v9 }
 0x562   :  { %v1376_v3 = vpop.xlane.xlu1 %1375  ;;  %v1370_v7 = vpop.xlane.xlu0 %1369 }
 0x563   :  { %v1427_v32 = vmax.f32 %v1415_v22, 0.0  ;;  %v1392_v35 = vmul.f32 0.0078125, %v1376_v3  ;;  %v1389_v37 = vmul.f32 0.0078125, %v1370_v7 }
 0x564   :  { %v5468_v36 = vpop.eup %5467 }
 0x565   :  { %v1416_v53 = vsub.f32 %v1392_v35, %v1404_v29  ;;  %v1413_v54 = vsub.f32 %v1389_v37, %v1401_v31  ;;  %v1451_v44 = vadd.f32 1e-05, %v1427_v32  ;;  %v1471_v4 = vmul.f32 %v5468_v36, %v1435_v59 }
 0x566   :  { %v1372_v50 = vpop.xlane.xlu1 %1371  ;;  %v1334_v52 = vpop.xlane.xlu0 %1333 }
 0x567   :  { %v1428_v49 = vmax.f32 %v1416_v53, 0.0  ;;  %v1425_v51 = vmax.f32 %v1413_v54, 0.0  ;;  %v1390_v39 = vmul.f32 0.0078125, %v1372_v50  ;;  %5475 = vrsqrt.f32 %v1451_v44 }
 0x568   :  { %v5470_v58 = vpop.eup %5469  ;;  %v6128_v40 = vmul.f32 0.0078125, %v1334_v52  ;;  %v1487_v13 = vmul.f32 %v6124_v12, %v1471_v4 }
 0x569   :  { %v5472_v61 = vpop.eup %5471  ;;  %v1452_v47 = vadd.f32 1e-05, %v1428_v49  ;;  %v1449_v34 = vadd.f32 1e-05, %v1425_v51  ;;  %v1414_v38 = vsub.f32 %v1390_v39, %v1402_v45  ;;  %v1472_v62 = vmul.f32 %v5470_v58, %v1436_v41 }
 0x56a   :  { %v1336_v63 = vpop.xlane.xlu1 %1335  ;;  %v1330_v0 = vpop.xlane.xlu0 %1329  ;;  %v1469_v1 = vmul.f32 %v5472_v61, %v1433_v60  ;;  %v1407_v11 = vmul.f32 %v6128_v40, %v6128_v40  ;;  %v6154_v37 = vadd.f32 %v6137_v57, %v1487_v13  ;;  %v1440_v51 = vsub.f32 %v6044_v56, %v6102_v17 }
 0x56b   :  { %5477 = vrsqrt.f32 %v1452_v47  ;;  %v1426_v8 = vmax.f32 %v1414_v38, 0.0  ;;  %v6122_v14 = vmul.f32 0.0078125, %v1330_v0  ;;  %v1488_v16 = vmul.f32 %v6124_v12, %v1472_v62 }
 0x56c   :  { %v5474_v27 = vpop.eup %5473  ;;  %5479 = vrsqrt.f32 %v1449_v34  ;;  %v1485_v21 = vmul.f32 %v6124_v12, %v1469_v1  ;;  %v6145_v31 = vmul.f32 0.0078125, %v1336_v63  ;;  %v1439_v38 = vsub.f32 %v6035_v46, %v6100_v24 }
 0x56d   :  { %v1450_v33 = vadd.f32 1e-05, %v1426_v8  ;;  %v1470_v19 = vmul.f32 %v5474_v27, %v1434_v30  ;;  %v1405_v5 = vmul.f32 %v6122_v14, %v6122_v14  ;;  %v6143_v29 = vadd.f32 %v6137_v57, %v1488_v16 }
 0x56e   :  { %v1332_v15 = vpop.xlane.xlu1 %1331  ;;  %v1378_v18 = vpop.xlane.xlu0 %1377  ;;  %v6148_v32 = vadd.f32 %v6137_v57, %v1485_v21  ;;  %v1408_v39 = vmul.f32 %v6145_v31, %v6145_v31  ;;  %v1437_v62 = vsub.f32 %v6042_v55, %v6104_v26  ;;  %v1438_v27 = vsub.f32 %v6049_v42, %v6112_v9 }
 0x56f   :  { %5481 = vrsqrt.f32 %v1450_v33  ;;  %v6135_v28 = vmul.f32 0.0078125, %v1332_v15  ;;  %v1393_v48 = vmul.f32 0.0078125, %v1378_v18  ;;  %v1486_v10 = vmul.f32 %v6124_v12, %v1470_v19 }
 0x570   :  { %v1530_v49 = vpack.c.bf16 %v6143_v29, %v6154_v37  ;;  %v1441_v21 = vsub.f32 %v6066_v20, %v6122_v14 }
 0x571   :  { %v1417_v22 = vsub.f32 %v1393_v48, %v1405_v5  ;;  %v6151_v35 = vadd.f32 %v6137_v57, %v1486_v10  ;;  %v1406_v53 = vmul.f32 %v6135_v28, %v6135_v28 }
 0x572   :  { %v1380_v3 = vpop.xlane.xlu1 %1379  ;;  %v1382_v7 = vpop.xlane.xlu0 %1381 }
 0x573   :  { %v1429_v54 = vmax.f32 %v1417_v22, 0.0  ;;  %v1394_v41 = vmul.f32 0.0078125, %v1380_v3  ;;  %v1395_v44 = vmul.f32 0.0078125, %v1382_v7  ;;  %v1529_v50 = vpack.c.bf16 %v6151_v35, %v6148_v32 }
 0x574   :  { %v5476_v59 = vpop.eup %5475  ;;  %v1443_v3 = vsub.f32 %v6059_v6, %v6128_v40 }
 0x575   :  { %v1453_v52 = vadd.f32 1e-05, %v1429_v54  ;;  %v1418_v36 = vsub.f32 %v1394_v41, %v1406_v53  ;;  %v1419_v45 = vsub.f32 %v1395_v44, %v1407_v11  ;;  %4975 = vmatprep.mubr.bf16.mxu0 %v1529_v50  ;;  %v1475_v8 = vmul.f32 %v5476_v59, %v1439_v38 }
 0x576   :  { %v1384_v58 = vpop.xlane.xlu1 %1383  ;;  %4976 = vmatmul.mubr.bf16.vlgmr.msra.gmra.mxu0 %v1530_v49  ;;  %v1442_v11 = vsub.f32 %v6073_v25, %v6135_v28  ;;  %v1444_v54 = vsub.f32 %v6068_v23, %v6145_v31  ;;  %v5305_v49 = vld [vmem:[#allocation6 + $0xa4] ss:$72 sps:$4 sm:$0xff]  }
 0x577   :  { %5483 = vrsqrt.f32 %v1453_v52  ;;  %v1430_v60 = vmax.f32 %v1418_v36, 0.0  ;;  %v1431_v61 = vmax.f32 %v1419_v45, 0.0  ;;  %v1396_v47 = vmul.f32 0.0078125, %v1384_v58  ;;  %v5304_v45 = vld [vmem:[#allocation6 + $0x134] ss:$72 sps:$4 sm:$0xff]  }
 0x578   :  { %v5478_v34 = vpop.eup %5477  ;;  %v1491_v26 = vmul.f32 %v6124_v12, %v1475_v8  ;;  %4997 = vmatprep.subr.bf16.mxu1 %v5304_v45  ;;  %v4502_v58 = vld [vmem:[#allocation8 + $0x6] ss:$0 sm:$0xff] }
 0x579   :  { %v5480_v63 = vpop.eup %5479  ;;  %v1454_v56 = vadd.f32 1e-05, %v1430_v60  ;;  %v1455_v17 = vadd.f32 1e-05, %v1431_v61  ;;  %v1420_v0 = vsub.f32 %v1396_v47, %v1408_v39  ;;  %v1476_v1 = vmul.f32 %v5478_v34, %v1440_v51  ;;  %4998 = vmatpush3.bf16.msra.mxu1 %v5304_v45 }
 0x57a   :  { %v1473_v4 = vmul.f32 %v5480_v63, %v1437_v62  ;;  %v6186_v19 = vadd.f32 %v6137_v57, %v1491_v26  ;;  %4999 = vmatprep.subr.bf16.mxu1 %v5305_v49 }
 0x57b   :  { %5485 = vrsqrt.f32 %v1454_v56  ;;  %v1432_v30 = vmax.f32 %v1420_v0, 0.0  ;;  %v1492_v16 = vmul.f32 %v6124_v12, %v1476_v1 }
 0x57c   :  { %v5482_v33 = vpop.eup %5481  ;;  %5487 = vrsqrt.f32 %v1455_v17  ;;  %v1489_v55 = vmul.f32 %v6124_v12, %v1473_v4 }
 0x57d   :  { %v1456_v46 = vadd.f32 1e-05, %v1432_v30  ;;  %v1474_v24 = vmul.f32 %v5482_v33, %v1438_v27  ;;  %v6177_v18 = vadd.f32 %v6137_v57, %v1492_v16  ;;  %5000 = vmatpush3.bf16.msra.mxu1 %v5305_v49 }
 0x57e   :  { %v6180_v42 = vadd.f32 %v6137_v57, %v1489_v55 }
 0x57f   :  { %5489 = vrsqrt.f32 %v1456_v46  ;;  %v1490_v15 = vmul.f32 %v6124_v12, %v1474_v24  ;;  %v1532_v48 = vpack.c.bf16 %v6177_v18, %v6186_v19 }
 0x581   :  { %v6183_v9 = vadd.f32 %v6137_v57, %v1490_v15 }
 0x583   :  { %v1531_v13 = vpack.c.bf16 %v6183_v9, %v6180_v42 }
 0x584   :  { %v5484_v5 = vpop.eup %5483 }
 0x585   :  { %4979 = vmatprep.mubr.bf16.mxu0 %v1531_v13  ;;  %v1477_v10 = vmul.f32 %v5484_v5, %v1441_v21 }
 0x586   :  { %4980 = vmatmul.mubr.bf16.gmra.mxu0 %v1532_v48 }
 0x587   :  { %v1493_v20 = vmul.f32 %v6124_v12, %v1477_v10 }
 0x588   :  { %v5486_v22 = vpop.eup %5485 }
 0x589   :  { %v5488_v7 = vpop.eup %5487  ;;  %v1478_v53 = vmul.f32 %v5486_v22, %v1442_v11  ;;  %v6203_v50 = vadd.f32 %v6137_v57, %v1493_v20 }
 0x58a   :  { %v1479_v14 = vmul.f32 %v5488_v7, %v1443_v3 }
 0x58b   :  { %v1494_v41 = vmul.f32 %v6124_v12, %v1478_v53 }
 0x58c   :  { %v5490_v44 = vpop.eup %5489  ;;  %v1495_v6 = vmul.f32 %v6124_v12, %v1479_v14 }
 0x58d   :  { %v6206_v25 = vadd.f32 %v6137_v57, %v1494_v41  ;;  %v1480_v28 = vmul.f32 %v5490_v44, %v1444_v54 }
 0x58e   :  { %v6213_v23 = vadd.f32 %v6137_v57, %v1495_v6  ;;  %v4511_v6 = vld [vmem:[#allocation8 + $0x7] ss:$0 sm:$0xff] }
 0x58f   :  { %v1533_v40 = vpack.c.bf16 %v6206_v25, %v6203_v50  ;;  %v1496_v52 = vmul.f32 %v6124_v12, %v1480_v28  ;;  %v5306_v12 = vld [vmem:[#allocation6 + $0x14] ss:$72 sps:$4 sm:$0xff]  }
 0x590   :  { %5001 = vmatprep.subr.bf16.mxu1 %v5306_v12 }
 0x591   :  { %4983 = vmatprep.mubr.bf16.mxu0 %v1533_v40  ;;  %v6216_v31 = vadd.f32 %v6137_v57, %v1496_v52  ;;  %5002 = vmatpush3.bf16.msra.mxu1 %v5306_v12 }
 0x593   :  { %v1534_v36 = vpack.c.bf16 %v6216_v31, %v6213_v23 }
 0x595   :  { %4984 = vmatmul.mubr.bf16.gmra.mxu0 %v1534_v36 }
 0x596   :  { %2371 = vmatprep.mubr.bf16.mxu0 %v5759_v2 }
 0x636   :  { %v4977_v51 = vpop.f32.mrf.mxu0 }
 0x637   :  { %v1631_v61 = vadd.f32 %v4977_v51, %v4502_v58 }
 0x638   :  { %v1622_v39 = vpop.f32.mrf.mxu0 }
 0x639   :  { %v1623_v59 = vadd.f32 %v4502_v58, %v1622_v39  ;;  %v1671_v56 = vmax.f32 %v1631_v61, 0.0 }
 0x63a   :  { %v4978_v57 = vpop.f32.mrf.mxu0 }
 0x63b   :  { %v1634_v60 = vadd.f32 %v4978_v57, %v4502_v58  ;;  %v1669_v62 = vmax.f32 %v1623_v59, 0.0 }
 0x63c   :  { %v1625_v47 = vpop.f32.mrf.mxu0 }
 0x63d   :  { %v1626_v34 = vadd.f32 %v4502_v58, %v1625_v47  ;;  %v1672_v38 = vmax.f32 %v1634_v60, 0.0 }
 0x63f   :  { %v1670_v63 = vmax.f32 %v1626_v34, 0.0  ;;  %v1698_v0 = vpack.c.bf16 %v1672_v38, %v1671_v56 }
 0x641   :  { %v1697_v17 = vpack.c.bf16 %v1670_v63, %v1669_v62 }
 0x643   :  { %5003 = vmatprep.mubr.bf16.mxu1 %v1697_v17 }
 0x644   :  { %5004 = vmatmul.mubr.bf16.vlgmr.msra.gmra.mxu1 %v1698_v0 }
 0x646   :  { %v4981_v1 = vpop.f32.mrf.mxu0 }
 0x647   :  { %v1647_v33 = vadd.f32 %v4981_v1, %v4502_v58 }
 0x648   :  { %v1638_v4 = vpop.f32.mrf.mxu0 }
 0x649   :  { %v1639_v27 = vadd.f32 %v4502_v58, %v1638_v4  ;;  %v1675_v15 = vmax.f32 %v1647_v33, 0.0 }
 0x64a   :  { %v4982_v8 = vpop.f32.mrf.mxu0 }
 0x64b   :  { %v1650_v30 = vadd.f32 %v4982_v8, %v4502_v58  ;;  %v1673_v55 = vmax.f32 %v1639_v27, 0.0 }
 0x64c   :  { %v1641_v16 = vpop.f32.mrf.mxu0 }
 0x64d   :  { %v1642_v46 = vadd.f32 %v4502_v58, %v1641_v16  ;;  %v1676_v24 = vmax.f32 %v1650_v30, 0.0 }
 0x64f   :  { %v1674_v26 = vmax.f32 %v1642_v46, 0.0  ;;  %v1700_v13 = vpack.c.bf16 %v1676_v24, %v1675_v15 }
 0x651   :  { %v1699_v21 = vpack.c.bf16 %v1674_v26, %v1673_v55 }
 0x653   :  { %5007 = vmatprep.mubr.bf16.mxu1 %v1699_v21 }
 0x654   :  { %5008 = vmatmul.mubr.bf16.gmra.mxu1 %v1700_v13 }
 0x655   :  { %v4985_v5 = vpop.f32.mrf.mxu0 }
 0x656   :  { %v1663_v3 = vadd.f32 %v4985_v5, %v4502_v58 }
 0x657   :  { %v1654_v48 = vpop.f32.mrf.mxu0 }
 0x658   :  { %v1655_v11 = vadd.f32 %v4502_v58, %v1654_v48  ;;  %v1679_v41 = vmax.f32 %v1663_v3, 0.0 }
 0x659   :  { %v4986_v10 = vpop.f32.mrf.mxu0 }
 0x65a   :  { %v1666_v22 = vadd.f32 %v4986_v10, %v4502_v58  ;;  %v1677_v14 = vmax.f32 %v1655_v11, 0.0 }
 0x65b   :  { %v1657_v7 = vpop.f32.mrf.mxu0 }
 0x65c   :  { %v1658_v53 = vadd.f32 %v4502_v58, %v1657_v7  ;;  %v1680_v20 = vmax.f32 %v1666_v22, 0.0 }
 0x65e   :  { %v1678_v54 = vmax.f32 %v1658_v53, 0.0  ;;  %v1702_v28 = vpack.c.bf16 %v1680_v20, %v1679_v41 }
 0x660   :  { %v1701_v44 = vpack.c.bf16 %v1678_v54, %v1677_v14 }
 0x662   :  { %5011 = vmatprep.mubr.bf16.mxu1 %v1701_v44 }
 0x663   :  { %5012 = vmatmul.mubr.bf16.gmra.mxu1 %v1702_v28 }
 0x704   :  { %v5005_v40 = vpop.f32.mrf.mxu1 }
 0x705   :  { %v1799_v52 = vadd.f32 %v5005_v40, %v4511_v6 }
 0x706   :  { %v1790_v36 = vpop.f32.mrf.mxu1 }
 0x707   :  { %v6222_v45 = vadd.f32 %v1799_v52, %v6154_v37  ;;  %v1791_v49 = vadd.f32 %v4511_v6, %v1790_v36 }
 0x708   :  { %v5006_v12 = vpop.f32.mrf.mxu1 }
 0x709   :  { %v1802_v51 = vadd.f32 %v5006_v12, %v4511_v6  ;;  %1855 = vadd.xlane.f32.xlu0 %v6222_v45  ;;  %v6226_v58 = vadd.f32 %v1791_v49, %v6148_v32  ;;  %v1889_v60 = vmul.f32 %v6222_v45, %v6222_v45 }
 0x70a   :  { %v1793_v39 = vpop.f32.mrf.mxu1 }
 0x70b   :  { %v6229_v57 = vadd.f32 %v1802_v51, %v6143_v29  ;;  %v1794_v59 = vadd.f32 %v4511_v6, %v1793_v39  ;;  %v1887_v29 = vmul.f32 %v6226_v58, %v6226_v58 }
 0x70d   :  { %1857 = vadd.xlane.f32.xlu1 %v6229_v57  ;;  %1851 = vadd.xlane.f32.xlu0 %v6226_v58  ;;  %v6234_v37 = vadd.f32 %v1794_v59, %v6151_v35  ;;  %v1890_v32 = vmul.f32 %v6229_v57, %v6229_v57 }
 0x70f   :  { %v1888_v63 = vmul.f32 %v6234_v37, %v6234_v37 }
 0x711   :  { %1853 = vadd.xlane.f32.xlu1 %v6234_v37  ;;  %1903 = vadd.xlane.f32.xlu0 %v1889_v60 }
 0x714   :  { %v5009_v61 = vpop.f32.mrf.mxu1 }
 0x715   :  { %v1815_v47 = vadd.f32 %v5009_v61, %v4511_v6  ;;  %1905 = vadd.xlane.f32.xlu1 %v1890_v32  ;;  %1899 = vadd.xlane.f32.xlu0 %v1887_v29 }
 0x716   :  { %v1806_v34 = vpop.f32.mrf.mxu1 }
 0x717   :  { %v6244_v35 = vadd.f32 %v1815_v47, %v6186_v19  ;;  %v1807_v38 = vadd.f32 %v4511_v6, %v1806_v34 }
 0x718   :  { %v5010_v62 = vpop.f32.mrf.mxu1 }
 0x719   :  { %v1818_v56 = vadd.f32 %v5010_v62, %v4511_v6  ;;  %1901 = vadd.xlane.f32.xlu1 %v1888_v63  ;;  %1863 = vadd.xlane.f32.xlu0 %v6244_v35  ;;  %v6253_v1 = vadd.f32 %v1807_v38, %v6180_v42  ;;  %v1893_v8 = vmul.f32 %v6244_v35, %v6244_v35 }
 0x71a   :  { %v1809_v17 = vpop.f32.mrf.mxu1 }
 0x71b   :  { %v6250_v0 = vadd.f32 %v1818_v56, %v6177_v18  ;;  %v1810_v4 = vadd.f32 %v4511_v6, %v1809_v17  ;;  %v1891_v30 = vmul.f32 %v6253_v1, %v6253_v1 }
 0x71d   :  { %1865 = vadd.xlane.f32.xlu1 %v6250_v0  ;;  %1859 = vadd.xlane.f32.xlu0 %v6253_v1  ;;  %v6258_v19 = vadd.f32 %v1810_v4, %v6183_v9  ;;  %v1894_v42 = vmul.f32 %v6250_v0, %v6250_v0 }
 0x71f   :  { %v1892_v55 = vmul.f32 %v6258_v19, %v6258_v19 }
 0x721   :  { %1861 = vadd.xlane.f32.xlu1 %v6258_v19  ;;  %1911 = vadd.xlane.f32.xlu0 %v1893_v8 }
 0x723   :  { %v5013_v27 = vpop.f32.mrf.mxu1 }
 0x724   :  { %v1831_v18 = vadd.f32 %v5013_v27, %v4511_v6 }
 0x725   :  { %v1822_v33 = vpop.f32.mrf.mxu1  ;;  %1913 = vadd.xlane.f32.xlu1 %v1894_v42  ;;  %1907 = vadd.xlane.f32.xlu0 %v1891_v30 }
 0x726   :  { %v6268_v16 = vadd.f32 %v1831_v18, %v6213_v23  ;;  %v1823_v46 = vadd.f32 %v4511_v6, %v1822_v33 }
 0x727   :  { %v5014_v9 = vpop.f32.mrf.mxu1 }
 0x728   :  { %v1834_v24 = vadd.f32 %v5014_v9, %v4511_v6  ;;  %v6277_v21 = vadd.f32 %v1823_v46, %v6203_v50  ;;  %v1897_v50 = vmul.f32 %v6268_v16, %v6268_v16 }
 0x729   :  { %v1825_v26 = vpop.f32.mrf.mxu1  ;;  %1909 = vadd.xlane.f32.xlu1 %v1892_v55  ;;  %1871 = vadd.xlane.f32.xlu0 %v6268_v16 }
 0x72a   :  { %v6273_v15 = vadd.f32 %v1834_v24, %v6216_v31  ;;  %v1826_v23 = vadd.f32 %v4511_v6, %v1825_v26  ;;  %v1895_v5 = vmul.f32 %v6277_v21, %v6277_v21 }
 0x72c   :  { %v6282_v13 = vadd.f32 %v1826_v23, %v6206_v25  ;;  %v1898_v48 = vmul.f32 %v6273_v15, %v6273_v15 }
 0x72d   :  { %1873 = vadd.xlane.f32.xlu1 %v6273_v15  ;;  %1867 = vadd.xlane.f32.xlu0 %v6277_v21 }
 0x72e   :  { %v1896_v31 = vmul.f32 %v6282_v13, %v6282_v13 }
 0x731   :  { %1869 = vadd.xlane.f32.xlu1 %v6282_v13  ;;  %1915 = vadd.xlane.f32.xlu0 %v1895_v5 }
 0x735   :  { %1917 = vadd.xlane.f32.xlu1 %v1896_v31  ;;  %1919 = vadd.xlane.f32.xlu0 %v1897_v50 }
 0x739   :  { %1921 = vadd.xlane.f32.xlu1 %v1898_v48 }
 0x792   :  { %v1856_v25 = vpop.xlane.xlu0 %1855 }
 0x793   :  { %v6295_v53 = vmul.f32 0.0078125, %v1856_v25 }
 0x795   :  { %v1937_v6 = vmul.f32 %v6295_v53, %v6295_v53 }
 0x796   :  { %v1858_v10 = vpop.xlane.xlu1 %1857  ;;  %v1852_v11 = vpop.xlane.xlu0 %1851 }
 0x797   :  { %v6293_v7 = vmul.f32 0.0078125, %v1852_v11  ;;  %v6303_v40 = vmul.f32 0.0078125, %v1858_v10 }
 0x799   :  { %v1935_v41 = vmul.f32 %v6293_v7, %v6293_v7  ;;  %v1938_v60 = vmul.f32 %v6303_v40, %v6303_v40 }
 0x79a   :  { %v1854_v22 = vpop.xlane.xlu1 %1853  ;;  %v1904_v3 = vpop.xlane.xlu0 %1903 }
 0x79b   :  { %v1925_v20 = vmul.f32 0.0078125, %v1904_v3  ;;  %v6299_v44 = vmul.f32 0.0078125, %v1854_v22 }
 0x79d   :  { %v1949_v36 = vsub.f32 %v1925_v20, %v1937_v6  ;;  %v1936_v39 = vmul.f32 %v6299_v44, %v6299_v44 }
 0x79e   :  { %v1906_v14 = vpop.xlane.xlu1 %1905  ;;  %v1900_v54 = vpop.xlane.xlu0 %1899 }
 0x79f   :  { %v1923_v28 = vmul.f32 0.0078125, %v1900_v54  ;;  %v1926_v49 = vmul.f32 0.0078125, %v1906_v14  ;;  %v1961_v29 = vmax.f32 %v1949_v36, 0.0 }
 0x7a1   :  { %v1947_v52 = vsub.f32 %v1923_v28, %v1935_v41  ;;  %v1950_v47 = vsub.f32 %v1926_v49, %v1938_v60  ;;  %v1985_v56 = vadd.f32 1e-05, %v1961_v29 }
 0x7a2   :  { %v1902_v12 = vpop.xlane.xlu1 %1901  ;;  %v1864_v51 = vpop.xlane.xlu0 %1863 }
 0x7a3   :  { %v1924_v59 = vmul.f32 0.0078125, %v1902_v12  ;;  %v1959_v61 = vmax.f32 %v1947_v52, 0.0  ;;  %v1962_v17 = vmax.f32 %v1950_v47, 0.0  ;;  %v6311_v42 = vmul.f32 0.0078125, %v1864_v51 }
 0x7a5   :  { %v1948_v32 = vsub.f32 %v1924_v59, %v1936_v39  ;;  %v1983_v62 = vadd.f32 1e-05, %v1959_v61  ;;  %v1986_v30 = vadd.f32 1e-05, %v1962_v17  ;;  %v1941_v23 = vmul.f32 %v6311_v42, %v6311_v42 }
 0x7a6   :  { %v1866_v34 = vpop.xlane.xlu1 %1865  ;;  %v1860_v38 = vpop.xlane.xlu0 %1859  ;;  %v1971_v39 = vsub.f32 %v6226_v58, %v6293_v7 }
 0x7a7   :  { %v1960_v63 = vmax.f32 %v1948_v32, 0.0  ;;  %v6309_v27 = vmul.f32 0.0078125, %v1860_v38  ;;  %5491 = vrsqrt.f32 %v1983_v62  ;;  %v6313_v24 = vmul.f32 0.0078125, %v1866_v34 }
 0x7a8   :  { %5493 = vrsqrt.f32 %v1985_v56  ;;  %v1973_v62 = vsub.f32 %v6222_v45, %v6295_v53 }
 0x7a9   :  { %v1984_v18 = vadd.f32 1e-05, %v1960_v63  ;;  %v1939_v55 = vmul.f32 %v6309_v27, %v6309_v27  ;;  %v1942_v11 = vmul.f32 %v6313_v24, %v6313_v24 }
 0x7aa   :  { %v1862_v4 = vpop.xlane.xlu1 %1861  ;;  %v1912_v8 = vpop.xlane.xlu0 %1911 }
 0x7ab   :  { %v1929_v33 = vmul.f32 0.0078125, %v1912_v8  ;;  %5495 = vrsqrt.f32 %v1984_v18  ;;  %v6319_v5 = vmul.f32 0.0078125, %v1862_v4  ;;  %v1972_v4 = vsub.f32 %v6234_v37, %v6299_v44  ;;  %v6341_v8 = vld [vmem:[#allocation8 + $0x8] ss:$0 sm:$0xff] }
 0x7ac   :  { %5497 = vrsqrt.f32 %v1986_v30  ;;  %v1974_v37 = vsub.f32 %v6229_v57, %v6303_v40 }
 0x7ad   :  { %v1953_v48 = vsub.f32 %v1929_v33, %v1941_v23  ;;  %v1940_v3 = vmul.f32 %v6319_v5, %v6319_v5 }
 0x7ae   :  { %v1914_v9 = vpop.xlane.xlu1 %1913  ;;  %v1908_v46 = vpop.xlane.xlu0 %1907 }
 0x7af   :  { %v1927_v26 = vmul.f32 0.0078125, %v1908_v46  ;;  %v1930_v31 = vmul.f32 0.0078125, %v1914_v9  ;;  %v1965_v41 = vmax.f32 %v1953_v48, 0.0 }
 0x7b1   :  { %v1951_v50 = vsub.f32 %v1927_v26, %v1939_v55  ;;  %v1954_v14 = vsub.f32 %v1930_v31, %v1942_v11  ;;  %v1989_v59 = vadd.f32 1e-05, %v1965_v41  ;;  %v1975_v41 = vsub.f32 %v6253_v1, %v6309_v27 }
 0x7b2   :  { %v1910_v25 = vpop.xlane.xlu1 %1909  ;;  %v1872_v10 = vpop.xlane.xlu0 %1871 }
 0x7b3   :  { %v1963_v22 = vmax.f32 %v1951_v50, 0.0  ;;  %v1928_v20 = vmul.f32 0.0078125, %v1910_v25  ;;  %v1966_v51 = vmax.f32 %v1954_v14, 0.0  ;;  %v6335_v56 = vmul.f32 0.0078125, %v1872_v10 }
 0x7b4   :  { %v5492_v12 = vpop.eup %5491 }
 0x7b5   :  { %v1987_v54 = vadd.f32 1e-05, %v1963_v22  ;;  %v1952_v28 = vsub.f32 %v1928_v20, %v1940_v3  ;;  %v5494_v29 = vpop.eup %5493  ;;  %v2007_v63 = vmul.f32 %v5492_v12, %v1971_v39  ;;  %v1990_v58 = vadd.f32 1e-05, %v1966_v51  ;;  %v6357_v3 = vld [vmem:[#allocation8 + $0x9] ss:$0 sm:$0xff] }
 0x7b6   :  { %v1874_v6 = vpop.xlane.xlu1 %1873  ;;  %v1868_v52 = vpop.xlane.xlu0 %1867  ;;  %v2009_v18 = vmul.f32 %v5494_v29, %v1973_v62  ;;  %v1945_v31 = vmul.f32 %v6335_v56, %v6335_v56  ;;  %v6379_v62 = vstv %s6354_s11 }
 0x7b7   :  { %5499 = vrsqrt.f32 %v1987_v54  ;;  %v1964_v36 = vmax.f32 %v1952_v28, 0.0  ;;  %v6325_v49 = vmul.f32 0.0078125, %v1868_v52  ;;  %v6343_v30 = vmul.f32 0.0078125, %v1874_v6 }
 0x7b8   :  { %v5496_v17 = vpop.eup %5495  ;;  %v2023_v44 = vmul.f32 %v6341_v8, %v2007_v63  ;;  %v2025_v25 = vmul.f32 %v6341_v8, %v2009_v18  ;;  %v6366_v52 = vstv %s6337_s2 }
 0x7b9   :  { %v1988_v60 = vadd.f32 1e-05, %v1964_v36  ;;  %v1943_v47 = vmul.f32 %v6325_v49, %v6325_v49  ;;  %v5498_v53 = vpop.eup %5497  ;;  %v2008_v23 = vmul.f32 %v5496_v17, %v1972_v4  ;;  %v1946_v57 = vmul.f32 %v6343_v30, %v6343_v30 }
 0x7ba   :  { %v1870_v61 = vpop.xlane.xlu1 %1869  ;;  %v1916_v32 = vpop.xlane.xlu0 %1915  ;;  %v2010_v10 = vmul.f32 %v5498_v53, %v1974_v37  ;;  %v2039_v14 = vadd.f32 %v6357_v3, %v2023_v44  ;;  %v2041_v51 = vadd.f32 %v6357_v3, %v2025_v25  ;;  %v1977_v4 = vsub.f32 %v6244_v35, %v6311_v42 }
 0x7bb   :  { %v6331_v34 = vmul.f32 0.0078125, %v1870_v61  ;;  %v1931_v38 = vmul.f32 0.0078125, %v1916_v32  ;;  %5501 = vrsqrt.f32 %v1988_v60  ;;  %v2024_v54 = vmul.f32 %v6341_v8, %v2008_v23 }
 0x7bc   :  { %5503 = vrsqrt.f32 %v1989_v59  ;;  %v2026_v39 = vmul.f32 %v6341_v8, %v2010_v10  ;;  %v6371_v61 = vstv %s6345_s10  ;;  %v1976_v32 = vsub.f32 %v6258_v19, %v6319_v5 }
 0x7bd   :  { %v1955_v7 = vsub.f32 %v1931_v38, %v1943_v47  ;;  %v1944_v9 = vmul.f32 %v6331_v34, %v6331_v34  ;;  %5505 = vrsqrt.f32 %v1990_v58  ;;  %v2053_v27 = vmul.f32 %v6366_v52, %v2039_v14 }
 0x7be   :  { %v1918_v33 = vpop.xlane.xlu1 %1917  ;;  %v1920_v45 = vpop.xlane.xlu0 %1919  ;;  %v2040_v29 = vadd.f32 %v6357_v3, %v2024_v54  ;;  %v2063_v17 = vmul.f32 %v6371_v61, %v2041_v51  ;;  %v2042_v58 = vadd.f32 %v6357_v3, %v2026_v39  ;;  %v1978_v35 = vsub.f32 %v6250_v0, %v6313_v24  ;;  %v5641_v39 = vld [vmem:[#allocation2 + $0x20] sm:$0xff] }
 0x7bf   :  { %v1967_v46 = vmax.f32 %v1955_v7, 0.0  ;;  %v1932_v55 = vmul.f32 0.0078125, %v1918_v33  ;;  %v1933_v26 = vmul.f32 0.0078125, %v1920_v45  ;;  %v1979_v42 = vsub.f32 %v6277_v21, %v6325_v49 }
 0x7c0   :  { %v2067_v18 = vadd.f32 %v2063_v17, %v2053_v27  ;;  %v2054_v33 = vmul.f32 %v6366_v52, %v2040_v29  ;;  %v1981_v49 = vsub.f32 %v6268_v16, %v6335_v56 }
 0x7c1   :  { %v1991_v50 = vadd.f32 1e-05, %v1967_v46  ;;  %v1956_v48 = vsub.f32 %v1932_v55, %v1944_v9  ;;  %v1957_v11 = vsub.f32 %v1933_v26, %v1945_v31  ;;  %v6389_v9 = vstv %s4524_s12 }
 0x7c2   :  { %v1922_v22 = vpop.xlane.xlu1 %1921  ;;  %v2064_v55 = vmul.f32 %v6371_v61, %v2042_v58 }
 0x7c3   :  { %5507 = vrsqrt.f32 %v1991_v50  ;;  %v1968_v40 = vmax.f32 %v1956_v48, 0.0  ;;  %v1934_v20 = vmul.f32 0.0078125, %v1922_v22  ;;  %v1969_v28 = vmax.f32 %v1957_v11, 0.0 }
 0x7c4   :  { %v5500_v6 = vpop.eup %5499  ;;  %v2068_v31 = vadd.f32 %v2064_v55, %v2054_v33 }
 0x7c5   :  { %v1992_v36 = vadd.f32 1e-05, %v1968_v40  ;;  %v1958_v12 = vsub.f32 %v1934_v20, %v1946_v57  ;;  %v2011_v59 = vmul.f32 %v5500_v6, %v1975_v41  ;;  %v1993_v60 = vadd.f32 1e-05, %v1969_v28  ;;  %v5639_v40 = vld [vmem:[#allocation2] sm:$0xff]  ;;  %v5640_v20 = vld [vmem:[#allocation2 + $0x10] sm:$0xff] }
 0x7c6   :  { %v1980_v57 = vsub.f32 %v6282_v13, %v6331_v34  ;;  %v2057_v14 = vadd.f32 %v5640_v20, %v5639_v40  ;;  %v1982_v34 = vsub.f32 %v6273_v15, %v6343_v30 }
 0x7c7   :  { %5509 = vrsqrt.f32 %v1992_v36  ;;  %v1970_v1 = vmax.f32 %v1958_v12, 0.0  ;;  %v2027_v47 = vmul.f32 %v6341_v8, %v2011_v59 }
 0x7c8   :  { %5511 = vrsqrt.f32 %v1993_v60  ;;  %v5502_v38 = vpop.eup %5501  ;;  %v2071_v59 = vadd.f32 %v5641_v39, %v2057_v14  ;;  %v5642_v60 = vld [vmem:[#allocation2 + $0x8] sm:$0xff] }
 0x7c9   :  { %v1994_v63 = vadd.f32 1e-05, %v1970_v1  ;;  %v2043_v7 = vadd.f32 %v6357_v3, %v2027_v47  ;;  %v2012_v19 = vmul.f32 %v5502_v38, %v1976_v32  ;;  %v5504_v5 = vpop.eup %5503  ;;  %v5643_v32 = vld [vmem:[#allocation2 + $0x18] sm:$0xff]  ;;  %v5326_v39 = vld [vmem:[#allocation6 + $0x380] ss:$72 sps:$4 sm:$0xff]  }
 0x7ca   :  { %v5506_v46 = vpop.eup %5505  ;;  %v2013_v26 = vmul.f32 %v5504_v5, %v1977_v4  ;;  %v2058_v1 = vadd.f32 %v5643_v32, %v5642_v60  ;;  %v5329_v60 = vld [vmem:[#allocation6 + $0xac] ss:$72 sps:$4 sm:$0xff]   ;;  %v5330_v32 = vld [vmem:[#allocation6 + $0x2f0] ss:$72 sps:$4 sm:$0xff]  }
 0x7cb   :  { %5513 = vrsqrt.f32 %v1994_v63  ;;  %v2077_v45 = vmul.f32 %v6379_v62, %v2043_v7  ;;  %v2028_v53 = vmul.f32 %v6341_v8, %v2012_v19  ;;  %v2014_v25 = vmul.f32 %v5506_v46, %v1978_v35  ;;  %v5644_v19 = vld [vmem:[#allocation2 + $0x28] sm:$0xff]  ;;  %v5646_v35 = vld [vmem:[#allocation2 + $0x30] sm:$0xff] }
 0x7cc   :  { %v2029_v11 = vmul.f32 %v6341_v8, %v2013_v26  ;;  %v2085_v7 = vmul.f32 0.33333334, %v2071_v59  ;;  %v2072_v5 = vadd.f32 %v5644_v19, %v2058_v1  ;;  %v5323_v59 = vld [vmem:[#allocation6 + $0x138] ss:$72 sps:$4 sm:$0xff]   ;;  %v5327_v1 = vld [vmem:[#allocation6 + $0xa8] ss:$72 sps:$4 sm:$0xff]  }
 0x7cd   :  { %v2081_v37 = vadd.f32 %v2077_v45, %v2067_v18  ;;  %v2044_v44 = vadd.f32 %v6357_v3, %v2028_v53  ;;  %v2030_v41 = vmul.f32 %v6341_v8, %v2014_v25 }
 0x7ce   :  { %v2045_v36 = vadd.f32 %v6357_v3, %v2029_v11  ;;  %v2086_v55 = vmul.f32 0.33333334, %v2072_v5 }
 0x7cf   :  { %v2091_v50 = vadd.f32 %v6389_v9, %v2081_v37  ;;  %v2078_v48 = vmul.f32 %v6379_v62, %v2044_v44  ;;  %v2046_v27 = vadd.f32 %v6357_v3, %v2030_v41  ;;  %v5645_v44 = vld [vmem:[#allocation2 + $0x40] sm:$0xff] }
 0x7d0   :  { %v5508_v23 = vpop.eup %5507  ;;  %v2055_v38 = vmul.f32 %v6366_v52, %v2045_v36  ;;  %v5310_v41 = vld [vmem:[#allocation6 + $0x378] ss:$72 sps:$4 sm:$0xff]   ;;  %v5313_v36 = vld [vmem:[#allocation6 + $0x2e8] ss:$72 sps:$4 sm:$0xff]  }
 0x7d1   :  { %v2015_v10 = vmul.f32 %v5508_v23, %v1979_v42  ;;  %5515 = vtanh.f32 %v2091_v50  ;;  %v2082_v22 = vadd.f32 %v2078_v48, %v2068_v31  ;;  %v2056_v4 = vmul.f32 %v6366_v52, %v2046_v27  ;;  %v5647_v23 = vld [vmem:[#allocation2 + $0x48] sm:$0xff]  ;;  %v5648_v31 = vld [vmem:[#allocation2 + $0x38] sm:$0xff] }
 0x7d2   :  { %v2059_v42 = vadd.f32 %v5646_v35, %v5645_v44  ;;  %v2060_v50 = vadd.f32 %v5648_v31, %v5647_v23  ;;  %v5331_v27 = vld [vmem:[#allocation6 + $0x18] ss:$72 sps:$4 sm:$0xff]  }
 0x7d3   :  { %v2031_v0 = vmul.f32 %v6341_v8, %v2015_v10  ;;  %v2092_v21 = vadd.f32 %v6389_v9, %v2082_v22  ;;  %v5650_v10 = vld [vmem:[#allocation2 + $0x58] sm:$0xff] }
 0x7d4   :  { %v5510_v24 = vpop.eup %5509  ;;  %v2074_v11 = vadd.f32 %v5650_v10, %v2060_v50 }
 0x7d5   :  { %v5512_v54 = vpop.eup %5511  ;;  %v2047_v28 = vadd.f32 %v6357_v3, %v2031_v0  ;;  %v2016_v6 = vmul.f32 %v5510_v24, %v1980_v57  ;;  %5517 = vtanh.f32 %v2092_v21  ;;  %v5309_v21 = vld [vmem:[#allocation6 + $0x40c] ss:$72 sps:$4 sm:$0xff]  }
 0x7d6   :  { %v2017_v13 = vmul.f32 %v5512_v54, %v1981_v49  ;;  %v2088_v0 = vmul.f32 0.33333334, %v2074_v11  ;;  %v5307_v49 = vld [vmem:[#allocation6 + $0x408] ss:$72 sps:$4 sm:$0xff]   ;;  %2339 = vmatprep.subr.bf16.mxu0 %v5309_v21  ;;  %v5312_v54 = vld [vmem:[#allocation6 + $0x37c] ss:$72 sps:$4 sm:$0xff]  }
 0x7d7   :  { %v2032_v12 = vmul.f32 %v6341_v8, %v2016_v6  ;;  %v2065_v16 = vmul.f32 %v6371_v61, %v2047_v28  ;;  %2340 = vmatpush1.bf16.msra.mxu0 %v5307_v49  ;;  %v5315_v6 = vld [vmem:[#allocation6 + $0x2ec] ss:$72 sps:$4 sm:$0xff]  }
 0x7d8   :  { %v5514_v51 = vpop.eup %5513  ;;  %v2033_v56 = vmul.f32 %v6341_v8, %v2017_v13  ;;  %2341 = vmatprep.subr.bf16.mxu0 %v5312_v54  ;;  %v5318_v13 = vld [vmem:[#allocation6 + $0x25c] ss:$72 sps:$4 sm:$0xff]  }
 0x7d9   :  { %v2048_v29 = vadd.f32 %v6357_v3, %v2032_v12  ;;  %v2018_v47 = vmul.f32 %v5514_v51, %v1982_v34  ;;  %v2069_v17 = vadd.f32 %v2065_v16, %v2055_v38  ;;  %v5316_v34 = vld [vmem:[#allocation6 + $0x258] ss:$72 sps:$4 sm:$0xff]   ;;  %v5321_v12 = vld [vmem:[#allocation6 + $0x1cc] ss:$72 sps:$4 sm:$0xff]   ;;  %v5319_v16 = vld [vmem:[#allocation6 + $0x1c8] ss:$72 sps:$4 sm:$0xff]  }
 0x7da   :  { %v2049_v15 = vadd.f32 %v6357_v3, %v2033_v56  ;;  %v5322_v51 = vld [vmem:[#allocation6 + $0x410] ss:$72 sps:$4 sm:$0xff]   ;;  %v5325_v56 = vld [vmem:[#allocation6 + $0x13c] ss:$72 sps:$4 sm:$0xff]  }
 0x7db   :  { %v2066_v30 = vmul.f32 %v6371_v61, %v2048_v29  ;;  %v2034_v63 = vmul.f32 %v6341_v8, %v2018_v47  ;;  %2342 = vmatpush1.bf16.msra.mxu0 %v5310_v41  ;;  %5015 = vmatprep.subr.bf16.mxu1 %v5322_v51  ;;  %v5333_v29 = vld [vmem:[#allocation6 + $0x1c] ss:$72 sps:$4 sm:$0xff]   ;;  %v5334_v47 = vld [vmem:[#allocation6 + $0x260] ss:$72 sps:$4 sm:$0xff]   ;;  %v5335_v38 = vld [vmem:[#allocation6 + $0x1d0] ss:$72 sps:$4 sm:$0xff]  }
 0x7dc   :  { %v2079_v58 = vmul.f32 %v6379_v62, %v2049_v15  ;;  %2343 = vmatprep.subr.bf16.mxu0 %v5315_v6  ;;  %5016 = vmatpush3.bf16.msra.mxu1 %v5322_v51  ;;  %v5336_v15 = vld [vmem:[#allocation6 + $0x140] ss:$72 sps:$4 sm:$0xff]   ;;  %v4525_v6 = vld [vmem:[#allocation8 + $0x1e] ss:$0 sm:$0xff] }
 0x7dd   :  { %v2050_v18 = vadd.f32 %v6357_v3, %v2034_v63  ;;  %v2070_v53 = vadd.f32 %v2066_v30, %v2056_v4  ;;  %5017 = vmatprep.subr.bf16.mxu1 %v5326_v39  ;;  %v5337_v30 = vld [vmem:[#allocation6 + $0xb0] ss:$72 sps:$4 sm:$0xff]   ;;  %v5338_v63 = vld [vmem:[#allocation6 + $0x20] ss:$72 sps:$4 sm:$0xff]  }
 0x7de   :  { %v2083_v33 = vadd.f32 %v2079_v58, %v2069_v17  ;;  %v6423_v45 = vpop.eup %5515 }
 0x7df   :  { %v2080_v46 = vmul.f32 %v6379_v62, %v2050_v18  ;;  %v6428_v8 = vadd.f32 %v6423_v45, %v2085_v7  ;;  %2344 = vmatpush1.bf16.msra.mxu0 %v5313_v36 }
 0x7e0   :  { %v2093_v61 = vadd.f32 %v6389_v9, %v2083_v33  ;;  %2345 = vmatprep.subr.bf16.mxu0 %v5318_v13  ;;  %5018 = vmatpush3.bf16.msra.mxu1 %v5326_v39 }
 0x7e1   :  { %v2084_v26 = vadd.f32 %v2080_v46, %v2070_v53  ;;  %2105 = vadd.xlane.f32.xlu0 %v6428_v8  ;;  %v2117_v62 = vmul.f32 %v6428_v8, %v6428_v8  ;;  %5019 = vmatprep.subr.bf16.mxu1 %v5330_v32 }
 0x7e2   :  { %5519 = vtanh.f32 %v2093_v61  ;;  %v6431_v37 = vpop.eup %5517 }
 0x7e3   :  { %v2094_v3 = vadd.f32 %v6389_v9, %v2084_v26  ;;  %v6435_v52 = vadd.f32 %v6431_v37, %v2086_v55  ;;  %v5649_v9 = vld [vmem:[#allocation2 + $0x50] sm:$0xff]  ;;  %2346 = vmatpush1.bf16.msra.mxu0 %v5316_v34 }
 0x7e4   :  { %v2073_v25 = vadd.f32 %v5649_v9, %v2059_v42  ;;  %2347 = vmatprep.subr.bf16.mxu0 %v5321_v12  ;;  %5020 = vmatpush3.bf16.msra.mxu1 %v5330_v32 }
 0x7e5   :  { %5521 = vtanh.f32 %v2094_v3  ;;  %2107 = vadd.xlane.f32.xlu1 %v6435_v52  ;;  %2121 = vadd.xlane.f32.xlu0 %v2117_v62  ;;  %v2118_v48 = vmul.f32 %v6435_v52, %v6435_v52 }
 0x7e6   :  { %v2087_v22 = vmul.f32 0.33333334, %v2073_v25  ;;  %5021 = vmatprep.subr.bf16.mxu1 %v5334_v47 }
 0x7e7   :  { %2348 = vmatpush1.bf16.msra.mxu0 %v5319_v16  ;;  %v4526_v16 = vld [vmem:[#allocation8 + $0x1f] ss:$0 sm:$0xff] }
 0x7e8   :  { %2349 = vmatprep.subr.bf16.mxu0 %v5325_v56  ;;  %5022 = vmatpush3.bf16.msra.mxu1 %v5334_v47 }
 0x7e9   :  { %2123 = vadd.xlane.f32.xlu1 %v2118_v48  ;;  %5023 = vmatprep.subr.bf16.mxu1 %v5335_v38 }
 0x7eb   :  { %2350 = vmatpush1.bf16.msra.mxu0 %v5323_v59 }
 0x7ec   :  { %2351 = vmatprep.subr.bf16.mxu0 %v5329_v60  ;;  %5024 = vmatpush3.bf16.msra.mxu1 %v5335_v38 }
 0x7ed   :  { %5025 = vmatprep.subr.bf16.mxu1 %v5336_v15 }
 0x7ef   :  { %v6442_v57 = vpop.eup %5519  ;;  %2352 = vmatpush1.bf16.msra.mxu0 %v5327_v1 }
 0x7f0   :  { %v6445_v24 = vadd.f32 %v6442_v57, %v2087_v22  ;;  %2353 = vmatprep.subr.bf16.mxu0 %v5333_v29  ;;  %5026 = vmatpush3.bf16.msra.mxu1 %v5336_v15 }
 0x7f1   :  { %5027 = vmatprep.subr.bf16.mxu1 %v5337_v30 }
 0x7f2   :  { %v6447_v40 = vpop.eup %5521  ;;  %2109 = vadd.xlane.f32.xlu0 %v6445_v24  ;;  %v2119_v14 = vmul.f32 %v6445_v24, %v6445_v24 }
 0x7f3   :  { %v6451_v20 = vadd.f32 %v6447_v40, %v2088_v0  ;;  %2354 = vmatpush1.bf16.msra.mxu0 %v5331_v27 }
 0x7f4   :  { %5035 = vmatprep.subr.bf16.mxu0 %v5760_v43  ;;  %5028 = vmatpush3.bf16.msra.mxu1 %v5337_v30 }
 0x7f5   :  { %2111 = vadd.xlane.f32.xlu1 %v6451_v20  ;;  %v2120_v28 = vmul.f32 %v6451_v20, %v6451_v20  ;;  %5029 = vmatprep.subr.bf16.mxu1 %v5338_v63 }
 0x7f6   :  { %2125 = vadd.xlane.f32.xlu0 %v2119_v14 }
 0x7f8   :  { %5030 = vmatpush3.bf16.msra.mxu1 %v5338_v63 }
 0x7f9   :  { %2127 = vadd.xlane.f32.xlu1 %v2120_v28  ;;  %5053 = vmatprep.subr.bf16.mxu1 %v5760_v43 }
 0x86a   :  { %v2106_v17 = vpop.xlane.xlu0 %2105 }
 0x86b   :  { %v2113_v58 = vmul.f32 0.0078125, %v2106_v17  ;;  %v4552_v17 = vld [vmem:[#allocation8 + $0xb] ss:$0 sm:$0xff] }
 0x86d   :  { %v2133_v5 = vmul.f32 %v2113_v58, %v2113_v58  ;;  %v2145_v0 = vsub.f32 %v6428_v8, %v2113_v58 }
 0x86e   :  { %v2108_v7 = vpop.xlane.xlu1 %2107  ;;  %v2122_v19 = vpop.xlane.xlu0 %2121 }
 0x86f   :  { %v2114_v4 = vmul.f32 0.0078125, %v2108_v7  ;;  %v2129_v18 = vmul.f32 0.0078125, %v2122_v19 }
 0x871   :  { %v2137_v33 = vsub.f32 %v2129_v18, %v2133_v5  ;;  %v2134_v46 = vmul.f32 %v2114_v4, %v2114_v4  ;;  %v2146_v36 = vsub.f32 %v6435_v52, %v2114_v4  ;;  %v4551_v18 = vld [vmem:[#allocation8 + $0xa] ss:$0 sm:$0xff] }
 0x872   :  { %v2124_v53 = vpop.xlane.xlu1 %2123 }
 0x873   :  { %v2141_v61 = vmax.f32 %v2137_v33, 0.0  ;;  %v2130_v55 = vmul.f32 0.0078125, %v2124_v53 }
 0x875   :  { %v2149_v26 = vadd.f32 1e-05, %v2141_v61  ;;  %v2138_v3 = vsub.f32 %v2130_v55, %v2134_v46 }
 0x877   :  { %5523 = vrsqrt.f32 %v2149_v26  ;;  %v2142_v62 = vmax.f32 %v2138_v3, 0.0  ;;  %v4553_v26 = vld [vmem:[#allocation8 + $0xc] ss:$0 sm:$0xff] }
 0x879   :  { %v2150_v44 = vadd.f32 1e-05, %v2142_v62 }
 0x87b   :  { %v2110_v35 = vpop.xlane.xlu0 %2109  ;;  %5525 = vrsqrt.f32 %v2150_v44 }
 0x87c   :  { %v2115_v42 = vmul.f32 0.0078125, %v2110_v35 }
 0x87e   :  { %v2112_v23 = vpop.xlane.xlu1 %2111  ;;  %v2135_v48 = vmul.f32 %v2115_v42, %v2115_v42  ;;  %v2147_v52 = vsub.f32 %v6445_v24, %v2115_v42 }
 0x87f   :  { %v2116_v31 = vmul.f32 0.0078125, %v2112_v23  ;;  %v2126_v50 = vpop.xlane.xlu0 %2125 }
 0x880   :  { %v2131_v9 = vmul.f32 0.0078125, %v2126_v50 }
 0x881   :  { %v2136_v11 = vmul.f32 %v2116_v31, %v2116_v31  ;;  %v2148_v1 = vsub.f32 %v6451_v20, %v2116_v31 }
 0x882   :  { %v2139_v25 = vsub.f32 %v2131_v9, %v2135_v48  ;;  %v2128_v10 = vpop.xlane.xlu1 %2127 }
 0x883   :  { %v2132_v22 = vmul.f32 0.0078125, %v2128_v10 }
 0x884   :  { %v2143_v21 = vmax.f32 %v2139_v25, 0.0  ;;  %v5524_v49 = vpop.eup %5523 }
 0x885   :  { %v2140_v14 = vsub.f32 %v2132_v22, %v2136_v11  ;;  %v2157_v54 = vmul.f32 %v5524_v49, %v2145_v0 }
 0x886   :  { %v2151_v41 = vadd.f32 1e-05, %v2143_v21 }
 0x887   :  { %v2144_v28 = vmax.f32 %v2140_v14, 0.0  ;;  %v2165_v51 = vmul.f32 %v4525_v6, %v2157_v54 }
 0x888   :  { %5527 = vrsqrt.f32 %v2151_v41  ;;  %v5526_v13 = vpop.eup %5525 }
 0x889   :  { %v2152_v34 = vadd.f32 1e-05, %v2144_v28  ;;  %v2158_v12 = vmul.f32 %v5526_v13, %v2146_v36  ;;  %v6462_v39 = vadd.f32 %v4526_v16, %v2165_v51 }
 0x88b   :  { %5529 = vrsqrt.f32 %v2152_v34  ;;  %v2166_v56 = vmul.f32 %v4525_v6, %v2158_v12 }
 0x88d   :  { %v6464_v8 = vadd.f32 %v4526_v16, %v2166_v56 }
 0x88f   :  { %v2177_v59 = vpack.c.bf16 %v6464_v8, %v6462_v39 }
 0x891   :  { %2372 = vmatmul.mubr.bf16.vlgmr.msra.gmra.mxu0 %v2177_v59  ;;  %5031 = vmatprep.mubr.bf16.mxu1 %v2177_v59 }
 0x892   :  { %2381 = vmatprep.mubr.bf16.mxu0 %v5759_v2 }
 0x895   :  { %v5528_v60 = vpop.eup %5527 }
 0x896   :  { %v2159_v32 = vmul.f32 %v5528_v60, %v2147_v52 }
 0x898   :  { %v5530_v27 = vpop.eup %5529  ;;  %v2167_v47 = vmul.f32 %v4525_v6, %v2159_v32 }
 0x899   :  { %v2160_v29 = vmul.f32 %v5530_v27, %v2148_v1 }
 0x89a   :  { %v6471_v15 = vadd.f32 %v4526_v16, %v2167_v47 }
 0x89b   :  { %v2168_v38 = vmul.f32 %v4525_v6, %v2160_v29 }
 0x89d   :  { %v6473_v30 = vadd.f32 %v4526_v16, %v2168_v38 }
 0x89f   :  { %v2178_v63 = vpack.c.bf16 %v6473_v30, %v6471_v15 }
 0x8a1   :  { %2382 = vmatmul.mubr.bf16.gmra.mxu0 %v2178_v63  ;;  %5032 = vmatmul.mubr.bf16.vlgmr.msra.gmra.mxu1 %v2178_v63 }
 0x8a2   :  { %5037 = vmatprep.mubr.msk.bf16.mxu0 %vm5761_vm0, %v5760_v43  ;;  %5055 = vmatprep.mubr.msk.bf16.mxu1 %vm5761_vm0, %v5760_v43 }
 0x951   :  { %v2373_v24 = vpop.f32.mrf.mxu0 }
 0x952   :  { %v2446_v53 = vadd.f32 %v4551_v18, %v2373_v24 }
 0x953   :  { %v2375_v20 = vpop.f32.mrf.mxu0 }
 0x954   :  { %v2457_v19 = vadd.f32 %v4552_v17, %v2375_v20 }
 0x955   :  { %v2377_v58 = vpop.f32.mrf.mxu0 }
 0x956   :  { %v2447_v33 = vadd.f32 %v4551_v18, %v2377_v58 }
 0x957   :  { %v2379_v7 = vpop.f32.mrf.mxu0 }
 0x958   :  { %v2458_v5 = vadd.f32 %v4552_v17, %v2379_v7  ;;  %v2450_v55 = vpack.c.bf16 %v2447_v33, %v2446_v53 }
 0x95a   :  { %v2461_v4 = vpack.c.bf16 %v2458_v5, %v2457_v19 }
 0x95c   :  { %5036 = vmatpush3.bf16.xpose.msra.mxu0 %v2461_v4 }
 0x95d   :  { %5041 = vmatprep.subr.bf16.mxu0 %v5760_v43 }
 0x961   :  { %v2383_v46 = vpop.f32.mrf.mxu0  ;;  %v5033_v61 = vpop.f32.mrf.mxu1 }
 0x962   :  { %v2470_v42 = vadd.f32 %v5033_v61, %v4553_v26  ;;  %v2448_v0 = vadd.f32 %v4551_v18, %v2383_v46  ;;  %v5339_v46 = vld [vmem:[#allocation6 + $0x414] ss:$72 sps:$4 sm:$0xff]  }
 0x963   :  { %v2385_v3 = vpop.f32.mrf.mxu0  ;;  %v2426_v62 = vpop.f32.mrf.mxu1  ;;  %5038 = vmatmul.mubr.bf16.vlgmr.msra.gmra.mxu0 %v2450_v55 }
 0x964   :  { %5043 = vmatprep.mubr.msk.bf16.mxu0 %vm5761_vm0, %v5760_v43  ;;  %v2459_v50 = vadd.f32 %v4552_v17, %v2385_v3  ;;  %v2468_v21 = vadd.f32 %v4553_v26, %v2426_v62 }
 0x965   :  { %v2387_v44 = vpop.f32.mrf.mxu0  ;;  %v5034_v35 = vpop.f32.mrf.mxu1 }
 0x966   :  { %v2471_v23 = vadd.f32 %v5034_v35, %v4553_v26  ;;  %v2449_v11 = vadd.f32 %v4551_v18, %v2387_v44 }
 0x967   :  { %v2389_v31 = vpop.f32.mrf.mxu0  ;;  %v2429_v10 = vpop.f32.mrf.mxu1 }
 0x968   :  { %v2473_v48 = vpack.c.bf16 %v2471_v23, %v2470_v42  ;;  %v2460_v9 = vadd.f32 %v4552_v17, %v2389_v31  ;;  %v2469_v22 = vadd.f32 %v4553_v26, %v2429_v10  ;;  %v2451_v49 = vpack.c.bf16 %v2449_v11, %v2448_v0  ;;  %v5340_v31 = vld [vmem:[#allocation6 + $0x384] ss:$72 sps:$4 sm:$0xff]   ;;  %v5343_v0 = vld [vmem:[#allocation6 + $0x1d4] ss:$72 sps:$4 sm:$0xff]  }
 0x96a   :  { %v2462_v25 = vpack.c.bf16 %v2460_v9, %v2459_v50  ;;  %5054 = vmatpush3.bf16.msra.mxu1 %v2473_v48  ;;  %v2472_v14 = vpack.c.bf16 %v2469_v22, %v2468_v21  ;;  %v5341_v50 = vld [vmem:[#allocation6 + $0x2f4] ss:$72 sps:$4 sm:$0xff]   ;;  %v5342_v22 = vld [vmem:[#allocation6 + $0x264] ss:$72 sps:$4 sm:$0xff]  }
 0x96b   :  { %v5344_v21 = vld [vmem:[#allocation6 + $0x144] ss:$72 sps:$4 sm:$0xff]  }
 0x96c   :  { %5042 = vmatpush3.bf16.xpose.msra.mxu0 %v2462_v25 }
 0x96d   :  { %5047 = vmatprep.subr.bf16.mxu0 %v5760_v43 }
 0x973   :  { %5044 = vmatmul.mubr.bf16.vlgmr.msra.gmra.mxu0 %v2451_v49  ;;  %v5345_v49 = vld [vmem:[#allocation6 + $0xb4] ss:$72 sps:$4 sm:$0xff]  }
 0x974   :  { %5048 = vmatpush3.bf16.msra.mxu0 %v2472_v14  ;;  %5049 = vmatprep.mubr.msk.bf16.mxu0 %vm5761_vm0, %v5760_v43  ;;  %v5346_v14 = vld [vmem:[#allocation6 + $0x24] ss:$72 sps:$4 sm:$0xff]  }
 0x975   :  { %5059 = vmatprep.subr.bf16.mxu0 %v5339_v46 }
 0xa23   :  { %v2508_v54 = vpop.f32.mrf.mxu0 }
 0xa24   :  { %v2556_v41 = vsel %vm740_vm1, %v2508_v54, -inf }
 0xa25   :  { %2557 = vmax.xlane.f32.xlu0 %v2556_v41  ;;  %v5039_v28 = vpop.f32.mrf.mxu0 }
 0xa27   :  { %v2511_v6 = vpop.f32.mrf.mxu0 }
 0xa28   :  { %v2559_v36 = vsel %vm740_vm1, %v2511_v6, -inf }
 0xa29   :  { %2560 = vmax.xlane.f32.xlu1 %v2559_v36  ;;  %v5040_v13 = vpop.f32.mrf.mxu0 }
 0xa33   :  { %v2549_v34 = vpop.f32.mrf.mxu0 }
 0xa34   :  { %v2562_v12 = vsel %vm740_vm1, %v2549_v34, -inf }
 0xa35   :  { %2563 = vmax.xlane.f32.xlu0 %v2562_v12  ;;  %v5045_v51 = vpop.f32.mrf.mxu0 }
 0xa37   :  { %v2552_v16 = vpop.f32.mrf.mxu0 }
 0xa38   :  { %v2565_v56 = vsel %vm740_vm1, %v2552_v16, -inf }
 0xa39   :  { %2566 = vmax.xlane.f32.xlu1 %v2565_v56  ;;  %v5046_v59 = vpop.f32.mrf.mxu0  ;;  %v4556_v56 = vld [vmem:[#allocation8 + $0xd] ss:$0 sm:$0xff] }
 0xaae   :  { %v2558_v52 = vpop.xlane.xlu0 %2557 }
 0xaaf   :  { %v2568_v60 = vsub.f32 %v2508_v54, %v2558_v52 }
 0xab1   :  { %v2572_v32 = vmul.f32 1.442695, %v2568_v60 }
 0xab2   :  { %v2561_v1 = vpop.xlane.xlu1 %2560 }
 0xab3   :  { %5531 = vpow2.f32 %v2572_v32  ;;  %v2569_v27 = vsub.f32 %v2511_v6, %v2561_v1 }
 0xab5   :  { %v2574_v29 = vmul.f32 1.442695, %v2569_v27 }
 0xab7   :  { %5533 = vpow2.f32 %v2574_v29 }
 0xabe   :  { %v2564_v47 = vpop.xlane.xlu0 %2563 }
 0xabf   :  { %v2570_v38 = vsub.f32 %v2549_v34, %v2564_v47 }
 0xac0   :  { %v5532_v63 = vpop.eup %5531 }
 0xac1   :  { %v2576_v24 = vmul.f32 1.442695, %v2570_v38  ;;  %v2580_v20 = vsel %vm740_vm1, %v5532_v63, 0.0 }
 0xac2   :  { %v2567_v17 = vpop.xlane.xlu1 %2566  ;;  %2581 = vadd.xlane.f32.xlu0 %v2580_v20 }
 0xac3   :  { %5535 = vpow2.f32 %v2576_v24  ;;  %v2571_v58 = vsub.f32 %v2552_v16, %v2567_v17 }
 0xac4   :  { %v5534_v7 = vpop.eup %5533 }
 0xac5   :  { %v2578_v19 = vmul.f32 1.442695, %v2571_v58  ;;  %v2583_v5 = vsel %vm740_vm1, %v5534_v7, 0.0 }
 0xac6   :  { %2584 = vadd.xlane.f32.xlu1 %v2583_v5  ;;  %v5347_v5 = vld [vmem:[#allocation6 + $0x418] ss:$72 sps:$4 sm:$0xff]  }
 0xac7   :  { %5537 = vpow2.f32 %v2578_v19  ;;  %5079 = vmatprep.subr.bf16.mxu1 %v5347_v5 }
 0xad0   :  { %v5536_v4 = vpop.eup %5535 }
 0xad1   :  { %v2586_v18 = vsel %vm740_vm1, %v5536_v4, 0.0 }
 0xad2   :  { %2587 = vadd.xlane.f32.xlu0 %v2586_v18  ;;  %v5349_v18 = vld [vmem:[#allocation6 + $0x2f8] ss:$72 sps:$4 sm:$0xff]  }
 0xad4   :  { %v5538_v33 = vpop.eup %5537 }
 0xad5   :  { %v2589_v53 = vsel %vm740_vm1, %v5538_v33, 0.0 }
 0xad6   :  { %2590 = vadd.xlane.f32.xlu1 %v2589_v53  ;;  %v5351_v53 = vld [vmem:[#allocation6 + $0x1d8] ss:$72 sps:$4 sm:$0xff]  }
 0xb4b   :  { %v2582_v61 = vpop.xlane.xlu0 %2581 }
 0xb4c   :  { %5539 = vrcp.f32 %v2582_v61  ;;  %v5353_v61 = vld [vmem:[#allocation6 + $0xb8] ss:$72 sps:$4 sm:$0xff]  }
 0xb4f   :  { %v2585_v55 = vpop.xlane.xlu1 %2584 }
 0xb50   :  { %5541 = vrcp.f32 %v2585_v55  ;;  %v5354_v55 = vld [vmem:[#allocation6 + $0x28] ss:$72 sps:$4 sm:$0xff]  }
 0xb59   :  { %v5540_v3 = vpop.eup %5539 }
 0xb5a   :  { %v2596_v35 = vmul.f32 %v5540_v3, %v5532_v63  ;;  %v5356_v3 = vld [vmem:[#allocation6 + $0x38c] ss:$72 sps:$4 sm:$0xff]  }
 0xb5b   :  { %v2588_v26 = vpop.xlane.xlu0 %2587 }
 0xb5c   :  { %5543 = vrcp.f32 %v2588_v26  ;;  %v5355_v26 = vld [vmem:[#allocation6 + $0x41c] ss:$72 sps:$4 sm:$0xff]  }
 0xb5d   :  { %v5542_v62 = vpop.eup %5541 }
 0xb5e   :  { %v2597_v42 = vmul.f32 %v5542_v62, %v5534_v7  ;;  %v5357_v62 = vld [vmem:[#allocation6 + $0x2fc] ss:$72 sps:$4 sm:$0xff]  }
 0xb5f   :  { %v2591_v44 = vpop.xlane.xlu1 %2590 }
 0xb60   :  { %5545 = vrcp.f32 %v2591_v44  ;;  %v2600_v23 = vpack.c.bf16 %v2597_v42, %v2596_v35  ;;  %v5358_v44 = vld [vmem:[#allocation6 + $0x26c] ss:$72 sps:$4 sm:$0xff]   ;;  %v5359_v35 = vld [vmem:[#allocation6 + $0x1dc] ss:$72 sps:$4 sm:$0xff]  }
 0xb62   :  { %5050 = vmatmul.mubr.msk.bf16.vlgmr.msra.gmra.mxu0 %vm740_vm1, %v2600_v23 }
 0xb63   :  { %5060 = vmatpush3.bf16.msra.mxu0 %v5339_v46  ;;  %v5352_v46 = vld [vmem:[#allocation6 + $0x148] ss:$72 sps:$4 sm:$0xff]  }
 0xb64   :  { %5061 = vmatprep.subr.bf16.mxu0 %v5340_v31 }
 0xb67   :  { %5062 = vmatpush3.bf16.msra.mxu0 %v5340_v31 }
 0xb68   :  { %5063 = vmatprep.subr.bf16.mxu0 %v5341_v50 }
 0xb69   :  { %v5544_v48 = vpop.eup %5543 }
 0xb6a   :  { %v2598_v25 = vmul.f32 %v5544_v48, %v5536_v4  ;;  %v5348_v4 = vld [vmem:[#allocation6 + $0x388] ss:$72 sps:$4 sm:$0xff]  }
 0xb6b   :  { %5064 = vmatpush3.bf16.msra.mxu0 %v5341_v50 }
 0xb6c   :  { %5065 = vmatprep.subr.bf16.mxu0 %v5342_v22 }
 0xb6d   :  { %v5546_v9 = vpop.eup %5545 }
 0xb6e   :  { %v2599_v10 = vmul.f32 %v5546_v9, %v5538_v33  ;;  %v5350_v33 = vld [vmem:[#allocation6 + $0x268] ss:$72 sps:$4 sm:$0xff]  }
 0xb6f   :  { %5066 = vmatpush3.bf16.msra.mxu0 %v5342_v22 }
 0xb70   :  { %v2601_v11 = vpack.c.bf16 %v2599_v10, %v2598_v25  ;;  %5067 = vmatprep.subr.bf16.mxu0 %v5343_v0 }
 0xb72   :  { %5056 = vmatmul.mubr.msk.bf16.vlgmr.msra.gmra.mxu1 %vm740_vm1, %v2601_v11 }
 0xb73   :  { %5068 = vmatpush3.bf16.msra.mxu0 %v5343_v0  ;;  %5080 = vmatpush3.bf16.msra.mxu1 %v5347_v5 }
 0xb74   :  { %5069 = vmatprep.subr.bf16.mxu0 %v5344_v21  ;;  %5081 = vmatprep.subr.bf16.mxu1 %v5348_v4 }
 0xb77   :  { %5070 = vmatpush3.bf16.msra.mxu0 %v5344_v21  ;;  %5082 = vmatpush3.bf16.msra.mxu1 %v5348_v4 }
 0xb78   :  { %5071 = vmatprep.subr.bf16.mxu0 %v5345_v49  ;;  %5083 = vmatprep.subr.bf16.mxu1 %v5349_v18 }
 0xb7b   :  { %5072 = vmatpush3.bf16.msra.mxu0 %v5345_v49  ;;  %5084 = vmatpush3.bf16.msra.mxu1 %v5349_v18 }
 0xb7c   :  { %5073 = vmatprep.subr.bf16.mxu0 %v5346_v14  ;;  %5085 = vmatprep.subr.bf16.mxu1 %v5350_v33 }
 0xb7f   :  { %5074 = vmatpush3.bf16.msra.mxu0 %v5346_v14  ;;  %5086 = vmatpush3.bf16.msra.mxu1 %v5350_v33 }
 0xb80   :  { %5087 = vmatprep.subr.bf16.mxu1 %v5351_v53  ;;  %5099 = vmatprep.subr.bf16.mxu0 %v5355_v26 }
 0xb83   :  { %5088 = vmatpush3.bf16.msra.mxu1 %v5351_v53 }
 0xb84   :  { %5089 = vmatprep.subr.bf16.mxu1 %v5352_v46 }
 0xb87   :  { %5090 = vmatpush3.bf16.msra.mxu1 %v5352_v46  ;;  %v4566_v46 = vld [vmem:[#allocation8 + $0xf] ss:$0 sm:$0xff] }
 0xb88   :  { %5091 = vmatprep.subr.bf16.mxu1 %v5353_v61 }
 0xb8b   :  { %5092 = vmatpush3.bf16.msra.mxu1 %v5353_v61 }
 0xb8c   :  { %5093 = vmatprep.subr.bf16.mxu1 %v5354_v55 }
 0xb8f   :  { %5094 = vmatpush3.bf16.msra.mxu1 %v5354_v55 }
 0xc22   :  { %v2639_v54 = vpop.f32.mrf.mxu0 }
 0xc24   :  { %v5051_v41 = vpop.f32.mrf.mxu0 }
 0xc26   :  { %v2642_v28 = vpop.f32.mrf.mxu0 }
 0xc27   :  { %v2706_v6 = vpack.c.bf16 %v2642_v28, %v2639_v54 }
 0xc28   :  { %v5052_v36 = vpop.f32.mrf.mxu0 }
 0xc29   :  { %5075 = vmatprep.mubr.bf16.mxu0 %v2706_v6 }
 0xc32   :  { %v2683_v13 = vpop.f32.mrf.mxu1 }
 0xc34   :  { %v5057_v34 = vpop.f32.mrf.mxu1 }
 0xc36   :  { %v2686_v12 = vpop.f32.mrf.mxu1 }
 0xc37   :  { %v2707_v51 = vpack.c.bf16 %v2686_v12, %v2683_v13 }
 0xc38   :  { %v5058_v16 = vpop.f32.mrf.mxu1 }
 0xc39   :  { %5076 = vmatmul.mubr.bf16.vlgmr.msra.gmra.mxu0 %v2707_v51 }
 0xc3a   :  { %5100 = vmatpush3.bf16.msra.mxu0 %v5355_v26 }
 0xc3b   :  { %5101 = vmatprep.subr.bf16.mxu0 %v5356_v3 }
 0xc3e   :  { %5102 = vmatpush3.bf16.msra.mxu0 %v5356_v3 }
 0xc3f   :  { %5103 = vmatprep.subr.bf16.mxu0 %v5357_v62 }
 0xc42   :  { %5104 = vmatpush3.bf16.msra.mxu0 %v5357_v62 }
 0xc43   :  { %5105 = vmatprep.subr.bf16.mxu0 %v5358_v44 }
 0xc46   :  { %5106 = vmatpush3.bf16.msra.mxu0 %v5358_v44 }
 0xc47   :  { %5107 = vmatprep.subr.bf16.mxu0 %v5359_v35 }
 0xc4a   :  { %5108 = vmatpush3.bf16.msra.mxu0 %v5359_v35 }
 0xcf9   :  { %v5077_v59 = vpop.f32.mrf.mxu0 }
 0xcfa   :  { %v2804_v52 = vadd.f32 %v5077_v59, %v4556_v56 }
 0xcfb   :  { %v2795_v60 = vpop.f32.mrf.mxu0 }
 0xcfc   :  { %v6498_v32 = vadd.f32 %v2804_v52, %v6471_v15  ;;  %v2796_v1 = vadd.f32 %v4556_v56, %v2795_v60 }
 0xcfd   :  { %v5078_v27 = vpop.f32.mrf.mxu0 }
 0xcfe   :  { %v2807_v29 = vadd.f32 %v5078_v27, %v4556_v56  ;;  %2820 = vadd.xlane.f32.xlu0 %v6498_v32  ;;  %v6502_v38 = vadd.f32 %v2796_v1, %v6462_v39  ;;  %v2830_v7 = vmul.f32 %v6498_v32, %v6498_v32 }
 0xcff   :  { %v2798_v47 = vpop.f32.mrf.mxu0 }
 0xd00   :  { %v6505_v63 = vadd.f32 %v2807_v29, %v6473_v30  ;;  %v2799_v24 = vadd.f32 %v4556_v56, %v2798_v47  ;;  %v2828_v17 = vmul.f32 %v6502_v38, %v6502_v38 }
 0xd02   :  { %2822 = vadd.xlane.f32.xlu1 %v6505_v63  ;;  %2816 = vadd.xlane.f32.xlu0 %v6502_v38  ;;  %v6510_v20 = vadd.f32 %v2799_v24, %v6464_v8  ;;  %v2831_v19 = vmul.f32 %v6505_v63, %v6505_v63 }
 0xd04   :  { %v2829_v58 = vmul.f32 %v6510_v20, %v6510_v20 }
 0xd06   :  { %2818 = vadd.xlane.f32.xlu1 %v6510_v20  ;;  %2832 = vadd.xlane.f32.xlu0 %v2828_v17 }
 0xd0a   :  { %2834 = vadd.xlane.f32.xlu1 %v2829_v58  ;;  %2836 = vadd.xlane.f32.xlu0 %v2830_v7  ;;  %v4565_v7 = vld [vmem:[#allocation8 + $0xe] ss:$0 sm:$0xff] }
 0xd0e   :  { %2838 = vadd.xlane.f32.xlu1 %v2831_v19 }
 0xd87   :  { %v2821_v42 = vpop.xlane.xlu0 %2820 }
 0xd88   :  { %v2826_v48 = vmul.f32 0.0078125, %v2821_v42 }
 0xd8a   :  { %v2846_v21 = vmul.f32 %v2826_v48, %v2826_v48  ;;  %v2858_v4 = vsub.f32 %v6498_v32, %v2826_v48  ;;  %v5360_v32 = vld [vmem:[#allocation6 + $0x14c] ss:$72 sps:$4 sm:$0xff]   ;;  %v5361_v48 = vld [vmem:[#allocation6 + $0xbc] ss:$72 sps:$4 sm:$0xff]  }
 0xd8b   :  { %v2823_v23 = vpop.xlane.xlu1 %2822  ;;  %v2817_v31 = vpop.xlane.xlu0 %2816  ;;  %5109 = vmatprep.subr.bf16.mxu0 %v5360_v32 }
 0xd8c   :  { %v2824_v50 = vmul.f32 0.0078125, %v2817_v31  ;;  %v2827_v49 = vmul.f32 0.0078125, %v2823_v23  ;;  %5110 = vmatpush3.bf16.msra.mxu0 %v5360_v32 }
 0xd8d   :  { %5111 = vmatprep.subr.bf16.mxu0 %v5361_v48 }
 0xd8e   :  { %v2844_v10 = vmul.f32 %v2824_v50, %v2824_v50  ;;  %v2847_v51 = vmul.f32 %v2827_v49, %v2827_v49  ;;  %v2856_v24 = vsub.f32 %v6502_v38, %v2824_v50  ;;  %v2859_v55 = vsub.f32 %v6505_v63, %v2827_v49  ;;  %v5362_v63 = vld [vmem:[#allocation6 + $0x2c] ss:$72 sps:$4 sm:$0xff]  }
 0xd8f   :  { %v2819_v9 = vpop.xlane.xlu1 %2818  ;;  %v2833_v25 = vpop.xlane.xlu0 %2832 }
 0xd90   :  { %v2825_v11 = vmul.f32 0.0078125, %v2819_v9  ;;  %v2840_v22 = vmul.f32 0.0078125, %v2833_v25  ;;  %5112 = vmatpush3.bf16.msra.mxu0 %v5361_v48 }
 0xd91   :  { %5113 = vmatprep.subr.bf16.mxu0 %v5362_v63 }
 0xd92   :  { %v2848_v0 = vsub.f32 %v2840_v22, %v2844_v10  ;;  %v2845_v41 = vmul.f32 %v2825_v11, %v2825_v11  ;;  %v2857_v19 = vsub.f32 %v6510_v20, %v2825_v11  ;;  %v4567_v10 = vld [vmem:[#allocation8 + $0x10] ss:$0 sm:$0xff] }
 0xd93   :  { %v2835_v14 = vpop.xlane.xlu1 %2834  ;;  %v2837_v54 = vpop.xlane.xlu0 %2836 }
 0xd94   :  { %v2852_v28 = vmax.f32 %v2848_v0, 0.0  ;;  %v2841_v6 = vmul.f32 0.0078125, %v2835_v14  ;;  %v2842_v36 = vmul.f32 0.0078125, %v2837_v54  ;;  %5114 = vmatpush3.bf16.msra.mxu0 %v5362_v63 }
 0xd96   :  { %v2860_v13 = vadd.f32 1e-05, %v2852_v28  ;;  %v2849_v34 = vsub.f32 %v2841_v6, %v2845_v41  ;;  %v2850_v12 = vsub.f32 %v2842_v36, %v2846_v21 }
 0xd97   :  { %v2839_v16 = vpop.xlane.xlu1 %2838 }
 0xd98   :  { %5547 = vrsqrt.f32 %v2860_v13  ;;  %v2853_v56 = vmax.f32 %v2849_v34, 0.0  ;;  %v2854_v59 = vmax.f32 %v2850_v12, 0.0  ;;  %v2843_v52 = vmul.f32 0.0078125, %v2839_v16  ;;  %v4576_v12 = vld [vmem:[#allocation8 + $0x11] ss:$0 sm:$0xff] }
 0xd9a   :  { %v2861_v60 = vadd.f32 1e-05, %v2853_v56  ;;  %v2862_v1 = vadd.f32 1e-05, %v2854_v59  ;;  %v2851_v27 = vsub.f32 %v2843_v52, %v2847_v51 }
 0xd9c   :  { %5549 = vrsqrt.f32 %v2861_v60  ;;  %v2855_v29 = vmax.f32 %v2851_v27, 0.0 }
 0xd9d   :  { %5551 = vrsqrt.f32 %v2862_v1 }
 0xd9e   :  { %v2863_v47 = vadd.f32 1e-05, %v2855_v29 }
 0xda0   :  { %5553 = vrsqrt.f32 %v2863_v47 }
 0xda5   :  { %v5548_v17 = vpop.eup %5547 }
 0xda6   :  { %v2868_v58 = vmul.f32 %v5548_v17, %v2856_v24 }
 0xda8   :  { %v2876_v53 = vmul.f32 %v4565_v7, %v2868_v58 }
 0xda9   :  { %v5550_v5 = vpop.eup %5549 }
 0xdaa   :  { %v5552_v18 = vpop.eup %5551  ;;  %v2869_v33 = vmul.f32 %v5550_v5, %v2857_v19  ;;  %v2884_v62 = vadd.f32 %v4566_v46, %v2876_v53 }
 0xdab   :  { %v2870_v61 = vmul.f32 %v5552_v18, %v2858_v4 }
 0xdac   :  { %v2877_v26 = vmul.f32 %v4565_v7, %v2869_v33 }
 0xdad   :  { %v5554_v3 = vpop.eup %5553  ;;  %v2878_v35 = vmul.f32 %v4565_v7, %v2870_v61 }
 0xdae   :  { %v2885_v44 = vadd.f32 %v4566_v46, %v2877_v26  ;;  %v2871_v38 = vmul.f32 %v5554_v3, %v2859_v55 }
 0xdaf   :  { %v2886_v20 = vadd.f32 %v4566_v46, %v2878_v35 }
 0xdb0   :  { %v2904_v42 = vpack.c.bf16 %v2885_v44, %v2884_v62  ;;  %v2879_v23 = vmul.f32 %v4565_v7, %v2871_v38 }
 0xdb2   :  { %5095 = vmatprep.mubr.bf16.mxu1 %v2904_v42  ;;  %v2887_v31 = vadd.f32 %v4566_v46, %v2879_v23 }
 0xdb4   :  { %v2905_v50 = vpack.c.bf16 %v2887_v31, %v2886_v20 }
 0xdb6   :  { %5096 = vmatmul.mubr.bf16.vlgmr.msra.gmra.mxu1 %v2905_v50 }
 0xdb7   :  { %3486 = vmatprep.mubr.bf16.mxu1 %v5759_v2 }
 0xe76   :  { %v5097_v9 = vpop.f32.mrf.mxu1 }
 0xe77   :  { %v3002_v21 = vadd.f32 %v5097_v9, %v4567_v10 }
 0xe78   :  { %v2993_v25 = vpop.f32.mrf.mxu1 }
 0xe79   :  { %v2994_v22 = vadd.f32 %v4567_v10, %v2993_v25  ;;  %v3010_v6 = vmax.f32 %v3002_v21, 0.0 }
 0xe7a   :  { %v5098_v11 = vpop.f32.mrf.mxu1 }
 0xe7b   :  { %v3005_v0 = vadd.f32 %v5098_v11, %v4567_v10  ;;  %v3008_v41 = vmax.f32 %v2994_v22, 0.0 }
 0xe7c   :  { %v2996_v49 = vpop.f32.mrf.mxu1 }
 0xe7d   :  { %v2997_v14 = vadd.f32 %v4567_v10, %v2996_v49  ;;  %v3011_v54 = vmax.f32 %v3005_v0, 0.0 }
 0xe7f   :  { %v3009_v28 = vmax.f32 %v2997_v14, 0.0  ;;  %v3029_v13 = vpack.c.bf16 %v3011_v54, %v3010_v6  ;;  %v4585_v6 = vld [vmem:[#allocation8 + $0x12] ss:$0 sm:$0xff] }
 0xe81   :  { %v3028_v36 = vpack.c.bf16 %v3009_v28, %v3008_v41 }
 0xe83   :  { %5115 = vmatprep.mubr.bf16.mxu0 %v3028_v36 }
 0xe84   :  { %5116 = vmatmul.mubr.bf16.vlgmr.msra.gmra.mxu0 %v3029_v13  ;;  %v4586_v13 = vld [vmem:[#allocation8 + $0x13] ss:$0 sm:$0xff] }
 0xf44   :  { %v5117_v34 = vpop.f32.mrf.mxu0 }
 0xf45   :  { %v3126_v1 = vadd.f32 %v5117_v34, %v4576_v12 }
 0xf46   :  { %v3117_v51 = vpop.f32.mrf.mxu0 }
 0xf47   :  { %v3118_v16 = vadd.f32 %v4576_v12, %v3117_v51  ;;  %v6526_v47 = vadd.f32 %v3126_v1, %v2886_v20 }
 0xf48   :  { %v5118_v56 = vpop.f32.mrf.mxu0 }
 0xf49   :  { %v3132_v59 = vadd.f32 %v3118_v16, %v2884_v62  ;;  %v3129_v24 = vadd.f32 %v5118_v56, %v4576_v12  ;;  %v3152_v7 = vmul.f32 %v6526_v47, %v6526_v47  ;;  %v3210_v56 = vadd.f32 %v6423_v45, %v6462_v39 }
 0xf4a   :  { %v3120_v52 = vpop.f32.mrf.mxu0 }
 0xf4b   :  { %v3121_v60 = vadd.f32 %v4576_v12, %v3120_v52  ;;  %3138 = vadd.xlane.f32.xlu0 %v3132_v59  ;;  %v3150_v29 = vmul.f32 %v3132_v59, %v3132_v59  ;;  %v6529_v58 = vadd.f32 %v3129_v24, %v2887_v31 }
 0xf4d   :  { %v3133_v27 = vadd.f32 %v3121_v60, %v2885_v44  ;;  %v3153_v19 = vmul.f32 %v6529_v58, %v6529_v58 }
 0xf4f   :  { %3140 = vadd.xlane.f32.xlu1 %v3133_v27  ;;  %3154 = vadd.xlane.f32.xlu0 %v3150_v29  ;;  %v3151_v17 = vmul.f32 %v3133_v27, %v3133_v27 }
 0xf53   :  { %3156 = vadd.xlane.f32.xlu1 %v3151_v17  ;;  %3142 = vadd.xlane.f32.xlu0 %v6526_v47 }
 0xf57   :  { %3144 = vadd.xlane.f32.xlu1 %v6529_v58  ;;  %3158 = vadd.xlane.f32.xlu0 %v3152_v7 }
 0xf5b   :  { %3160 = vadd.xlane.f32.xlu1 %v3153_v19 }
 0xfd4   :  { %v3139_v5 = vpop.xlane.xlu0 %3138 }
 0xfd5   :  { %v3146_v4 = vmul.f32 0.0078125, %v3139_v5 }
 0xfd7   :  { %v3166_v53 = vmul.f32 %v3146_v4, %v3146_v4  ;;  %v3178_v41 = vsub.f32 %v3132_v59, %v3146_v4 }
 0xfd8   :  { %v3141_v18 = vpop.xlane.xlu1 %3140  ;;  %v3155_v33 = vpop.xlane.xlu0 %3154 }
 0xfd9   :  { %v3147_v46 = vmul.f32 0.0078125, %v3141_v18  ;;  %v3162_v61 = vmul.f32 0.0078125, %v3155_v33  ;;  %v3212_v18 = vadd.f32 %v6442_v57, %v6471_v15 }
 0xfdb   :  { %v3170_v55 = vsub.f32 %v3162_v61, %v3166_v53  ;;  %v3167_v62 = vmul.f32 %v3147_v46, %v3147_v46  ;;  %v3179_v34 = vsub.f32 %v3133_v27, %v3147_v46  ;;  %v3211_v27 = vadd.f32 %v6431_v37, %v6464_v8 }
 0xfdc   :  { %v3157_v26 = vpop.xlane.xlu1 %3156  ;;  %v3143_v3 = vpop.xlane.xlu0 %3142  ;;  %v3213_v61 = vadd.f32 %v6447_v40, %v6473_v30  ;;  %v5371_v30 = vld [vmem:[#allocation6 + $0x304] ss:$72 sps:$4 sm:$0xff]  }
 0xfdd   :  { %v3174_v44 = vmax.f32 %v3170_v55, 0.0  ;;  %v3163_v38 = vmul.f32 0.0078125, %v3157_v26  ;;  %v3148_v35 = vmul.f32 0.0078125, %v3143_v3  ;;  %v5365_v3 = vld [vmem:[#allocation6 + $0x424] ss:$72 sps:$4 sm:$0xff]  }
 0xfde   :  { %3454 = vmatprep.subr.bf16.mxu1 %v5365_v3 }
 0xfdf   :  { %v3182_v42 = vadd.f32 1e-05, %v3174_v44  ;;  %v3171_v23 = vsub.f32 %v3163_v38, %v3167_v62  ;;  %v3168_v20 = vmul.f32 %v3148_v35, %v3148_v35  ;;  %v3180_v60 = vsub.f32 %v6526_v47, %v3148_v35  ;;  %v5363_v62 = vld [vmem:[#allocation6 + $0x420] ss:$72 sps:$4 sm:$0xff]   ;;  %v5368_v44 = vld [vmem:[#allocation6 + $0x394] ss:$72 sps:$4 sm:$0xff]  }
 0xfe0   :  { %v3145_v31 = vpop.xlane.xlu1 %3144  ;;  %v3159_v50 = vpop.xlane.xlu0 %3158  ;;  %3455 = vmatpush1.bf16.msra.mxu1 %v5363_v62  ;;  %v5366_v38 = vld [vmem:[#allocation6 + $0x390] ss:$72 sps:$4 sm:$0xff]  }
 0xfe1   :  { %5555 = vrsqrt.f32 %v3182_v42  ;;  %v3175_v32 = vmax.f32 %v3171_v23, 0.0  ;;  %v3149_v48 = vmul.f32 0.0078125, %v3145_v31  ;;  %v3164_v63 = vmul.f32 0.0078125, %v3159_v50  ;;  %3456 = vmatprep.subr.bf16.mxu1 %v5368_v44  ;;  %v5372_v35 = vld [vmem:[#allocation6 + $0x428] ss:$72 sps:$4 sm:$0xff]  }
 0xfe2   :  { %v5369_v42 = vld [vmem:[#allocation6 + $0x300] ss:$72 sps:$4 sm:$0xff]   ;;  %5119 = vmatprep.subr.bf16.mxu0 %v5372_v35  ;;  %v5375_v23 = vld [vmem:[#allocation6 + $0x274] ss:$72 sps:$4 sm:$0xff]   ;;  %v5373_v31 = vld [vmem:[#allocation6 + $0x270] ss:$72 sps:$4 sm:$0xff]  }
 0xfe3   :  { %v3183_v9 = vadd.f32 1e-05, %v3175_v32  ;;  %v3172_v25 = vsub.f32 %v3164_v63, %v3168_v20  ;;  %v3169_v11 = vmul.f32 %v3149_v48, %v3149_v48  ;;  %v3181_v7 = vsub.f32 %v6529_v58, %v3149_v48  ;;  %5120 = vmatpush3.bf16.msra.mxu0 %v5372_v35  ;;  %v5376_v20 = vld [vmem:[#allocation6 + $0x398] ss:$72 sps:$4 sm:$0xff]   ;;  %v5379_v50 = vld [vmem:[#allocation6 + $0x1e4] ss:$72 sps:$4 sm:$0xff]  }
 0xfe4   :  { %v3161_v10 = vpop.xlane.xlu1 %3160  ;;  %3457 = vmatpush1.bf16.msra.mxu1 %v5366_v38  ;;  %5121 = vmatprep.subr.bf16.mxu0 %v5376_v20  ;;  %v5380_v32 = vld [vmem:[#allocation6 + $0x308] ss:$72 sps:$4 sm:$0xff]  }
 0xfe5   :  { %5557 = vrsqrt.f32 %v3183_v9  ;;  %v3176_v22 = vmax.f32 %v3172_v25, 0.0  ;;  %v3165_v0 = vmul.f32 0.0078125, %v3161_v10  ;;  %3458 = vmatprep.subr.bf16.mxu1 %v5371_v30  ;;  %v5377_v48 = vld [vmem:[#allocation6 + $0x1e0] ss:$72 sps:$4 sm:$0xff]   ;;  %v5381_v63 = vld [vmem:[#allocation6 + $0x150] ss:$72 sps:$4 sm:$0xff]  }
 0xfe6   :  { %v5383_v9 = vld [vmem:[#allocation6 + $0x154] ss:$72 sps:$4 sm:$0xff]   ;;  %v5384_v25 = vld [vmem:[#allocation6 + $0x278] ss:$72 sps:$4 sm:$0xff]   ;;  %v5387_v10 = vld [vmem:[#allocation6 + $0xc4] ss:$72 sps:$4 sm:$0xff]  }
 0xfe7   :  { %v3184_v21 = vadd.f32 1e-05, %v3176_v22  ;;  %v3173_v49 = vsub.f32 %v3165_v0, %v3169_v11  ;;  %5122 = vmatpush3.bf16.msra.mxu0 %v5376_v20  ;;  %v5388_v11 = vld [vmem:[#allocation6 + $0x1e8] ss:$72 sps:$4 sm:$0xff]   ;;  %v5391_v0 = vld [vmem:[#allocation6 + $0x34] ss:$72 sps:$4 sm:$0xff]  }
 0xfe8   :  { %3459 = vmatpush1.bf16.msra.mxu1 %v5369_v42  ;;  %5123 = vmatprep.subr.bf16.mxu0 %v5380_v32  ;;  %v5385_v22 = vld [vmem:[#allocation6 + $0xc0] ss:$72 sps:$4 sm:$0xff]  }
 0xfe9   :  { %5559 = vrsqrt.f32 %v3184_v21  ;;  %v3177_v14 = vmax.f32 %v3173_v49, 0.0  ;;  %3460 = vmatprep.subr.bf16.mxu1 %v5375_v23  ;;  %v5392_v21 = vld [vmem:[#allocation6 + $0x158] ss:$72 sps:$4 sm:$0xff]  }
 0xfea   :  { %v5389_v49 = vld [vmem:[#allocation6 + $0x30] ss:$72 sps:$4 sm:$0xff]  }
 0xfeb   :  { %v3185_v54 = vadd.f32 1e-05, %v3177_v14  ;;  %5124 = vmatpush3.bf16.msra.mxu0 %v5380_v32  ;;  %v5393_v14 = vld [vmem:[#allocation6 + $0xc8] ss:$72 sps:$4 sm:$0xff]  }
 0xfec   :  { %3461 = vmatpush1.bf16.msra.mxu1 %v5373_v31  ;;  %5125 = vmatprep.subr.bf16.mxu0 %v5384_v25  ;;  %v4587_v31 = vld [vmem:[#allocation8 + $0x20] ss:$0 sm:$0xff] }
 0xfed   :  { %5561 = vrsqrt.f32 %v3185_v54  ;;  %3462 = vmatprep.subr.bf16.mxu1 %v5379_v50  ;;  %v5394_v54 = vld [vmem:[#allocation6 + $0x38] ss:$72 sps:$4 sm:$0xff]  }
 0xfee   :  { %v5556_v28 = vpop.eup %5555 }
 0xfef   :  { %v3190_v36 = vmul.f32 %v5556_v28, %v3178_v41  ;;  %5126 = vmatpush3.bf16.msra.mxu0 %v5384_v25 }
 0xff0   :  { %3463 = vmatpush1.bf16.msra.mxu1 %v5377_v48  ;;  %5127 = vmatprep.subr.bf16.mxu0 %v5388_v11 }
 0xff1   :  { %v3198_v12 = vmul.f32 %v4585_v6, %v3190_v36  ;;  %3464 = vmatprep.subr.bf16.mxu1 %v5383_v9  ;;  %v4588_v9 = vld [vmem:[#allocation8 + $0x21] ss:$0 sm:$0xff] }
 0xff2   :  { %v5558_v51 = vpop.eup %5557 }
 0xff3   :  { %v6536_v16 = vadd.f32 %v4586_v13, %v3198_v12  ;;  %v3191_v52 = vmul.f32 %v5558_v51, %v3179_v34  ;;  %5128 = vmatpush3.bf16.msra.mxu0 %v5388_v11 }
 0xff4   :  { %3465 = vmatpush1.bf16.msra.mxu1 %v5381_v63  ;;  %5129 = vmatprep.subr.bf16.mxu0 %v5392_v21 }
 0xff5   :  { %v6542_v1 = vadd.f32 %v3210_v56, %v6536_v16  ;;  %v3199_v59 = vmul.f32 %v4585_v6, %v3191_v52  ;;  %3466 = vmatprep.subr.bf16.mxu1 %v5387_v10 }
 0xff6   :  { %v5560_v29 = vpop.eup %5559 }
 0xff7   :  { %3220 = vadd.xlane.f32.xlu0 %v6542_v1  ;;  %v6545_v24 = vadd.f32 %v4586_v13, %v3199_v59  ;;  %v3192_v17 = vmul.f32 %v5560_v29, %v3180_v60  ;;  %v3232_v47 = vmul.f32 %v6542_v1, %v6542_v1  ;;  %5130 = vmatpush3.bf16.msra.mxu0 %v5392_v21 }
 0xff8   :  { %3467 = vmatpush1.bf16.msra.mxu1 %v5385_v22  ;;  %5131 = vmatprep.subr.bf16.mxu0 %v5393_v14 }
 0xff9   :  { %v6551_v39 = vadd.f32 %v3211_v27, %v6545_v24  ;;  %v3200_v19 = vmul.f32 %v4585_v6, %v3192_v17  ;;  %3468 = vmatprep.subr.bf16.mxu1 %v5391_v0 }
 0xffa   :  { %v5562_v5 = vpop.eup %5561 }
 0xffb   :  { %3222 = vadd.xlane.f32.xlu1 %v6551_v39  ;;  %3236 = vadd.xlane.f32.xlu0 %v3232_v47  ;;  %v6556_v4 = vadd.f32 %v4586_v13, %v3200_v19  ;;  %v3193_v8 = vmul.f32 %v5562_v5, %v3181_v7  ;;  %v3233_v58 = vmul.f32 %v6551_v39, %v6551_v39 }
 0xffc   :  { %3469 = vmatpush1.bf16.msra.mxu1 %v5389_v49  ;;  %5132 = vmatpush3.bf16.msra.mxu0 %v5393_v14 }
 0xffd   :  { %v6563_v33 = vadd.f32 %v3212_v18, %v6556_v4  ;;  %v3201_v53 = vmul.f32 %v4585_v6, %v3193_v8  ;;  %5139 = vmatprep.subr.bf16.mxu1 %v5760_v43  ;;  %5133 = vmatprep.subr.bf16.mxu0 %v5394_v54 }
 0xfff   :  { %3238 = vadd.xlane.f32.xlu1 %v3233_v58  ;;  %3224 = vadd.xlane.f32.xlu0 %v6563_v33  ;;  %v6566_v46 = vadd.f32 %v4586_v13, %v3201_v53  ;;  %v3234_v15 = vmul.f32 %v6563_v33, %v6563_v33 }
0x1000   :  { %5134 = vmatpush3.bf16.msra.mxu0 %v5394_v54 }
0x1001   :  { %v6571_v55 = vadd.f32 %v3213_v61, %v6566_v46  ;;  %5157 = vmatprep.subr.bf16.mxu0 %v5760_v43 }
0x1003   :  { %3226 = vadd.xlane.f32.xlu1 %v6571_v55  ;;  %3240 = vadd.xlane.f32.xlu0 %v3234_v15  ;;  %v3235_v26 = vmul.f32 %v6571_v55, %v6571_v55 }
0x1007   :  { %3242 = vadd.xlane.f32.xlu1 %v3235_v26 }
0x1080   :  { %v3221_v41 = vpop.xlane.xlu0 %3220 }
0x1081   :  { %v3228_v28 = vmul.f32 0.0078125, %v3221_v41 }
0x1083   :  { %v3248_v13 = vmul.f32 %v3228_v28, %v3228_v28  ;;  %v3260_v42 = vsub.f32 %v6542_v1, %v3228_v28 }
0x1084   :  { %v3223_v6 = vpop.xlane.xlu1 %3222  ;;  %v3237_v36 = vpop.xlane.xlu0 %3236 }
0x1085   :  { %v3229_v34 = vmul.f32 0.0078125, %v3223_v6  ;;  %v3244_v12 = vmul.f32 0.0078125, %v3237_v36 }
0x1087   :  { %v3252_v51 = vsub.f32 %v3244_v12, %v3248_v13  ;;  %v3249_v60 = vmul.f32 %v3229_v34, %v3229_v34  ;;  %v3261_v50 = vsub.f32 %v6551_v39, %v3229_v34  ;;  %v4614_v13 = vld [vmem:[#allocation8 + $0x15] ss:$0 sm:$0xff] }
0x1088   :  { %v3239_v56 = vpop.xlane.xlu1 %3238  ;;  %v3225_v52 = vpop.xlane.xlu0 %3224 }
0x1089   :  { %v3256_v59 = vmax.f32 %v3252_v51, 0.0  ;;  %v3245_v29 = vmul.f32 0.0078125, %v3239_v56  ;;  %v3230_v27 = vmul.f32 0.0078125, %v3225_v52 }
0x108b   :  { %v3264_v17 = vadd.f32 1e-05, %v3256_v59  ;;  %v3253_v7 = vsub.f32 %v3245_v29, %v3249_v60  ;;  %v3250_v47 = vmul.f32 %v3230_v27, %v3230_v27  ;;  %v3262_v25 = vsub.f32 %v6563_v33, %v3230_v27  ;;  %v4615_v59 = vld [vmem:[#allocation8 + $0x16] ss:$0 sm:$0xff] }
0x108c   :  { %v3227_v19 = vpop.xlane.xlu1 %3226  ;;  %v3241_v5 = vpop.xlane.xlu0 %3240 }
0x108d   :  { %5563 = vrsqrt.f32 %v3264_v17  ;;  %v3257_v18 = vmax.f32 %v3253_v7, 0.0  ;;  %v3231_v8 = vmul.f32 0.0078125, %v3227_v19  ;;  %v3246_v58 = vmul.f32 0.0078125, %v3241_v5  ;;  %v4613_v17 = vld [vmem:[#allocation8 + $0x14] ss:$0 sm:$0xff] }
0x108f   :  { %v3265_v53 = vadd.f32 1e-05, %v3257_v18  ;;  %v3254_v61 = vsub.f32 %v3246_v58, %v3250_v47  ;;  %v3251_v26 = vmul.f32 %v3231_v8, %v3231_v8  ;;  %v3263_v1 = vsub.f32 %v6571_v55, %v3231_v8 }
0x1090   :  { %v3243_v15 = vpop.xlane.xlu1 %3242 }
0x1091   :  { %5565 = vrsqrt.f32 %v3265_v53  ;;  %v3258_v3 = vmax.f32 %v3254_v61, 0.0  ;;  %v3247_v62 = vmul.f32 0.0078125, %v3243_v15 }
0x1093   :  { %v3266_v44 = vadd.f32 1e-05, %v3258_v3  ;;  %v3255_v38 = vsub.f32 %v3247_v62, %v3251_v26 }
0x1095   :  { %5567 = vrsqrt.f32 %v3266_v44  ;;  %v3259_v30 = vmax.f32 %v3255_v38, 0.0 }
0x1097   :  { %v3267_v35 = vadd.f32 1e-05, %v3259_v30 }
0x1099   :  { %5569 = vrsqrt.f32 %v3267_v35 }
0x109a   :  { %v5564_v23 = vpop.eup %5563 }
0x109b   :  { %v3272_v20 = vmul.f32 %v5564_v23, %v3260_v42 }
0x109d   :  { %v3280_v63 = vmul.f32 %v4587_v31, %v3272_v20 }
0x109e   :  { %v5566_v32 = vpop.eup %5565 }
0x109f   :  { %v3273_v48 = vmul.f32 %v5566_v32, %v3261_v50  ;;  %v6583_v22 = vadd.f32 %v4588_v9, %v3280_v63 }
0x10a1   :  { %v3281_v10 = vmul.f32 %v4587_v31, %v3273_v48 }
0x10a2   :  { %v5568_v11 = vpop.eup %5567 }
0x10a3   :  { %v6585_v0 = vadd.f32 %v4588_v9, %v3281_v10  ;;  %v3274_v21 = vmul.f32 %v5568_v11, %v3262_v25 }
0x10a5   :  { %v3292_v49 = vpack.c.bf16 %v6585_v0, %v6583_v22  ;;  %v3282_v54 = vmul.f32 %v4587_v31, %v3274_v21 }
0x10a6   :  { %v5570_v14 = vpop.eup %5569 }
0x10a7   :  { %3487 = vmatmul.mubr.bf16.vlgmr.msra.gmra.mxu1 %v3292_v49  ;;  %5135 = vmatprep.mubr.bf16.mxu0 %v3292_v49  ;;  %v3275_v39 = vmul.f32 %v5570_v14, %v3263_v1  ;;  %v6591_v41 = vadd.f32 %v4588_v9, %v3282_v54 }
0x10a8   :  { %3496 = vmatprep.mubr.bf16.mxu1 %v5759_v2 }
0x10a9   :  { %v3283_v33 = vmul.f32 %v4587_v31, %v3275_v39 }
0x10ab   :  { %v6593_v28 = vadd.f32 %v4588_v9, %v3283_v33 }
0x10ad   :  { %v3293_v6 = vpack.c.bf16 %v6593_v28, %v6591_v41 }
0x10af   :  { %3497 = vmatmul.mubr.bf16.gmra.mxu1 %v3293_v6  ;;  %5136 = vmatmul.mubr.bf16.vlgmr.msra.gmra.mxu0 %v3293_v6 }
0x10b0   :  { %5141 = vmatprep.mubr.msk.bf16.mxu1 %vm5761_vm0, %v5760_v43  ;;  %5159 = vmatprep.mubr.msk.bf16.mxu0 %vm5761_vm0, %v5760_v43 }
0x1167   :  { %v3488_v55 = vpop.f32.mrf.mxu1 }
0x1168   :  { %v3561_v8 = vadd.f32 %v4613_v17, %v3488_v55 }
0x1169   :  { %v3490_v36 = vpop.f32.mrf.mxu1 }
0x116a   :  { %v3572_v12 = vadd.f32 %v4614_v13, %v3490_v36 }
0x116b   :  { %v3492_v2 = vpop.f32.mrf.mxu1 }
0x116c   :  { %v3562_v7 = vadd.f32 %v4613_v17, %v3492_v2 }
0x116d   :  { %v3494_v34 = vpop.f32.mrf.mxu1 }
0x116e   :  { %v3573_v51 = vadd.f32 %v4614_v13, %v3494_v34  ;;  %v3565_v26 = vpack.c.bf16 %v3562_v7, %v3561_v8 }
0x116f   :  { %v3498_v56 = vpop.f32.mrf.mxu1  ;;  %v5137_v52 = vpop.f32.mrf.mxu0 }
0x1170   :  { %v3576_v60 = vpack.c.bf16 %v3573_v51, %v3572_v12  ;;  %v3585_v5 = vadd.f32 %v5137_v52, %v4615_v59  ;;  %v3563_v30 = vadd.f32 %v4613_v17, %v3498_v56 }
0x1171   :  { %v3500_v29 = vpop.f32.mrf.mxu1  ;;  %v3541_v27 = vpop.f32.mrf.mxu0 }
0x1172   :  { %5140 = vmatpush3.bf16.xpose.msra.mxu1 %v3576_v60  ;;  %v3574_v53 = vadd.f32 %v4614_v13, %v3500_v29  ;;  %v3583_v35 = vadd.f32 %v4615_v59, %v3541_v27 }
0x1173   :  { %v3502_v47 = vpop.f32.mrf.mxu1  ;;  %v5138_v19 = vpop.f32.mrf.mxu0  ;;  %5145 = vmatprep.subr.bf16.mxu1 %v5760_v43 }
0x1174   :  { %v3586_v18 = vadd.f32 %v5138_v19, %v4615_v59  ;;  %v3564_v44 = vadd.f32 %v4613_v17, %v3502_v47  ;;  %v5395_v17 = vld [vmem:[#allocation6 + $0x42c] ss:$72 sps:$4 sm:$0xff]  }
0x1175   :  { %v3504_v58 = vpop.f32.mrf.mxu1  ;;  %v3544_v62 = vpop.f32.mrf.mxu0 }
0x1176   :  { %v3588_v61 = vpack.c.bf16 %v3586_v18, %v3585_v5  ;;  %v3575_v15 = vadd.f32 %v4614_v13, %v3504_v58  ;;  %v3584_v38 = vadd.f32 %v4615_v59, %v3544_v62  ;;  %v3566_v42 = vpack.c.bf16 %v3564_v44, %v3563_v30 }
0x1178   :  { %v3577_v3 = vpack.c.bf16 %v3575_v15, %v3574_v53  ;;  %5158 = vmatpush3.bf16.msra.mxu0 %v3588_v61  ;;  %v3587_v23 = vpack.c.bf16 %v3584_v38, %v3583_v35  ;;  %v5396_v15 = vld [vmem:[#allocation6 + $0x39c] ss:$72 sps:$4 sm:$0xff]  }
0x1179   :  { %5142 = vmatmul.mubr.bf16.vlgmr.msra.gmra.mxu1 %v3565_v26  ;;  %v5398_v35 = vld [vmem:[#allocation6 + $0x27c] ss:$72 sps:$4 sm:$0xff]  }
0x117a   :  { %5146 = vmatpush3.bf16.xpose.msra.mxu1 %v3577_v3  ;;  %5147 = vmatprep.mubr.msk.bf16.mxu1 %vm5761_vm0, %v5760_v43  ;;  %v5397_v3 = vld [vmem:[#allocation6 + $0x30c] ss:$72 sps:$4 sm:$0xff]  }
0x117b   :  { %5151 = vmatprep.subr.bf16.mxu1 %v5760_v43 }
0x1181   :  { %5148 = vmatmul.mubr.bf16.vlgmr.msra.gmra.mxu1 %v3566_v42  ;;  %v5399_v42 = vld [vmem:[#allocation6 + $0x1ec] ss:$72 sps:$4 sm:$0xff]  }
0x1182   :  { %5152 = vmatpush3.bf16.msra.mxu1 %v3587_v23  ;;  %5153 = vmatprep.mubr.msk.bf16.mxu1 %vm5761_vm0, %v5760_v43  ;;  %v5400_v23 = vld [vmem:[#allocation6 + $0x15c] ss:$72 sps:$4 sm:$0xff]  }
0x1183   :  { %5163 = vmatprep.subr.bf16.mxu1 %v5395_v17 }
0x1239   :  { %v3623_v20 = vpop.f32.mrf.mxu1 }
0x123a   :  { %v3671_v31 = vsel %vm740_vm1, %v3623_v20, -inf }
0x123b   :  { %3672 = vmax.xlane.f32.xlu0 %v3671_v31  ;;  %v5143_v50 = vpop.f32.mrf.mxu1  ;;  %v5402_v31 = vld [vmem:[#allocation6 + $0x3c] ss:$72 sps:$4 sm:$0xff]  }
0x123d   :  { %v3626_v32 = vpop.f32.mrf.mxu1 }
0x123e   :  { %v3674_v48 = vsel %vm740_vm1, %v3626_v32, -inf }
0x123f   :  { %3675 = vmax.xlane.f32.xlu1 %v3674_v48  ;;  %v5144_v63 = vpop.f32.mrf.mxu1 }
0x1241   :  { %v3664_v9 = vpop.f32.mrf.mxu1 }
0x1242   :  { %v3677_v25 = vsel %vm740_vm1, %v3664_v9, -inf }
0x1243   :  { %3678 = vmax.xlane.f32.xlu0 %v3677_v25  ;;  %v5149_v10 = vpop.f32.mrf.mxu1 }
0x1245   :  { %v3667_v11 = vpop.f32.mrf.mxu1 }
0x1246   :  { %v3680_v21 = vsel %vm740_vm1, %v3667_v11, -inf }
0x1247   :  { %3681 = vmax.xlane.f32.xlu1 %v3680_v21  ;;  %v5150_v43 = vpop.f32.mrf.mxu1 }
0x12c4   :  { %v3673_v1 = vpop.xlane.xlu0 %3672 }
0x12c5   :  { %v3683_v49 = vsub.f32 %v3623_v20, %v3673_v1  ;;  %v5401_v20 = vld [vmem:[#allocation6 + $0xcc] ss:$72 sps:$4 sm:$0xff]  }
0x12c6   :  { %v4618_v1 = vld [vmem:[#allocation8 + $0x17] ss:$0 sm:$0xff] }
0x12c7   :  { %v3687_v14 = vmul.f32 1.442695, %v3683_v49 }
0x12c8   :  { %v3676_v39 = vpop.xlane.xlu1 %3675 }
0x12c9   :  { %5571 = vpow2.f32 %v3687_v14  ;;  %v3684_v54 = vsub.f32 %v3626_v32, %v3676_v39 }
0x12cb   :  { %v3689_v33 = vmul.f32 1.442695, %v3684_v54 }
0x12cc   :  { %v3679_v6 = vpop.xlane.xlu0 %3678 }
0x12cd   :  { %5573 = vpow2.f32 %v3689_v33  ;;  %v3685_v55 = vsub.f32 %v3664_v9, %v3679_v6 }
0x12cf   :  { %v3691_v36 = vmul.f32 1.442695, %v3685_v55 }
0x12d0   :  { %v3682_v13 = vpop.xlane.xlu1 %3681 }
0x12d1   :  { %5575 = vpow2.f32 %v3691_v36  ;;  %v3686_v2 = vsub.f32 %v3667_v11, %v3682_v13 }
0x12d3   :  { %v3693_v34 = vmul.f32 1.442695, %v3686_v2 }
0x12d5   :  { %5577 = vpow2.f32 %v3693_v34 }
0x12d6   :  { %v5572_v12 = vpop.eup %5571 }
0x12d7   :  { %v3695_v51 = vsel %vm740_vm1, %v5572_v12, 0.0 }
0x12d8   :  { %3696 = vadd.xlane.f32.xlu0 %v3695_v51 }
0x12da   :  { %v5574_v56 = vpop.eup %5573 }
0x12db   :  { %v3698_v52 = vsel %vm740_vm1, %v5574_v56, 0.0 }
0x12dc   :  { %3699 = vadd.xlane.f32.xlu1 %v3698_v52 }
0x12de   :  { %v5576_v60 = vpop.eup %5575 }
0x12df   :  { %v3701_v59 = vsel %vm740_vm1, %v5576_v60, 0.0 }
0x12e0   :  { %3702 = vadd.xlane.f32.xlu0 %v3701_v59  ;;  %v5403_v59 = vld [vmem:[#allocation6 + $0x430] ss:$72 sps:$4 sm:$0xff]  }
0x12e1   :  { %5183 = vmatprep.subr.bf16.mxu0 %v5403_v59 }
0x12e2   :  { %v5578_v29 = vpop.eup %5577 }
0x12e3   :  { %v3704_v27 = vsel %vm740_vm1, %v5578_v29, 0.0 }
0x12e4   :  { %3705 = vadd.xlane.f32.xlu1 %v3704_v27  ;;  %v5405_v27 = vld [vmem:[#allocation6 + $0x310] ss:$72 sps:$4 sm:$0xff]  }
0x1361   :  { %v3697_v7 = vpop.xlane.xlu0 %3696 }
0x1362   :  { %5579 = vrcp.f32 %v3697_v7  ;;  %v5407_v7 = vld [vmem:[#allocation6 + $0x1f0] ss:$72 sps:$4 sm:$0xff]  }
0x1365   :  { %v3700_v47 = vpop.xlane.xlu1 %3699 }
0x1366   :  { %5581 = vrcp.f32 %v3700_v47  ;;  %v5408_v47 = vld [vmem:[#allocation6 + $0x160] ss:$72 sps:$4 sm:$0xff]  }
0x1369   :  { %v3703_v19 = vpop.xlane.xlu0 %3702 }
0x136a   :  { %5583 = vrcp.f32 %v3703_v19  ;;  %v5409_v19 = vld [vmem:[#allocation6 + $0xd0] ss:$72 sps:$4 sm:$0xff]  }
0x136d   :  { %v3706_v5 = vpop.xlane.xlu1 %3705 }
0x136e   :  { %5585 = vrcp.f32 %v3706_v5  ;;  %v5410_v5 = vld [vmem:[#allocation6 + $0x40] ss:$72 sps:$4 sm:$0xff]  }
0x136f   :  { %v5580_v18 = vpop.eup %5579 }
0x1370   :  { %v3711_v58 = vmul.f32 %v5580_v18, %v5572_v12  ;;  %v5411_v18 = vld [vmem:[#allocation6 + $0x434] ss:$72 sps:$4 sm:$0xff]  }
0x1373   :  { %v5582_v8 = vpop.eup %5581 }
0x1374   :  { %v3712_v53 = vmul.f32 %v5582_v8, %v5574_v56  ;;  %v5412_v8 = vld [vmem:[#allocation6 + $0x3a4] ss:$72 sps:$4 sm:$0xff]  }
0x1376   :  { %v3715_v61 = vpack.c.bf16 %v3712_v53, %v3711_v58  ;;  %v5413_v58 = vld [vmem:[#allocation6 + $0x314] ss:$72 sps:$4 sm:$0xff]   ;;  %v5414_v53 = vld [vmem:[#allocation6 + $0x284] ss:$72 sps:$4 sm:$0xff]  }
0x1377   :  { %v5584_v26 = vpop.eup %5583 }
0x1378   :  { %5154 = vmatmul.mubr.msk.bf16.vlgmr.msra.gmra.mxu1 %vm740_vm1, %v3715_v61  ;;  %v3713_v44 = vmul.f32 %v5584_v26, %v5576_v60  ;;  %v5415_v61 = vld [vmem:[#allocation6 + $0x1f4] ss:$72 sps:$4 sm:$0xff]  }
0x1379   :  { %5164 = vmatpush3.bf16.msra.mxu1 %v5395_v17  ;;  %v5406_v17 = vld [vmem:[#allocation6 + $0x280] ss:$72 sps:$4 sm:$0xff]  }
0x137a   :  { %5165 = vmatprep.subr.bf16.mxu1 %v5396_v15 }
0x137b   :  { %v5586_v62 = vpop.eup %5585 }
0x137c   :  { %v3714_v38 = vmul.f32 %v5586_v62, %v5578_v29  ;;  %v5404_v29 = vld [vmem:[#allocation6 + $0x3a0] ss:$72 sps:$4 sm:$0xff]  }
0x137d   :  { %5166 = vmatpush3.bf16.msra.mxu1 %v5396_v15 }
0x137e   :  { %v3716_v30 = vpack.c.bf16 %v3714_v38, %v3713_v44  ;;  %5167 = vmatprep.subr.bf16.mxu1 %v5397_v3 }
0x1380   :  { %5160 = vmatmul.mubr.msk.bf16.vlgmr.msra.gmra.mxu0 %vm740_vm1, %v3716_v30 }
0x1381   :  { %5168 = vmatpush3.bf16.msra.mxu1 %v5397_v3  ;;  %5184 = vmatpush3.bf16.msra.mxu0 %v5403_v59  ;;  %v4627_v59 = vld [vmem:[#allocation8 + $0x18] ss:$0 sm:$0xff] }
0x1382   :  { %5169 = vmatprep.subr.bf16.mxu1 %v5398_v35  ;;  %5185 = vmatprep.subr.bf16.mxu0 %v5404_v29 }
0x1385   :  { %5170 = vmatpush3.bf16.msra.mxu1 %v5398_v35  ;;  %5186 = vmatpush3.bf16.msra.mxu0 %v5404_v29 }
0x1386   :  { %5171 = vmatprep.subr.bf16.mxu1 %v5399_v42  ;;  %5187 = vmatprep.subr.bf16.mxu0 %v5405_v27 }
0x1389   :  { %5172 = vmatpush3.bf16.msra.mxu1 %v5399_v42  ;;  %5188 = vmatpush3.bf16.msra.mxu0 %v5405_v27 }
0x138a   :  { %5173 = vmatprep.subr.bf16.mxu1 %v5400_v23  ;;  %5189 = vmatprep.subr.bf16.mxu0 %v5406_v17 }
0x138d   :  { %5174 = vmatpush3.bf16.msra.mxu1 %v5400_v23  ;;  %5190 = vmatpush3.bf16.msra.mxu0 %v5406_v17 }
0x138e   :  { %5175 = vmatprep.subr.bf16.mxu1 %v5401_v20  ;;  %5191 = vmatprep.subr.bf16.mxu0 %v5407_v7 }
0x1391   :  { %5176 = vmatpush3.bf16.msra.mxu1 %v5401_v20  ;;  %5192 = vmatpush3.bf16.msra.mxu0 %v5407_v7 }
0x1392   :  { %5177 = vmatprep.subr.bf16.mxu1 %v5402_v31  ;;  %5193 = vmatprep.subr.bf16.mxu0 %v5408_v47 }
0x1395   :  { %5178 = vmatpush3.bf16.msra.mxu1 %v5402_v31  ;;  %5194 = vmatpush3.bf16.msra.mxu0 %v5408_v47 }
0x1396   :  { %5195 = vmatprep.subr.bf16.mxu0 %v5409_v19  ;;  %5203 = vmatprep.subr.bf16.mxu1 %v5411_v18 }
0x1399   :  { %5196 = vmatpush3.bf16.msra.mxu0 %v5409_v19 }
0x139a   :  { %5197 = vmatprep.subr.bf16.mxu0 %v5410_v5 }
0x139d   :  { %5198 = vmatpush3.bf16.msra.mxu0 %v5410_v5  ;;  %v4628_v5 = vld [vmem:[#allocation8 + $0x19] ss:$0 sm:$0xff] }
0x1438   :  { %v3754_v50 = vpop.f32.mrf.mxu1 }
0x143a   :  { %v5155_v32 = vpop.f32.mrf.mxu1 }
0x143c   :  { %v3757_v48 = vpop.f32.mrf.mxu1 }
0x143d   :  { %v3821_v63 = vpack.c.bf16 %v3757_v48, %v3754_v50 }
0x143e   :  { %v5156_v9 = vpop.f32.mrf.mxu1 }
0x143f   :  { %5179 = vmatprep.mubr.bf16.mxu1 %v3821_v63 }
0x1440   :  { %v3798_v25 = vpop.f32.mrf.mxu0 }
0x1442   :  { %v5161_v10 = vpop.f32.mrf.mxu0 }
0x1444   :  { %v3801_v11 = vpop.f32.mrf.mxu0 }
0x1445   :  { %v3822_v21 = vpack.c.bf16 %v3801_v11, %v3798_v25 }
0x1446   :  { %v5162_v43 = vpop.f32.mrf.mxu0 }
0x1447   :  { %5180 = vmatmul.mubr.bf16.vlgmr.msra.gmra.mxu1 %v3822_v21 }
0x1448   :  { %5204 = vmatpush3.bf16.msra.mxu1 %v5411_v18 }
0x1449   :  { %5205 = vmatprep.subr.bf16.mxu1 %v5412_v8 }
0x144c   :  { %5206 = vmatpush3.bf16.msra.mxu1 %v5412_v8 }
0x144d   :  { %5207 = vmatprep.subr.bf16.mxu1 %v5413_v58 }
0x1450   :  { %5208 = vmatpush3.bf16.msra.mxu1 %v5413_v58 }
0x1451   :  { %5209 = vmatprep.subr.bf16.mxu1 %v5414_v53 }
0x1454   :  { %5210 = vmatpush3.bf16.msra.mxu1 %v5414_v53 }
0x1455   :  { %5211 = vmatprep.subr.bf16.mxu1 %v5415_v61 }
0x1458   :  { %5212 = vmatpush3.bf16.msra.mxu1 %v5415_v61 }
0x1507   :  { %v5181_v49 = vpop.f32.mrf.mxu1 }
0x1508   :  { %v3919_v14 = vadd.f32 %v5181_v49, %v4618_v1 }
0x1509   :  { %v3910_v39 = vpop.f32.mrf.mxu1 }
0x150a   :  { %v6618_v54 = vadd.f32 %v3919_v14, %v6591_v41  ;;  %v3911_v33 = vadd.f32 %v4618_v1, %v3910_v39 }
0x150b   :  { %v5182_v6 = vpop.f32.mrf.mxu1 }
0x150c   :  { %v3922_v55 = vadd.f32 %v5182_v6, %v4618_v1  ;;  %3935 = vadd.xlane.f32.xlu0 %v6618_v54  ;;  %v6622_v13 = vadd.f32 %v3911_v33, %v6583_v22  ;;  %v3945_v52 = vmul.f32 %v6618_v54, %v6618_v54 }
0x150d   :  { %v3913_v36 = vpop.f32.mrf.mxu1 }
0x150e   :  { %v6625_v2 = vadd.f32 %v3922_v55, %v6593_v28  ;;  %v3914_v34 = vadd.f32 %v4618_v1, %v3913_v36  ;;  %v3943_v51 = vmul.f32 %v6622_v13, %v6622_v13 }
0x1510   :  { %3937 = vadd.xlane.f32.xlu1 %v6625_v2  ;;  %3931 = vadd.xlane.f32.xlu0 %v6622_v13  ;;  %v6630_v12 = vadd.f32 %v3914_v34, %v6585_v0  ;;  %v3946_v60 = vmul.f32 %v6625_v2, %v6625_v2 }
0x1512   :  { %v3944_v56 = vmul.f32 %v6630_v12, %v6630_v12 }
0x1514   :  { %3933 = vadd.xlane.f32.xlu1 %v6630_v12  ;;  %3947 = vadd.xlane.f32.xlu0 %v3943_v51 }
0x1518   :  { %3949 = vadd.xlane.f32.xlu1 %v3944_v56  ;;  %3951 = vadd.xlane.f32.xlu0 %v3945_v52 }
0x151c   :  { %3953 = vadd.xlane.f32.xlu1 %v3946_v60 }
0x1595   :  { %v3936_v15 = vpop.xlane.xlu0 %3935 }
0x1596   :  { %v3941_v44 = vmul.f32 0.0078125, %v3936_v15 }
0x1598   :  { %v3961_v31 = vmul.f32 %v3941_v44, %v3941_v44  ;;  %v3973_v17 = vsub.f32 %v6618_v54, %v3941_v44  ;;  %v5416_v54 = vld [vmem:[#allocation6 + $0x164] ss:$72 sps:$4 sm:$0xff]   ;;  %v5417_v44 = vld [vmem:[#allocation6 + $0xd4] ss:$72 sps:$4 sm:$0xff]  }
0x1599   :  { %v3938_v26 = vpop.xlane.xlu1 %3937  ;;  %v3932_v3 = vpop.xlane.xlu0 %3931  ;;  %5213 = vmatprep.subr.bf16.mxu1 %v5416_v54 }
0x159a   :  { %v3939_v62 = vmul.f32 0.0078125, %v3932_v3  ;;  %v3942_v50 = vmul.f32 0.0078125, %v3938_v26  ;;  %5214 = vmatpush3.bf16.msra.mxu1 %v5416_v54 }
0x159b   :  { %5215 = vmatprep.subr.bf16.mxu1 %v5417_v44 }
0x159c   :  { %v3959_v35 = vmul.f32 %v3939_v62, %v3939_v62  ;;  %v3962_v1 = vmul.f32 %v3942_v50, %v3942_v50  ;;  %v3971_v56 = vsub.f32 %v6622_v13, %v3939_v62  ;;  %v3974_v8 = vsub.f32 %v6625_v2, %v3942_v50  ;;  %v5418_v2 = vld [vmem:[#allocation6 + $0x44] ss:$72 sps:$4 sm:$0xff]  }
0x159d   :  { %v3934_v38 = vpop.xlane.xlu1 %3933  ;;  %v3948_v30 = vpop.xlane.xlu0 %3947 }
0x159e   :  { %v3940_v42 = vmul.f32 0.0078125, %v3934_v38  ;;  %v3955_v23 = vmul.f32 0.0078125, %v3948_v30  ;;  %5216 = vmatpush3.bf16.msra.mxu1 %v5417_v44 }
0x159f   :  { %5217 = vmatprep.subr.bf16.mxu1 %v5418_v2 }
0x15a0   :  { %v3963_v20 = vsub.f32 %v3955_v23, %v3959_v35  ;;  %v3960_v63 = vmul.f32 %v3940_v42, %v3940_v42  ;;  %v3972_v29 = vsub.f32 %v6630_v12, %v3940_v42  ;;  %v4629_v23 = vld [vmem:[#allocation8 + $0x1a] ss:$0 sm:$0xff] }
0x15a1   :  { %v3950_v32 = vpop.xlane.xlu1 %3949  ;;  %v3952_v48 = vpop.xlane.xlu0 %3951 }
0x15a2   :  { %v3967_v9 = vmax.f32 %v3963_v20, 0.0  ;;  %v3956_v25 = vmul.f32 0.0078125, %v3950_v32  ;;  %v3957_v10 = vmul.f32 0.0078125, %v3952_v48  ;;  %5218 = vmatpush3.bf16.msra.mxu1 %v5418_v2 }
0x15a4   :  { %v3975_v11 = vadd.f32 1e-05, %v3967_v9  ;;  %v3964_v21 = vsub.f32 %v3956_v25, %v3960_v63  ;;  %v3965_v43 = vsub.f32 %v3957_v10, %v3961_v31 }
0x15a5   :  { %v3954_v49 = vpop.xlane.xlu1 %3953 }
0x15a6   :  { %5587 = vrsqrt.f32 %v3975_v11  ;;  %v3968_v14 = vmax.f32 %v3964_v21, 0.0  ;;  %v3969_v39 = vmax.f32 %v3965_v43, 0.0  ;;  %v3958_v33 = vmul.f32 0.0078125, %v3954_v49 }
0x15a8   :  { %v3976_v6 = vadd.f32 1e-05, %v3968_v14  ;;  %v3977_v55 = vadd.f32 1e-05, %v3969_v39  ;;  %v3966_v36 = vsub.f32 %v3958_v33, %v3962_v1  ;;  %v4638_v1 = vld [vmem:[#allocation8 + $0x1b] ss:$0 sm:$0xff] }
0x15aa   :  { %5589 = vrsqrt.f32 %v3976_v6  ;;  %v3970_v34 = vmax.f32 %v3966_v36, 0.0 }
0x15ab   :  { %5591 = vrsqrt.f32 %v3977_v55 }
0x15ac   :  { %v3978_v51 = vadd.f32 1e-05, %v3970_v34 }
0x15ae   :  { %5593 = vrsqrt.f32 %v3978_v51 }
0x15b3   :  { %v5588_v52 = vpop.eup %5587 }
0x15b4   :  { %v3983_v60 = vmul.f32 %v5588_v52, %v3971_v56 }
0x15b6   :  { %v3991_v19 = vmul.f32 %v4627_v59, %v3983_v60 }
0x15b7   :  { %v5590_v27 = vpop.eup %5589 }
0x15b8   :  { %v5592_v7 = vpop.eup %5591  ;;  %v3984_v47 = vmul.f32 %v5590_v27, %v3972_v29  ;;  %v3999_v61 = vadd.f32 %v4628_v5, %v3991_v19 }
0x15b9   :  { %v3985_v18 = vmul.f32 %v5592_v7, %v3973_v17 }
0x15ba   :  { %v3992_v58 = vmul.f32 %v4627_v59, %v3984_v47 }
0x15bb   :  { %v5594_v53 = vpop.eup %5593  ;;  %v3993_v26 = vmul.f32 %v4627_v59, %v3985_v18 }
0x15bc   :  { %v4000_v15 = vadd.f32 %v4628_v5, %v3992_v58  ;;  %v3986_v13 = vmul.f32 %v5594_v53, %v3974_v8 }
0x15bd   :  { %v4001_v12 = vadd.f32 %v4628_v5, %v3993_v26 }
0x15be   :  { %v4019_v3 = vpack.c.bf16 %v4000_v15, %v3999_v61  ;;  %v3994_v62 = vmul.f32 %v4627_v59, %v3986_v13 }
0x15c0   :  { %5199 = vmatprep.mubr.bf16.mxu0 %v4019_v3  ;;  %v4002_v38 = vadd.f32 %v4628_v5, %v3994_v62 }
0x15c2   :  { %v4020_v30 = vpack.c.bf16 %v4002_v38, %v4001_v12 }
0x15c4   :  { %5200 = vmatmul.mubr.bf16.vlgmr.msra.gmra.mxu0 %v4020_v30 }
0x1684   :  { %v5201_v35 = vpop.f32.mrf.mxu0 }
0x1685   :  { %v4117_v32 = vadd.f32 %v5201_v35, %v4629_v23 }
0x1686   :  { %v4108_v42 = vpop.f32.mrf.mxu0 }
0x1687   :  { %v4109_v31 = vadd.f32 %v4629_v23, %v4108_v42  ;;  %v4125_v11 = vmax.f32 %v4117_v32, 0.0 }
0x1688   :  { %v5202_v20 = vpop.f32.mrf.mxu0 }
0x1689   :  { %v4120_v50 = vadd.f32 %v5202_v20, %v4629_v23  ;;  %v4123_v25 = vmax.f32 %v4109_v31, 0.0 }
0x168a   :  { %v4111_v48 = vpop.f32.mrf.mxu0 }
0x168b   :  { %v4112_v63 = vadd.f32 %v4629_v23, %v4111_v48  ;;  %v4126_v9 = vmax.f32 %v4120_v50, 0.0 }
0x168d   :  { %v4124_v10 = vmax.f32 %v4112_v63, 0.0  ;;  %v4144_v43 = vpack.c.bf16 %v4126_v9, %v4125_v11 }
0x168f   :  { %v4143_v21 = vpack.c.bf16 %v4124_v10, %v4123_v25 }
0x1691   :  { %5219 = vmatprep.mubr.bf16.mxu1 %v4143_v21 }
0x1692   :  { %5220 = vmatmul.mubr.bf16.vlgmr.msra.gmra.mxu1 %v4144_v43 }
0x1752   :  { %v5221_v49 = vpop.f32.mrf.mxu1 }
0x1753   :  { %v4241_v14 = vadd.f32 %v5221_v49, %v4638_v1 }
0x1754   :  { %v4232_v39 = vpop.f32.mrf.mxu1 }
0x1755   :  { %v6645_v33 = vadd.f32 %v4241_v14, %v4001_v12  ;;  %v4233_v6 = vadd.f32 %v4638_v1, %v4232_v39 }
0x1756   :  { %v5222_v55 = vpop.f32.mrf.mxu1 }
0x1757   :  { %v4244_v36 = vadd.f32 %v5222_v55, %v4638_v1  ;;  %4257 = vadd.xlane.f32.xlu0 %v6645_v33  ;;  %v4247_v51 = vadd.f32 %v4233_v6, %v3999_v61  ;;  %v4267_v27 = vmul.f32 %v6645_v33, %v6645_v33  ;;  %v4647_v6 = vld [vmem:[#allocation8 + $0x1c] ss:$0 sm:$0xff] }
0x1758   :  { %v4235_v34 = vpop.f32.mrf.mxu1 }
0x1759   :  { %v6648_v56 = vadd.f32 %v4244_v36, %v4002_v38  ;;  %v4236_v52 = vadd.f32 %v4638_v1, %v4235_v34  ;;  %v4265_v59 = vmul.f32 %v4247_v51, %v4247_v51  ;;  %v4327_v36 = vadd.f32 %v6442_v57, %v6591_v41 }
0x175b   :  { %4259 = vadd.xlane.f32.xlu1 %v6648_v56  ;;  %4253 = vadd.xlane.f32.xlu0 %v4247_v51  ;;  %v4248_v60 = vadd.f32 %v4236_v52, %v4000_v15  ;;  %v4268_v17 = vmul.f32 %v6648_v56, %v6648_v56 }
0x175d   :  { %v4266_v29 = vmul.f32 %v4248_v60, %v4248_v60 }
0x175f   :  { %4255 = vadd.xlane.f32.xlu1 %v4248_v60  ;;  %4269 = vadd.xlane.f32.xlu0 %v4265_v59 }
0x1763   :  { %4271 = vadd.xlane.f32.xlu1 %v4266_v29  ;;  %4273 = vadd.xlane.f32.xlu0 %v4267_v27 }
0x1767   :  { %4275 = vadd.xlane.f32.xlu1 %v4268_v17  ;;  %v4648_v17 = vld [vmem:[#allocation8 + $0x1d] ss:$0 sm:$0xff] }
0x17e0   :  { %v4258_v7 = vpop.xlane.xlu0 %4257 }
0x17e1   :  { %v4263_v18 = vmul.f32 0.0078125, %v4258_v7 }
0x17e3   :  { %v4283_v26 = vmul.f32 %v4263_v18, %v4263_v18  ;;  %v4295_v1 = vsub.f32 %v6645_v33, %v4263_v18 }
0x17e4   :  { %v4260_v47 = vpop.xlane.xlu1 %4259  ;;  %v4254_v19 = vpop.xlane.xlu0 %4253 }
0x17e5   :  { %v4261_v5 = vmul.f32 0.0078125, %v4254_v19  ;;  %v4264_v3 = vmul.f32 0.0078125, %v4260_v47  ;;  %v4331_v47 = vadd.f32 %v4327_v36, %v6556_v4 }
0x17e7   :  { %v4281_v53 = vmul.f32 %v4261_v5, %v4261_v5  ;;  %v4284_v20 = vmul.f32 %v4264_v3, %v4264_v3  ;;  %v4293_v21 = vsub.f32 %v4247_v51, %v4261_v5  ;;  %v4296_v34 = vsub.f32 %v6648_v56, %v4264_v3 }
0x17e8   :  { %v4256_v8 = vpop.xlane.xlu1 %4255  ;;  %v4270_v58 = vpop.xlane.xlu0 %4269  ;;  %v4328_v51 = vadd.f32 %v6447_v40, %v6593_v28 }
0x17e9   :  { %v4262_v61 = vmul.f32 0.0078125, %v4256_v8  ;;  %v4277_v15 = vmul.f32 0.0078125, %v4270_v58  ;;  %v4326_v8 = vadd.f32 %v6431_v37, %v6585_v0 }
0x17ea   :  { %v4332_v18 = vadd.f32 %v4328_v51, %v6566_v46 }
0x17eb   :  { %v4285_v13 = vsub.f32 %v4277_v15, %v4281_v53  ;;  %v4282_v38 = vmul.f32 %v4262_v61, %v4262_v61  ;;  %v4294_v39 = vsub.f32 %v4248_v60, %v4262_v61  ;;  %v4325_v60 = vadd.f32 %v6423_v45, %v6583_v22 }
0x17ec   :  { %v4272_v62 = vpop.xlane.xlu1 %4271  ;;  %v4274_v12 = vpop.xlane.xlu0 %4273  ;;  %v4330_v45 = vadd.f32 %v4326_v8, %v6545_v24 }
0x17ed   :  { %v4289_v30 = vmax.f32 %v4285_v13, 0.0  ;;  %v4278_v54 = vmul.f32 0.0078125, %v4272_v62  ;;  %v4279_v44 = vmul.f32 0.0078125, %v4274_v12  ;;  %v4329_v40 = vadd.f32 %v4325_v60, %v6536_v16 }
0x17ef   :  { %v4297_v2 = vadd.f32 1e-05, %v4289_v30  ;;  %v4286_v35 = vsub.f32 %v4278_v54, %v4282_v38  ;;  %v4287_v42 = vsub.f32 %v4279_v44, %v4283_v26 }
0x17f0   :  { %v4276_v23 = vpop.xlane.xlu1 %4275 }
0x17f1   :  { %v4290_v31 = vmax.f32 %v4286_v35, 0.0  ;;  %v4291_v50 = vmax.f32 %v4287_v42, 0.0  ;;  %v4280_v32 = vmul.f32 0.0078125, %v4276_v23  ;;  %5595 = vrsqrt.f32 %v4297_v2 }
0x17f3   :  { %v4298_v48 = vadd.f32 1e-05, %v4290_v31  ;;  %v4299_v63 = vadd.f32 1e-05, %v4291_v50  ;;  %v4288_v9 = vsub.f32 %v4280_v32, %v4284_v20 }
0x17f5   :  { %5597 = vrsqrt.f32 %v4298_v48  ;;  %v4292_v25 = vmax.f32 %v4288_v9, 0.0 }
0x17f6   :  { %5599 = vrsqrt.f32 %v4299_v63 }
0x17f7   :  { %v4300_v10 = vadd.f32 1e-05, %v4292_v25 }
0x17f9   :  { %5601 = vrsqrt.f32 %v4300_v10 }
0x17fe   :  { %v5596_v11 = vpop.eup %5595 }
0x17ff   :  { %v4305_v49 = vmul.f32 %v5596_v11, %v4293_v21 }
0x1801   :  { %v4313_v27 = vmul.f32 %v4647_v6, %v4305_v49 }
0x1802   :  { %v5598_v43 = vpop.eup %5597 }
0x1803   :  { %v5600_v14 = vpop.eup %5599  ;;  %v4306_v52 = vmul.f32 %v5598_v43, %v4294_v39  ;;  %v4321_v41 = vadd.f32 %v4648_v17, %v4313_v27 }
0x1804   :  { %v4307_v55 = vmul.f32 %v5600_v14, %v4295_v1 }
0x1805   :  { %v4314_v5 = vmul.f32 %v4647_v6, %v4306_v52  ;;  %v4333_v58 = vadd.f32 %v4329_v40, %v4321_v41  ;;  %v4650_v52 = vld [vmem:[#allocation8 + $0x23] ss:$0 sm:$0xff] }
0x1806   :  { %v5602_v59 = vpop.eup %5601  ;;  %v4315_v29 = vmul.f32 %v4647_v6, %v4307_v55  ;;  %v4649_v55 = vld [vmem:[#allocation8 + $0x22] ss:$0 sm:$0xff] }
0x1807   :  { %v4308_v7 = vmul.f32 %v5602_v59, %v4296_v34  ;;  %v4322_v4 = vadd.f32 %v4648_v17, %v4314_v5  ;;  %v4351_v53 = vmul.f32 %v4333_v58, %v4333_v58 }
0x1808   :  { %v4323_v33 = vadd.f32 %v4648_v17, %v4315_v29 }
0x1809   :  { %v4316_v19 = vmul.f32 %v4647_v6, %v4308_v7  ;;  %v4334_v22 = vadd.f32 %v4330_v45, %v4322_v4 }
0x180a   :  { %v6664_v57 = vadd.f32 %v4331_v47, %v4323_v33 }
0x180b   :  { %v4324_v56 = vadd.f32 %v4648_v17, %v4316_v19  ;;  %v4352_v46 = vmul.f32 %v4334_v22, %v4334_v22 }
0x180c   :  { %4343 = vadd.xlane.f32.xlu0 %v6664_v57  ;;  %v4353_v37 = vmul.f32 %v6664_v57, %v6664_v57 }
0x180d   :  { %v6671_v28 = vadd.f32 %v4332_v18, %v4324_v56 }
0x180f   :  { %4345 = vadd.xlane.f32.xlu1 %v6671_v28  ;;  %v4354_v16 = vmul.f32 %v6671_v28, %v6671_v28 }
0x1810   :  { %4339 = vadd.xlane.f32.xlu0 %v4333_v58 }
0x1813   :  { %4341 = vadd.xlane.f32.xlu1 %v4334_v22 }
0x1814   :  { %4355 = vadd.xlane.f32.xlu0 %v4351_v53 }
0x1817   :  { %4357 = vadd.xlane.f32.xlu1 %v4352_v46 }
0x1818   :  { %4359 = vadd.xlane.f32.xlu0 %v4353_v37 }
0x181b   :  { %4361 = vadd.xlane.f32.xlu1 %v4354_v16 }
0x1895   :  { %v4344_v0 = vpop.xlane.xlu0 %4343 }
0x1896   :  { %v4349_v62 = vmul.f32 0.0078125, %v4344_v0 }
0x1898   :  { %v4346_v61 = vpop.xlane.xlu1 %4345  ;;  %v4369_v23 = vmul.f32 %v4349_v62, %v4349_v62  ;;  %v4381_v29 = vsub.f32 %v6664_v57, %v4349_v62 }
0x1899   :  { %v4340_v15 = vpop.xlane.xlu0 %4339  ;;  %v4350_v44 = vmul.f32 0.0078125, %v4346_v61 }
0x189a   :  { %v4347_v13 = vmul.f32 0.0078125, %v4340_v15 }
0x189b   :  { %v4370_v9 = vmul.f32 %v4350_v44, %v4350_v44  ;;  %v4382_v47 = vsub.f32 %v6671_v28, %v4350_v44 }
0x189c   :  { %v4342_v24 = vpop.xlane.xlu1 %4341  ;;  %v4367_v12 = vmul.f32 %v4347_v13, %v4347_v13  ;;  %v4379_v39 = vsub.f32 %v4333_v58, %v4347_v13 }
0x189d   :  { %v4348_v26 = vmul.f32 0.0078125, %v4342_v24  ;;  %v4356_v3 = vpop.xlane.xlu0 %4355 }
0x189e   :  { %v4363_v38 = vmul.f32 0.0078125, %v4356_v3 }
0x189f   :  { %v4368_v2 = vmul.f32 %v4348_v26, %v4348_v26  ;;  %v4380_v34 = vsub.f32 %v4334_v22, %v4348_v26 }
0x18a0   :  { %v4371_v30 = vsub.f32 %v4363_v38, %v4367_v12  ;;  %v4358_v54 = vpop.xlane.xlu1 %4357 }
0x18a1   :  { %v4364_v35 = vmul.f32 0.0078125, %v4358_v54  ;;  %v4360_v42 = vpop.xlane.xlu0 %4359 }
0x18a2   :  { %v4375_v20 = vmax.f32 %v4371_v30, 0.0  ;;  %v4365_v31 = vmul.f32 0.0078125, %v4360_v42 }
0x18a3   :  { %v4372_v50 = vsub.f32 %v4364_v35, %v4368_v2 }
0x18a4   :  { %v4383_v32 = vadd.f32 1e-05, %v4375_v20  ;;  %v4373_v48 = vsub.f32 %v4365_v31, %v4369_v23  ;;  %v4362_v63 = vpop.xlane.xlu1 %4361 }
0x18a5   :  { %v4376_v25 = vmax.f32 %v4372_v50, 0.0  ;;  %v4366_v10 = vmul.f32 0.0078125, %v4362_v63 }
0x18a6   :  { %5603 = vrsqrt.f32 %v4383_v32  ;;  %v4377_v11 = vmax.f32 %v4373_v48, 0.0 }
0x18a7   :  { %v4384_v21 = vadd.f32 1e-05, %v4376_v25  ;;  %v4374_v43 = vsub.f32 %v4366_v10, %v4370_v9 }
0x18a8   :  { %v4385_v1 = vadd.f32 1e-05, %v4377_v11 }
0x18a9   :  { %5605 = vrsqrt.f32 %v4384_v21  ;;  %v4378_v49 = vmax.f32 %v4374_v43, 0.0 }
0x18aa   :  { %5607 = vrsqrt.f32 %v4385_v1 }
0x18ab   :  { %v4386_v14 = vadd.f32 1e-05, %v4378_v49 }
0x18ad   :  { %5609 = vrsqrt.f32 %v4386_v14 }
0x18b3   :  { %v5604_v6 = vpop.eup %5603 }
0x18b4   :  { %v4391_v36 = vmul.f32 %v5604_v6, %v4379_v39 }
0x18b6   :  { %v5606_v59 = vpop.eup %5605  ;;  %v4399_v27 = vmul.f32 %v4649_v55, %v4391_v36 }
0x18b7   :  { %v5608_v17 = vpop.eup %5607  ;;  %v4392_v7 = vmul.f32 %v5606_v59, %v4380_v34 }
0x18b8   :  { %v4393_v51 = vmul.f32 %v5608_v17, %v4381_v29  ;;  %v4407_v33 = vadd.f32 %v4650_v52, %v4399_v27 }
0x18b9   :  { %v4400_v60 = vmul.f32 %v4649_v55, %v4392_v7 }
0x18ba   :  { %v5610_v19 = vpop.eup %5609  ;;  %v4401_v5 = vmul.f32 %v4649_v55, %v4393_v51  ;;  %v4651_v41 = vmul.f32 -1.442695, %v4407_v33 }
0x18bb   :  { %v4394_v56 = vmul.f32 %v5610_v19, %v4382_v47  ;;  %v4408_v18 = vadd.f32 %v4650_v52, %v4400_v60 }
0x18bc   :  { %v4409_v8 = vadd.f32 %v4650_v52, %v4401_v5  ;;  %5611 = vpow2.f32 %v4651_v41 }
0x18bd   :  { %v4402_v40 = vmul.f32 %v4649_v55, %v4394_v56  ;;  %v4652_v4 = vmul.f32 -1.442695, %v4408_v18 }
0x18be   :  { %v4653_v58 = vmul.f32 -1.442695, %v4409_v8 }
0x18bf   :  { %v4410_v45 = vadd.f32 %v4650_v52, %v4402_v40  ;;  %5613 = vpow2.f32 %v4652_v4 }
0x18c0   :  { %5615 = vpow2.f32 %v4653_v58 }
0x18c1   :  { %v4654_v57 = vmul.f32 -1.442695, %v4410_v45 }
0x18c3   :  { %5617 = vpow2.f32 %v4654_v57 }
0x18c9   :  { %v5612_v22 = vpop.eup %5611 }
0x18ca   :  { %v4423_v53 = vadd.f32 1.0, %v5612_v22 }
0x18cc   :  { %v5614_v46 = vpop.eup %5613  ;;  %5619 = vrcp.f32 %v4423_v53 }
0x18cd   :  { %v5616_v28 = vpop.eup %5615  ;;  %v4424_v37 = vadd.f32 1.0, %v5614_v46 }
0x18ce   :  { %v4425_v16 = vadd.f32 1.0, %v5616_v28 }
0x18cf   :  { %5621 = vrcp.f32 %v4424_v37 }
0x18d0   :  { %v5618_v0 = vpop.eup %5617  ;;  %5623 = vrcp.f32 %v4425_v16 }
0x18d1   :  { %v4426_v61 = vadd.f32 1.0, %v5618_v0 }
0x18d3   :  { %5625 = vrcp.f32 %v4426_v61 }
0x18d9   :  { %v5620_v15 = vpop.eup %5619 }
0x18da   :  { %4435 = vst [vmem:[#allocation10] sm:$0xff] %v5620_v15 }
0x18dc   :  { %v5622_v13 = vpop.eup %5621 }
0x18dd   :  { %v5624_v24 = vpop.eup %5623  ;;  %4436 = vst [vmem:[#allocation10 + $0x8] sm:$0xff] %v5622_v13 }
0x18de   :  { %4437 = vst [vmem:[#allocation10 + $0x10] sm:$0xff] %v5624_v24 }
0x18e0   :  { %v5626_v26 = vpop.eup %5625 }
0x18e1   :  { %4438 = vst [vmem:[#allocation10 + $0x18] sm:$0xff] %v5626_v26 }
0x18e2   :  { %5734 = shalt.err (!%p5731_p10)
}
0x18e3   :  { %4450 = dma.vmem_to_hbm [thread:$0]  %s4445_s14, 512, %s6691_s4, [#allocation4], %s5755_s25, %s5755_s25, %s5756_s26  }
0x18e4   :  { %5749 = dma.done.wait [#allocation4], 512  }
0x18e5   :  { %5750 = vsyncadd [#allocation4], 4294966784 }
0x18e6   :  { %4454 = vsyncpa [#allocation3], 1 }
0x18e7   :  { %4455 = vsyncpa [#allocation7], 1 }
0x18e8   :  { %4456 = vsyncpa [#allocation4], 1 }
0x18e9   :  { %4457 = vsyncpa [#allocation5], 1 }

</bundles_post_ra>
